<compile_context>
chip_gen: v7x
topology: tpu7x:2x2x1
jax: 0.10.0
libtpu: 0.0.40
codegen_flags: <defaults>
</compile_context>

<pallas_src>
import jax
import jax.numpy as jnp
from jax import lax
from jax.experimental import pallas as pl
from jax.experimental.pallas import tpu as pltpu

NUM_DIRECTION = 32


# ----------------------------------------------------------------------------
# Fused DEBlock kernel: one batch element per grid step, (C, N) lane-dense.
# ----------------------------------------------------------------------------
def _deblock_kernel(f_ref, dp_ref, idxw_ref,
                    vec_ref, wde1_ref, bde1_ref, wde2_ref, bde2_ref,
                    w123_ref, bd_ref, slp_ref, blp_ref,
                    wm1_ref, bm1_ref, wm2_ref,
                    out_ref):
    f = f_ref[0]                         # (C, N)
    C, N = f.shape
    dp = dp_ref[0]                       # (3, K, N) relative-position coords
    K = dp.shape[1]
    M = vec_ref.shape[1]                 # num_direction = 32

    # ---------------- DirectionalEncoding -----------------------------------
    x, y, z = dp[0], dp[1], dp[2]        # (K, N) each
    # F.normalize(dp): one EUP rsqrt on the clamped squared norm (eps=1e-12).
    inv = lax.rsqrt(jnp.maximum(x * x + y * y + z * z, 1e-24))
    xs, ys, zs = x * inv, y * inv, z * inv

    # hoisted lane-broadcasts of the unit direction vectors (VPU-only path;
    # a K=3 MXU matmul would massively under-utilize the systolic array)
    vec = vec_ref[...]                   # (3, M, 1)
    vx = jnp.broadcast_to(vec[0], (M, N))
    vy = jnp.broadcast_to(vec[1], (M, N))
    vz = jnp.broadcast_to(vec[2], (M, N))

    def theta(k):                        # (M, N)
        return vx * xs[k:k + 1, :] + vy * ys[k:k + 1, :] + vz * zs[k:k + 1, :]

    tmax = theta(0)
    for k in range(1, K):                # static unroll, small VPU work
        tmax = jnp.maximum(tmax, theta(k))

    h = jnp.dot(wde1_ref[...], tmax, preferred_element_type=jnp.float32) + bde1_ref[...]
    # TODO(synk): torch nn.GELU() default is exact erf; tanh approximation used
    # here for guaranteed Mosaic lowering.
    h = jax.nn.gelu(h, approximate=True)
    pe = jnp.dot(wde2_ref[...], h, preferred_element_type=jnp.float32) + bde2_ref[...]

    # ---------------- LPFMA --------------------------------------------------
    # one stacked MXU launch: [W1; W2; W3-W1] @ f   -> (3C, N)
    f123 = jnp.dot(w123_ref[...], f, preferred_element_type=jnp.float32)
    f12 = f123[:2 * C]                   # bias-free gather source (2C, N)
    fd = f123[2 * C:]                    # (W3 - W1) f                (C, N)

    # hi/lo bf16 split of the gather source, stacked along M so the gather is
    # exact-to-~f32 yet feeds the MXU with bf16 operands in one launch.
    hi = f12.astype(jnp.bfloat16)
    lo = (f12 - hi.astype(jnp.float32)).astype(jnp.bfloat16)
    src = jnp.concatenate([hi, lo], axis=0)           # (4C, N) bf16

    # one wide (N_src, K*N_dst) one-hot; column k*N+n selects neighbour k of
    # destination point n.  idxw is pre-flattened lane-wide in the wrapper.
    idxw = idxw_ref[0]                                 # (1, K*N) int32
    src_ids = lax.broadcasted_iota(jnp.int32, (N, K * N), 0)
    onehot = (src_ids == idxw).astype(jnp.bfloat16)    # (N, K*N) bf16 (0/1 exact)

    gw = jnp.dot(src, onehot, preferred_element_type=jnp.float32)  # (4C, K*N)
    gs = gw[:2 * C] + gw[2 * C:]                       # hi + lo -> (2C, K*N)

    # running max over the K lane-aligned 128-lane slices (pure VPU vmax)
    g = gs[:, :N]
    for k in range(1, K):
        g = jnp.maximum(g, gs[:, k * N:(k + 1) * N])

    # max_k(f1[idx]-f1) + (max_k(f2[idx]-f2)+f2) + f3
    #   = g1 + g2 + (W3-W1) f + (b2 + b3)       (per-channel biases commute
    #     through the one-hot gather and the max, so they fold post-gather)
    agg = (g[:C] + g[C:] + fd + bd_ref[...]) * slp_ref[...] + blp_ref[...]

    f1 = f + agg + pe                    # bn0 = Identity (bn_after=False)

    # ---------------- Mlp + residual -----------------------------------------
    hm = jnp.dot(wm1_ref[...], f1, preferred_element_type=jnp.float32) + bm1_ref[...]
    hm = jax.nn.gelu(hm, approximate=True)
    f2 = f1 + jnp.dot(wm2_ref[...], hm, preferred_element_type=jnp.float32)

    out_ref[0] = f2.astype(out_ref.dtype)


def deblock_forward(p, f, dp, pe_prev, qidx, kernel_params):
    """DEBlock forward. f: (B,C,N), dp: (B,3,N,K), qidx: (B,N,K) int."""
    B, C, N = f.shape
    K = qidx.shape[-1]
    # small auxiliary tensors only; the feature tensor never leaves NCL layout
    dp_t = jnp.transpose(dp, (0, 1, 3, 2))                       # (B, 3, K, N)
    # lane-wide neighbour indices: column k*N + n holds qidx[b, n, k]
    idx_w = jnp.transpose(qidx.astype(jnp.int32), (0, 2, 1)).reshape(B, 1, K * N)

    def bat(shape):                      # per-batch-element block
        nd = len(shape)
        return pl.BlockSpec((1,) + shape, lambda b: (b,) + (0,) * nd)

    def rep(arr):                        # replicated (weights stay resident)
        nd = arr.ndim
        # TODO(synk): pipeline_mode=pl.Buffered(1) would skip double-buffering
        # these weights; negligible at demo shapes, useful VMEM headroom once
        # production N-tiling pushes the one-hot toward v7x's 64 MiB VMEM.
        return pl.BlockSpec(arr.shape, lambda b: (0,) * nd)

    # TODO(synk): for production point counts, add a destination-point tile
    # grid axis (the gather source f12 must stay resident for the full N) and
    # size tiles against v7x's 64 MiB physical / ~32 MiB scoped VMEM — the
    # O(N_src * tile_dst) one-hot, not the weights, is the limiter.
    # TODO(synk): on single-TC chips (v5e/v6e) with many small batch elements,
    # fold several batch elements into the lane dimension per grid step; keep
    # B as a "parallel" grid axis on v7x so both TensorCores get work.
    f_out = pl.pallas_call(
        _deblock_kernel,
        out_shape=jax.ShapeDtypeStruct((B, C, N), jnp.float32),
        grid=(B,),
        in_specs=[bat((C, N)), bat((3, K, N)), bat((1, K * N))]
                 + [rep(w) for w in kernel_params],
        out_specs=bat((C, N)),
        compiler_params=pltpu.CompilerParams(
            dimension_semantics=("parallel",)),
    )(f, dp_t, idx_w, *kernel_params)
    return [p, f_out, dp, pe_prev, qidx]


# ----------------------------------------------------------------------------
# Deterministic parameters mirroring DEBlock.__init__ (eval-mode BN folded).
# ----------------------------------------------------------------------------
def build_deblock_params(key, c):
    assert c % 2 == 0
    ks = list(jax.random.split(key, 16))

    def mk_w(k, co, ci):
        return jax.random.normal(k, (co, ci), jnp.float32) / jnp.sqrt(ci)

    def mk_b(k, co):
        return 0.1 * jax.random.normal(k, (co,), jnp.float32)

    def mk_bn(k, co):
        kg, kb, km, kv = jax.random.split(k, 4)
        gamma = 1.0 + 0.1 * jax.random.normal(kg, (co,), jnp.float32)
        beta = 0.1 * jax.random.normal(kb, (co,), jnp.float32)
        mean = 0.1 * jax.random.normal(km, (co,), jnp.float32)
        var = 1.0 + 0.1 * jax.random.uniform(kv, (co,), jnp.float32)
        scale = gamma / jnp.sqrt(var + 1e-5)
        bias = beta - mean * scale
        return scale, bias

    # DirectionalEncoding(3, c)
    dirv = jax.random.normal(ks[0], (NUM_DIRECTION, 3), jnp.float32)
    vecn = dirv / jnp.maximum(
        jnp.sqrt(jnp.sum(dirv * dirv, axis=1, keepdims=True)), 1e-12)
    w_de1 = mk_w(ks[1], c // 2, NUM_DIRECTION)       # bias-free conv
    s_de1, b_de1 = mk_bn(ks[2], c // 2)
    w_de2 = mk_w(ks[3], c, c // 2)
    b_de2 = mk_b(ks[4], c)

    # LPFMA(c, c)
    w1 = mk_w(ks[5], c, c); b1 = mk_b(ks[6], c)
    w2 = mk_w(ks[7], c, c); b2 = mk_b(ks[8], c)
    w3 = mk_w(ks[9], c, c); b3 = mk_b(ks[10], c)
    s_lp, b_lp = mk_bn(ks[11], c)

    # Mlp(c, 2)
    wm1 = mk_w(ks[12], 2 * c, c)                     # bias-free conv
    s_m, b_m = mk_bn(ks[13], 2 * c)
    wm2 = mk_w(ks[14], c, 2 * c)                     # bias-free conv

    col = lambda v: v.reshape(-1, 1)
    kernel_params = (
        jnp.transpose(vecn).reshape(3, NUM_DIRECTION, 1),   # unit dir vectors
        w_de1 * s_de1[:, None], col(b_de1),                 # DE conv1 (+BN folded)
        w_de2, col(b_de2),                                  # DE conv2
        jnp.concatenate([w1, w2, w3 - w1], axis=0),         # stacked [W1;W2;W3-W1]
        col(b2 + b3),                                       # post-gather bias fold
        col(s_lp), col(b_lp),                               # LPFMA BN (folded)
        wm1 * s_m[:, None], col(b_m),                       # Mlp conv1 (+BN folded)
        wm2,
    )
    raw_params = (vecn, w_de1, s_de1, b_de1, w_de2, b_de2,
                  w1, b1, w2, b2, w3, b3, s_lp, b_lp,
                  wm1, s_m, b_m, wm2)
    return kernel_params, raw_params


# ----------------------------------------------------------------------------
# Pure-JAX reference following the torch module op-by-op (unfolded params).
# ----------------------------------------------------------------------------
def _gelu(x):
    return jax.nn.gelu(x, approximate=True)


def ref_deblock_forward(p, f, dp, pe_prev, qidx, raw):
    (vecn, w_de1, s_de1, b_de1, w_de2, b_de2,
     w1, b1, w2, b2, w3, b3, s_lp, b_lp,
     wm1, s_m, b_m, wm2) = raw

    # DirectionalEncoding
    dpn = dp / jnp.maximum(jnp.sqrt(jnp.sum(dp * dp, axis=1, keepdims=True)), 1e-12)
    theta = jnp.einsum('md,bdnk->bmnk', vecn, dpn)
    tmax = theta.max(axis=-1)                                   # (B, 32, N)
    h = jnp.einsum('oi,bin->bon', w_de1, tmax)
    h = _gelu(h * s_de1[None, :, None] + b_de1[None, :, None])
    pe = jnp.einsum('oi,bin->bon', w_de2, h) + b_de2[None, :, None]

    # LPFMA
    def conv(x, w, b):
        return jnp.einsum('oi,bin->bon', w, x) + b[None, :, None]

    f1 = conv(f, w1, b1)
    f2 = conv(f, w2, b2)
    f3 = conv(f, w3, b3)

    def nbr_max(x):                                             # (B,C,N)
        g = jax.vmap(lambda xb, ib: xb[:, ib])(x, qidx)         # (B,C,N,K)
        return g.max(axis=-1)

    f_agg = nbr_max(f1) - f1                                    # knn_edge_maxpooling
    f_agg2 = (nbr_max(f2) - f2) + f2
    agg = (f_agg + f_agg2 + f3) * s_lp[None, :, None] + b_lp[None, :, None]

    fa = f + (agg + pe)                                         # bn0 = Identity
    hm = _gelu(jnp.einsum('oi,bin->bon', wm1, fa) * s_m[None, :, None]
               + b_m[None, :, None])
    fb = fa + jnp.einsum('oi,bin->bon', wm2, hm)
    return [p, fb, dp, pe_prev, qidx]


# ----------------------------------------------------------------------------
if __name__ == "__main__":
    key = jax.random.PRNGKey(0)
    B, C, N, K = 2, 64, 128, 16          # batch, channels, points, kNN size

    kp, kf, kdp, kidx, kpar = jax.random.split(key, 5)
    p = jax.random.normal(kp, (B, N, 3), jnp.float32)
    f = jax.random.normal(kf, (B, C, N), jnp.float32)
    dp = jax.random.normal(kdp, (B, 3, N, K), jnp.float32)
    qidx = jax.random.randint(kidx, (B, N, K), 0, N, dtype=jnp.int32)
    pe_prev = jnp.zeros((B, C, N), jnp.float32)

    kernel_params, raw_params = build_deblock_params(kpar, C)

    out_list = deblock_forward(p, f, dp, pe_prev, qidx, kernel_params)
    f_out = jax.block_until_ready(out_list[1])
    assert f_out.shape == (B, C, N), f_out.shape

    ref_list = ref_deblock_forward(p, f, dp, pe_prev, qidx, raw_params)
    ref_f = jax.block_until_ready(ref_list[1])

    # tolerance accounts for TPU reduced-precision f32 matmuls in the XLA
    # reference path vs the Pallas MXU matmuls (the bf16 hi/lo gather itself
    # reconstructs the gathered values to ~f32 precision)
    max_err = float(jnp.max(jnp.abs(f_out - ref_f)))
    assert max_err < 5e-2, f"mismatch vs reference: {max_err}"

    print("KERNEL_OK")
</pallas_src>

<mosaic_0001>
module attributes {stable_mosaic.version = 11 : i64} {
  func.func @_deblock_kernel(%arg0: i32, %arg1: memref<1x64x128xf32, #tpu.memory_space<vmem>>, %arg2: memref<1x3x16x128xf32, #tpu.memory_space<vmem>>, %arg3: memref<1x1x2048xi32, #tpu.memory_space<vmem>>, %arg4: memref<3x32x1xf32, #tpu.memory_space<vmem>>, %arg5: memref<32x32xf32, #tpu.memory_space<vmem>>, %arg6: memref<32x1xf32, #tpu.memory_space<vmem>>, %arg7: memref<64x32xf32, #tpu.memory_space<vmem>>, %arg8: memref<64x1xf32, #tpu.memory_space<vmem>>, %arg9: memref<192x64xf32, #tpu.memory_space<vmem>>, %arg10: memref<64x1xf32, #tpu.memory_space<vmem>>, %arg11: memref<64x1xf32, #tpu.memory_space<vmem>>, %arg12: memref<64x1xf32, #tpu.memory_space<vmem>>, %arg13: memref<128x64xf32, #tpu.memory_space<vmem>>, %arg14: memref<128x1xf32, #tpu.memory_space<vmem>>, %arg15: memref<64x128xf32, #tpu.memory_space<vmem>>, %arg16: memref<1x64x128xf32, #tpu.memory_space<vmem>>) attributes {dimension_semantics = [#tpu.dimension_semantics<parallel>], iteration_bounds = array<i64: 2>, scalar_prefetch = 0 : i64, scratch_operands = 0 : i64, tpu.core_type = #tpu.core_type<tc>, window_params = [{transform_indices = @transform_0, window_bounds = array<i64: 1, 64, 128>}, {transform_indices = @transform_1, window_bounds = array<i64: 1, 3, 16, 128>}, {transform_indices = @transform_2, window_bounds = array<i64: 1, 1, 2048>}, {pipeline_mode = #tpu.pipeline_mode<synchronous>, transform_indices = @transform_3, window_bounds = array<i64: 3, 32, 1>}, {pipeline_mode = #tpu.pipeline_mode<synchronous>, transform_indices = @transform_4, window_bounds = array<i64: 32, 32>}, {pipeline_mode = #tpu.pipeline_mode<synchronous>, transform_indices = @transform_5, window_bounds = array<i64: 32, 1>}, {pipeline_mode = #tpu.pipeline_mode<synchronous>, transform_indices = @transform_6, window_bounds = array<i64: 64, 32>}, {pipeline_mode = #tpu.pipeline_mode<synchronous>, transform_indices = @transform_7, window_bounds = array<i64: 64, 1>}, {pipeline_mode = #tpu.pipeline_mode<synchronous>, transform_indices = @transform_8, window_bounds = array<i64: 192, 64>}, {pipeline_mode = #tpu.pipeline_mode<synchronous>, transform_indices = @transform_9, window_bounds = array<i64: 64, 1>}, {pipeline_mode = #tpu.pipeline_mode<synchronous>, transform_indices = @transform_10, window_bounds = array<i64: 64, 1>}, {pipeline_mode = #tpu.pipeline_mode<synchronous>, transform_indices = @transform_11, window_bounds = array<i64: 64, 1>}, {pipeline_mode = #tpu.pipeline_mode<synchronous>, transform_indices = @transform_12, window_bounds = array<i64: 128, 64>}, {pipeline_mode = #tpu.pipeline_mode<synchronous>, transform_indices = @transform_13, window_bounds = array<i64: 128, 1>}, {pipeline_mode = #tpu.pipeline_mode<synchronous>, transform_indices = @transform_14, window_bounds = array<i64: 64, 128>}, {transform_indices = @transform_15, window_bounds = array<i64: 1, 64, 128>}]} {
    %c0 = arith.constant 0 : index
    %c0_0 = arith.constant 0 : index
    %c0_1 = arith.constant 0 : index
    %0 = vector.load %arg1[%c0, %c0_0, %c0_1] : memref<1x64x128xf32, #tpu.memory_space<vmem>>, vector<1x64x128xf32>
    %1 = vector.shape_cast %0 : vector<1x64x128xf32> to vector<64x128xf32>
    %c0_2 = arith.constant 0 : index
    %c0_3 = arith.constant 0 : index
    %c0_4 = arith.constant 0 : index
    %c0_5 = arith.constant 0 : index
    %2 = vector.load %arg2[%c0_2, %c0_3, %c0_4, %c0_5] : memref<1x3x16x128xf32, #tpu.memory_space<vmem>>, vector<1x3x16x128xf32>
    %3 = vector.shape_cast %2 : vector<1x3x16x128xf32> to vector<3x16x128xf32>
    %4 = vector.extract_strided_slice %3 {offsets = [0, 0, 0], sizes = [1, 16, 128], strides = [1, 1, 1]} : vector<3x16x128xf32> to vector<1x16x128xf32>
    %5 = vector.shape_cast %4 : vector<1x16x128xf32> to vector<16x128xf32>
    %6 = vector.extract_strided_slice %3 {offsets = [1, 0, 0], sizes = [1, 16, 128], strides = [1, 1, 1]} : vector<3x16x128xf32> to vector<1x16x128xf32>
    %7 = vector.shape_cast %6 : vector<1x16x128xf32> to vector<16x128xf32>
    %8 = vector.extract_strided_slice %3 {offsets = [2, 0, 0], sizes = [1, 16, 128], strides = [1, 1, 1]} : vector<3x16x128xf32> to vector<1x16x128xf32>
    %9 = vector.shape_cast %8 : vector<1x16x128xf32> to vector<16x128xf32>
    %10 = arith.mulf %5, %5 : vector<16x128xf32>
    %11 = arith.mulf %7, %7 : vector<16x128xf32>
    %12 = arith.addf %10, %11 : vector<16x128xf32>
    %13 = arith.mulf %9, %9 : vector<16x128xf32>
    %14 = arith.addf %12, %13 : vector<16x128xf32>
    %cst = arith.constant 1.000000e-24 : f32
    %15 = vector.broadcast %cst : f32 to vector<16x128xf32>
    %16 = arith.maximumf %14, %15 : vector<16x128xf32>
    %17 = math.rsqrt %16 : vector<16x128xf32>
    %18 = arith.mulf %5, %17 : vector<16x128xf32>
    %19 = arith.mulf %7, %17 : vector<16x128xf32>
    %20 = arith.mulf %9, %17 : vector<16x128xf32>
    %c0_6 = arith.constant 0 : index
    %c0_7 = arith.constant 0 : index
    %c0_8 = arith.constant 0 : index
    %21 = vector.load %arg4[%c0_6, %c0_7, %c0_8] : memref<3x32x1xf32, #tpu.memory_space<vmem>>, vector<3x32x1xf32>
    %22 = vector.extract_strided_slice %21 {offsets = [0, 0, 0], sizes = [1, 32, 1], strides = [1, 1, 1]} : vector<3x32x1xf32> to vector<1x32x1xf32>
    %23 = vector.shape_cast %22 : vector<1x32x1xf32> to vector<32x1xf32>
    %24 = vector.shape_cast %23 : vector<32x1xf32> to vector<32x1xf32>
    %25 = vector.broadcast %24 : vector<32x1xf32> to vector<32x128xf32>
    %26 = vector.extract_strided_slice %21 {offsets = [1, 0, 0], sizes = [1, 32, 1], strides = [1, 1, 1]} : vector<3x32x1xf32> to vector<1x32x1xf32>
    %27 = vector.shape_cast %26 : vector<1x32x1xf32> to vector<32x1xf32>
    %28 = vector.shape_cast %27 : vector<32x1xf32> to vector<32x1xf32>
    %29 = vector.broadcast %28 : vector<32x1xf32> to vector<32x128xf32>
    %30 = vector.extract_strided_slice %21 {offsets = [2, 0, 0], sizes = [1, 32, 1], strides = [1, 1, 1]} : vector<3x32x1xf32> to vector<1x32x1xf32>
    %31 = vector.shape_cast %30 : vector<1x32x1xf32> to vector<32x1xf32>
    %32 = vector.shape_cast %31 : vector<32x1xf32> to vector<32x1xf32>
    %33 = vector.broadcast %32 : vector<32x1xf32> to vector<32x128xf32>
    %34 = vector.extract_strided_slice %18 {offsets = [0, 0], sizes = [1, 128], strides = [1, 1]} : vector<16x128xf32> to vector<1x128xf32>
    %35 = vector.broadcast %34 : vector<1x128xf32> to vector<32x128xf32>
    %36 = arith.mulf %25, %35 : vector<32x128xf32>
    %37 = vector.extract_strided_slice %19 {offsets = [0, 0], sizes = [1, 128], strides = [1, 1]} : vector<16x128xf32> to vector<1x128xf32>
    %38 = vector.broadcast %37 : vector<1x128xf32> to vector<32x128xf32>
    %39 = arith.mulf %29, %38 : vector<32x128xf32>
    %40 = arith.addf %36, %39 : vector<32x128xf32>
    %41 = vector.extract_strided_slice %20 {offsets = [0, 0], sizes = [1, 128], strides = [1, 1]} : vector<16x128xf32> to vector<1x128xf32>
    %42 = vector.broadcast %41 : vector<1x128xf32> to vector<32x128xf32>
    %43 = arith.mulf %33, %42 : vector<32x128xf32>
    %44 = arith.addf %40, %43 : vector<32x128xf32>
    %45 = vector.extract_strided_slice %18 {offsets = [1, 0], sizes = [1, 128], strides = [1, 1]} : vector<16x128xf32> to vector<1x128xf32>
    %46 = vector.broadcast %45 : vector<1x128xf32> to vector<32x128xf32>
    %47 = arith.mulf %25, %46 : vector<32x128xf32>
    %48 = vector.extract_strided_slice %19 {offsets = [1, 0], sizes = [1, 128], strides = [1, 1]} : vector<16x128xf32> to vector<1x128xf32>
    %49 = vector.broadcast %48 : vector<1x128xf32> to vector<32x128xf32>
    %50 = arith.mulf %29, %49 : vector<32x128xf32>
    %51 = arith.addf %47, %50 : vector<32x128xf32>
    %52 = vector.extract_strided_slice %20 {offsets = [1, 0], sizes = [1, 128], strides = [1, 1]} : vector<16x128xf32> to vector<1x128xf32>
    %53 = vector.broadcast %52 : vector<1x128xf32> to vector<32x128xf32>
    %54 = arith.mulf %33, %53 : vector<32x128xf32>
    %55 = arith.addf %51, %54 : vector<32x128xf32>
    %56 = arith.maximumf %44, %55 : vector<32x128xf32>
    %57 = vector.extract_strided_slice %18 {offsets = [2, 0], sizes = [1, 128], strides = [1, 1]} : vector<16x128xf32> to vector<1x128xf32>
    %58 = vector.broadcast %57 : vector<1x128xf32> to vector<32x128xf32>
    %59 = arith.mulf %25, %58 : vector<32x128xf32>
    %60 = vector.extract_strided_slice %19 {offsets = [2, 0], sizes = [1, 128], strides = [1, 1]} : vector<16x128xf32> to vector<1x128xf32>
    %61 = vector.broadcast %60 : vector<1x128xf32> to vector<32x128xf32>
    %62 = arith.mulf %29, %61 : vector<32x128xf32>
    %63 = arith.addf %59, %62 : vector<32x128xf32>
    %64 = vector.extract_strided_slice %20 {offsets = [2, 0], sizes = [1, 128], strides = [1, 1]} : vector<16x128xf32> to vector<1x128xf32>
    %65 = vector.broadcast %64 : vector<1x128xf32> to vector<32x128xf32>
    %66 = arith.mulf %33, %65 : vector<32x128xf32>
    %67 = arith.addf %63, %66 : vector<32x128xf32>
    %68 = arith.maximumf %56, %67 : vector<32x128xf32>
    %69 = vector.extract_strided_slice %18 {offsets = [3, 0], sizes = [1, 128], strides = [1, 1]} : vector<16x128xf32> to vector<1x128xf32>
    %70 = vector.broadcast %69 : vector<1x128xf32> to vector<32x128xf32>
    %71 = arith.mulf %25, %70 : vector<32x128xf32>
    %72 = vector.extract_strided_slice %19 {offsets = [3, 0], sizes = [1, 128], strides = [1, 1]} : vector<16x128xf32> to vector<1x128xf32>
    %73 = vector.broadcast %72 : vector<1x128xf32> to vector<32x128xf32>
    %74 = arith.mulf %29, %73 : vector<32x128xf32>
    %75 = arith.addf %71, %74 : vector<32x128xf32>
    %76 = vector.extract_strided_slice %20 {offsets = [3, 0], sizes = [1, 128], strides = [1, 1]} : vector<16x128xf32> to vector<1x128xf32>
    %77 = vector.broadcast %76 : vector<1x128xf32> to vector<32x128xf32>
    %78 = arith.mulf %33, %77 : vector<32x128xf32>
    %79 = arith.addf %75, %78 : vector<32x128xf32>
    %80 = arith.maximumf %68, %79 : vector<32x128xf32>
    %81 = vector.extract_strided_slice %18 {offsets = [4, 0], sizes = [1, 128], strides = [1, 1]} : vector<16x128xf32> to vector<1x128xf32>
    %82 = vector.broadcast %81 : vector<1x128xf32> to vector<32x128xf32>
    %83 = arith.mulf %25, %82 : vector<32x128xf32>
    %84 = vector.extract_strided_slice %19 {offsets = [4, 0], sizes = [1, 128], strides = [1, 1]} : vector<16x128xf32> to vector<1x128xf32>
    %85 = vector.broadcast %84 : vector<1x128xf32> to vector<32x128xf32>
    %86 = arith.mulf %29, %85 : vector<32x128xf32>
    %87 = arith.addf %83, %86 : vector<32x128xf32>
    %88 = vector.extract_strided_slice %20 {offsets = [4, 0], sizes = [1, 128], strides = [1, 1]} : vector<16x128xf32> to vector<1x128xf32>
    %89 = vector.broadcast %88 : vector<1x128xf32> to vector<32x128xf32>
    %90 = arith.mulf %33, %89 : vector<32x128xf32>
    %91 = arith.addf %87, %90 : vector<32x128xf32>
    %92 = arith.maximumf %80, %91 : vector<32x128xf32>
    %93 = vector.extract_strided_slice %18 {offsets = [5, 0], sizes = [1, 128], strides = [1, 1]} : vector<16x128xf32> to vector<1x128xf32>
    %94 = vector.broadcast %93 : vector<1x128xf32> to vector<32x128xf32>
    %95 = arith.mulf %25, %94 : vector<32x128xf32>
    %96 = vector.extract_strided_slice %19 {offsets = [5, 0], sizes = [1, 128], strides = [1, 1]} : vector<16x128xf32> to vector<1x128xf32>
    %97 = vector.broadcast %96 : vector<1x128xf32> to vector<32x128xf32>
    %98 = arith.mulf %29, %97 : vector<32x128xf32>
    %99 = arith.addf %95, %98 : vector<32x128xf32>
    %100 = vector.extract_strided_slice %20 {offsets = [5, 0], sizes = [1, 128], strides = [1, 1]} : vector<16x128xf32> to vector<1x128xf32>
    %101 = vector.broadcast %100 : vector<1x128xf32> to vector<32x128xf32>
    %102 = arith.mulf %33, %101 : vector<32x128xf32>
    %103 = arith.addf %99, %102 : vector<32x128xf32>
    %104 = arith.maximumf %92, %103 : vector<32x128xf32>
    %105 = vector.extract_strided_slice %18 {offsets = [6, 0], sizes = [1, 128], strides = [1, 1]} : vector<16x128xf32> to vector<1x128xf32>
    %106 = vector.broadcast %105 : vector<1x128xf32> to vector<32x128xf32>
    %107 = arith.mulf %25, %106 : vector<32x128xf32>
    %108 = vector.extract_strided_slice %19 {offsets = [6, 0], sizes = [1, 128], strides = [1, 1]} : vector<16x128xf32> to vector<1x128xf32>
    %109 = vector.broadcast %108 : vector<1x128xf32> to vector<32x128xf32>
    %110 = arith.mulf %29, %109 : vector<32x128xf32>
    %111 = arith.addf %107, %110 : vector<32x128xf32>
    %112 = vector.extract_strided_slice %20 {offsets = [6, 0], sizes = [1, 128], strides = [1, 1]} : vector<16x128xf32> to vector<1x128xf32>
    %113 = vector.broadcast %112 : vector<1x128xf32> to vector<32x128xf32>
    %114 = arith.mulf %33, %113 : vector<32x128xf32>
    %115 = arith.addf %111, %114 : vector<32x128xf32>
    %116 = arith.maximumf %104, %115 : vector<32x128xf32>
    %117 = vector.extract_strided_slice %18 {offsets = [7, 0], sizes = [1, 128], strides = [1, 1]} : vector<16x128xf32> to vector<1x128xf32>
    %118 = vector.broadcast %117 : vector<1x128xf32> to vector<32x128xf32>
    %119 = arith.mulf %25, %118 : vector<32x128xf32>
    %120 = vector.extract_strided_slice %19 {offsets = [7, 0], sizes = [1, 128], strides = [1, 1]} : vector<16x128xf32> to vector<1x128xf32>
    %121 = vector.broadcast %120 : vector<1x128xf32> to vector<32x128xf32>
    %122 = arith.mulf %29, %121 : vector<32x128xf32>
    %123 = arith.addf %119, %122 : vector<32x128xf32>
    %124 = vector.extract_strided_slice %20 {offsets = [7, 0], sizes = [1, 128], strides = [1, 1]} : vector<16x128xf32> to vector<1x128xf32>
    %125 = vector.broadcast %124 : vector<1x128xf32> to vector<32x128xf32>
    %126 = arith.mulf %33, %125 : vector<32x128xf32>
    %127 = arith.addf %123, %126 : vector<32x128xf32>
    %128 = arith.maximumf %116, %127 : vector<32x128xf32>
    %129 = vector.extract_strided_slice %18 {offsets = [8, 0], sizes = [1, 128], strides = [1, 1]} : vector<16x128xf32> to vector<1x128xf32>
    %130 = vector.broadcast %129 : vector<1x128xf32> to vector<32x128xf32>
    %131 = arith.mulf %25, %130 : vector<32x128xf32>
    %132 = vector.extract_strided_slice %19 {offsets = [8, 0], sizes = [1, 128], strides = [1, 1]} : vector<16x128xf32> to vector<1x128xf32>
    %133 = vector.broadcast %132 : vector<1x128xf32> to vector<32x128xf32>
    %134 = arith.mulf %29, %133 : vector<32x128xf32>
    %135 = arith.addf %131, %134 : vector<32x128xf32>
    %136 = vector.extract_strided_slice %20 {offsets = [8, 0], sizes = [1, 128], strides = [1, 1]} : vector<16x128xf32> to vector<1x128xf32>
    %137 = vector.broadcast %136 : vector<1x128xf32> to vector<32x128xf32>
    %138 = arith.mulf %33, %137 : vector<32x128xf32>
    %139 = arith.addf %135, %138 : vector<32x128xf32>
    %140 = arith.maximumf %128, %139 : vector<32x128xf32>
    %141 = vector.extract_strided_slice %18 {offsets = [9, 0], sizes = [1, 128], strides = [1, 1]} : vector<16x128xf32> to vector<1x128xf32>
    %142 = vector.broadcast %141 : vector<1x128xf32> to vector<32x128xf32>
    %143 = arith.mulf %25, %142 : vector<32x128xf32>
    %144 = vector.extract_strided_slice %19 {offsets = [9, 0], sizes = [1, 128], strides = [1, 1]} : vector<16x128xf32> to vector<1x128xf32>
    %145 = vector.broadcast %144 : vector<1x128xf32> to vector<32x128xf32>
    %146 = arith.mulf %29, %145 : vector<32x128xf32>
    %147 = arith.addf %143, %146 : vector<32x128xf32>
    %148 = vector.extract_strided_slice %20 {offsets = [9, 0], sizes = [1, 128], strides = [1, 1]} : vector<16x128xf32> to vector<1x128xf32>
    %149 = vector.broadcast %148 : vector<1x128xf32> to vector<32x128xf32>
    %150 = arith.mulf %33, %149 : vector<32x128xf32>
    %151 = arith.addf %147, %150 : vector<32x128xf32>
    %152 = arith.maximumf %140, %151 : vector<32x128xf32>
    %153 = vector.extract_strided_slice %18 {offsets = [10, 0], sizes = [1, 128], strides = [1, 1]} : vector<16x128xf32> to vector<1x128xf32>
    %154 = vector.broadcast %153 : vector<1x128xf32> to vector<32x128xf32>
    %155 = arith.mulf %25, %154 : vector<32x128xf32>
    %156 = vector.extract_strided_slice %19 {offsets = [10, 0], sizes = [1, 128], strides = [1, 1]} : vector<16x128xf32> to vector<1x128xf32>
    %157 = vector.broadcast %156 : vector<1x128xf32> to vector<32x128xf32>
    %158 = arith.mulf %29, %157 : vector<32x128xf32>
    %159 = arith.addf %155, %158 : vector<32x128xf32>
    %160 = vector.extract_strided_slice %20 {offsets = [10, 0], sizes = [1, 128], strides = [1, 1]} : vector<16x128xf32> to vector<1x128xf32>
    %161 = vector.broadcast %160 : vector<1x128xf32> to vector<32x128xf32>
    %162 = arith.mulf %33, %161 : vector<32x128xf32>
    %163 = arith.addf %159, %162 : vector<32x128xf32>
    %164 = arith.maximumf %152, %163 : vector<32x128xf32>
    %165 = vector.extract_strided_slice %18 {offsets = [11, 0], sizes = [1, 128], strides = [1, 1]} : vector<16x128xf32> to vector<1x128xf32>
    %166 = vector.broadcast %165 : vector<1x128xf32> to vector<32x128xf32>
    %167 = arith.mulf %25, %166 : vector<32x128xf32>
    %168 = vector.extract_strided_slice %19 {offsets = [11, 0], sizes = [1, 128], strides = [1, 1]} : vector<16x128xf32> to vector<1x128xf32>
    %169 = vector.broadcast %168 : vector<1x128xf32> to vector<32x128xf32>
    %170 = arith.mulf %29, %169 : vector<32x128xf32>
    %171 = arith.addf %167, %170 : vector<32x128xf32>
    %172 = vector.extract_strided_slice %20 {offsets = [11, 0], sizes = [1, 128], strides = [1, 1]} : vector<16x128xf32> to vector<1x128xf32>
    %173 = vector.broadcast %172 : vector<1x128xf32> to vector<32x128xf32>
    %174 = arith.mulf %33, %173 : vector<32x128xf32>
    %175 = arith.addf %171, %174 : vector<32x128xf32>
    %176 = arith.maximumf %164, %175 : vector<32x128xf32>
    %177 = vector.extract_strided_slice %18 {offsets = [12, 0], sizes = [1, 128], strides = [1, 1]} : vector<16x128xf32> to vector<1x128xf32>
    %178 = vector.broadcast %177 : vector<1x128xf32> to vector<32x128xf32>
    %179 = arith.mulf %25, %178 : vector<32x128xf32>
    %180 = vector.extract_strided_slice %19 {offsets = [12, 0], sizes = [1, 128], strides = [1, 1]} : vector<16x128xf32> to vector<1x128xf32>
    %181 = vector.broadcast %180 : vector<1x128xf32> to vector<32x128xf32>
    %182 = arith.mulf %29, %181 : vector<32x128xf32>
    %183 = arith.addf %179, %182 : vector<32x128xf32>
    %184 = vector.extract_strided_slice %20 {offsets = [12, 0], sizes = [1, 128], strides = [1, 1]} : vector<16x128xf32> to vector<1x128xf32>
    %185 = vector.broadcast %184 : vector<1x128xf32> to vector<32x128xf32>
    %186 = arith.mulf %33, %185 : vector<32x128xf32>
    %187 = arith.addf %183, %186 : vector<32x128xf32>
    %188 = arith.maximumf %176, %187 : vector<32x128xf32>
    %189 = vector.extract_strided_slice %18 {offsets = [13, 0], sizes = [1, 128], strides = [1, 1]} : vector<16x128xf32> to vector<1x128xf32>
    %190 = vector.broadcast %189 : vector<1x128xf32> to vector<32x128xf32>
    %191 = arith.mulf %25, %190 : vector<32x128xf32>
    %192 = vector.extract_strided_slice %19 {offsets = [13, 0], sizes = [1, 128], strides = [1, 1]} : vector<16x128xf32> to vector<1x128xf32>
    %193 = vector.broadcast %192 : vector<1x128xf32> to vector<32x128xf32>
    %194 = arith.mulf %29, %193 : vector<32x128xf32>
    %195 = arith.addf %191, %194 : vector<32x128xf32>
    %196 = vector.extract_strided_slice %20 {offsets = [13, 0], sizes = [1, 128], strides = [1, 1]} : vector<16x128xf32> to vector<1x128xf32>
    %197 = vector.broadcast %196 : vector<1x128xf32> to vector<32x128xf32>
    %198 = arith.mulf %33, %197 : vector<32x128xf32>
    %199 = arith.addf %195, %198 : vector<32x128xf32>
    %200 = arith.maximumf %188, %199 : vector<32x128xf32>
    %201 = vector.extract_strided_slice %18 {offsets = [14, 0], sizes = [1, 128], strides = [1, 1]} : vector<16x128xf32> to vector<1x128xf32>
    %202 = vector.broadcast %201 : vector<1x128xf32> to vector<32x128xf32>
    %203 = arith.mulf %25, %202 : vector<32x128xf32>
    %204 = vector.extract_strided_slice %19 {offsets = [14, 0], sizes = [1, 128], strides = [1, 1]} : vector<16x128xf32> to vector<1x128xf32>
    %205 = vector.broadcast %204 : vector<1x128xf32> to vector<32x128xf32>
    %206 = arith.mulf %29, %205 : vector<32x128xf32>
    %207 = arith.addf %203, %206 : vector<32x128xf32>
    %208 = vector.extract_strided_slice %20 {offsets = [14, 0], sizes = [1, 128], strides = [1, 1]} : vector<16x128xf32> to vector<1x128xf32>
    %209 = vector.broadcast %208 : vector<1x128xf32> to vector<32x128xf32>
    %210 = arith.mulf %33, %209 : vector<32x128xf32>
    %211 = arith.addf %207, %210 : vector<32x128xf32>
    %212 = arith.maximumf %200, %211 : vector<32x128xf32>
    %213 = vector.extract_strided_slice %18 {offsets = [15, 0], sizes = [1, 128], strides = [1, 1]} : vector<16x128xf32> to vector<1x128xf32>
    %214 = vector.broadcast %213 : vector<1x128xf32> to vector<32x128xf32>
    %215 = arith.mulf %25, %214 : vector<32x128xf32>
    %216 = vector.extract_strided_slice %19 {offsets = [15, 0], sizes = [1, 128], strides = [1, 1]} : vector<16x128xf32> to vector<1x128xf32>
    %217 = vector.broadcast %216 : vector<1x128xf32> to vector<32x128xf32>
    %218 = arith.mulf %29, %217 : vector<32x128xf32>
    %219 = arith.addf %215, %218 : vector<32x128xf32>
    %220 = vector.extract_strided_slice %20 {offsets = [15, 0], sizes = [1, 128], strides = [1, 1]} : vector<16x128xf32> to vector<1x128xf32>
    %221 = vector.broadcast %220 : vector<1x128xf32> to vector<32x128xf32>
    %222 = arith.mulf %33, %221 : vector<32x128xf32>
    %223 = arith.addf %219, %222 : vector<32x128xf32>
    %224 = arith.maximumf %212, %223 : vector<32x128xf32>
    %c0_9 = arith.constant 0 : index
    %c0_10 = arith.constant 0 : index
    %225 = vector.load %arg5[%c0_9, %c0_10] : memref<32x32xf32, #tpu.memory_space<vmem>>, vector<32x32xf32>
    %cst_11 = arith.constant dense<0.000000e+00> : vector<32x128xf32>
    %226 = tpu.matmul %225, %224, %cst_11 {dimension_numbers = #tpu.dot_dimension_numbers<[1], [0], [0], [1], [0, 0, 1, 1], [], []>} : vector<32x32xf32>, vector<32x128xf32>, vector<32x128xf32> -> vector<32x128xf32>
    %c0_12 = arith.constant 0 : index
    %c0_13 = arith.constant 0 : index
    %227 = vector.load %arg6[%c0_12, %c0_13] : memref<32x1xf32, #tpu.memory_space<vmem>>, vector<32x1xf32>
    %228 = vector.broadcast %227 : vector<32x1xf32> to vector<32x128xf32>
    %229 = arith.addf %226, %228 : vector<32x128xf32>
    %230 = arith.mulf %229, %229 : vector<32x128xf32>
    %231 = arith.mulf %229, %230 : vector<32x128xf32>
    %cst_14 = arith.constant 4.471500e-02 : f32
    %232 = vector.broadcast %cst_14 : f32 to vector<32x128xf32>
    %233 = arith.mulf %232, %231 : vector<32x128xf32>
    %234 = arith.addf %229, %233 : vector<32x128xf32>
    %cst_15 = arith.constant 0.797884583 : f32
    %235 = vector.broadcast %cst_15 : f32 to vector<32x128xf32>
    %236 = arith.mulf %235, %234 : vector<32x128xf32>
    %237 = math.tanh %236 : vector<32x128xf32>
    %cst_16 = arith.constant 1.000000e+00 : f32
    %238 = vector.broadcast %cst_16 : f32 to vector<32x128xf32>
    %239 = arith.addf %238, %237 : vector<32x128xf32>
    %cst_17 = arith.constant 5.000000e-01 : f32
    %240 = vector.broadcast %cst_17 : f32 to vector<32x128xf32>
    %241 = arith.mulf %240, %239 : vector<32x128xf32>
    %242 = arith.mulf %229, %241 : vector<32x128xf32>
    %c0_18 = arith.constant 0 : index
    %c0_19 = arith.constant 0 : index
    %243 = vector.load %arg7[%c0_18, %c0_19] : memref<64x32xf32, #tpu.memory_space<vmem>>, vector<64x32xf32>
    %cst_20 = arith.constant dense<0.000000e+00> : vector<64x128xf32>
    %244 = tpu.matmul %243, %242, %cst_20 {dimension_numbers = #tpu.dot_dimension_numbers<[1], [0], [0], [1], [0, 0, 1, 1], [], []>} : vector<64x32xf32>, vector<32x128xf32>, vector<64x128xf32> -> vector<64x128xf32>
    %c0_21 = arith.constant 0 : index
    %c0_22 = arith.constant 0 : index
    %245 = vector.load %arg8[%c0_21, %c0_22] : memref<64x1xf32, #tpu.memory_space<vmem>>, vector<64x1xf32>
    %246 = vector.broadcast %245 : vector<64x1xf32> to vector<64x128xf32>
    %247 = arith.addf %244, %246 : vector<64x128xf32>
    %c0_23 = arith.constant 0 : index
    %c0_24 = arith.constant 0 : index
    %248 = vector.load %arg9[%c0_23, %c0_24] : memref<192x64xf32, #tpu.memory_space<vmem>>, vector<192x64xf32>
    %cst_25 = arith.constant dense<0.000000e+00> : vector<192x128xf32>
    %249 = tpu.matmul %248, %1, %cst_25 {dimension_numbers = #tpu.dot_dimension_numbers<[1], [0], [0], [1], [0, 0, 1, 1], [], []>} : vector<192x64xf32>, vector<64x128xf32>, vector<192x128xf32> -> vector<192x128xf32>
    %250 = vector.extract_strided_slice %249 {offsets = [0, 0], sizes = [128, 128], strides = [1, 1]} : vector<192x128xf32> to vector<128x128xf32>
    %251 = vector.extract_strided_slice %249 {offsets = [128, 0], sizes = [64, 128], strides = [1, 1]} : vector<192x128xf32> to vector<64x128xf32>
    %252 = arith.truncf %250 : vector<128x128xf32> to vector<128x128xbf16>
    %253 = arith.extf %252 : vector<128x128xbf16> to vector<128x128xf32>
    %254 = arith.subf %250, %253 : vector<128x128xf32>
    %255 = arith.truncf %254 : vector<128x128xf32> to vector<128x128xbf16>
    %256 = tpu.concatenate %252, %255 in 0 : vector<128x128xbf16>, vector<128x128xbf16> -> vector<256x128xbf16>
    %c0_26 = arith.constant 0 : index
    %c0_27 = arith.constant 0 : index
    %c0_28 = arith.constant 0 : index
    %257 = vector.load %arg3[%c0_26, %c0_27, %c0_28] : memref<1x1x2048xi32, #tpu.memory_space<vmem>>, vector<1x1x2048xi32>
    %258 = vector.shape_cast %257 : vector<1x1x2048xi32> to vector<1x2048xi32>
    %259 = tpu.iota {dimensions = array<i32: 0>} : vector<128x2048xi32>
    %260 = vector.broadcast %258 : vector<1x2048xi32> to vector<128x2048xi32>
    %261 = arith.cmpi eq, %259, %260 : vector<128x2048xi32>
    %262 = arith.extui %261 : vector<128x2048xi1> to vector<128x2048xi32>
    %263 = arith.sitofp %262 : vector<128x2048xi32> to vector<128x2048xf32>
    %264 = arith.truncf %263 : vector<128x2048xf32> to vector<128x2048xbf16>
    %cst_29 = arith.constant dense<0.000000e+00> : vector<256x2048xf32>
    %265 = tpu.matmul %256, %264, %cst_29 {dimension_numbers = #tpu.dot_dimension_numbers<[1], [0], [0], [1], [0, 0, 1, 1], [], []>} : vector<256x128xbf16>, vector<128x2048xbf16>, vector<256x2048xf32> -> vector<256x2048xf32>
    %266 = vector.extract_strided_slice %265 {offsets = [0, 0], sizes = [128, 2048], strides = [1, 1]} : vector<256x2048xf32> to vector<128x2048xf32>
    %267 = vector.extract_strided_slice %265 {offsets = [128, 0], sizes = [128, 2048], strides = [1, 1]} : vector<256x2048xf32> to vector<128x2048xf32>
    %268 = arith.addf %266, %267 : vector<128x2048xf32>
    %269 = vector.extract_strided_slice %268 {offsets = [0, 0], sizes = [128, 128], strides = [1, 1]} : vector<128x2048xf32> to vector<128x128xf32>
    %270 = vector.extract_strided_slice %268 {offsets = [0, 128], sizes = [128, 128], strides = [1, 1]} : vector<128x2048xf32> to vector<128x128xf32>
    %271 = arith.maximumf %269, %270 : vector<128x128xf32>
    %272 = vector.extract_strided_slice %268 {offsets = [0, 256], sizes = [128, 128], strides = [1, 1]} : vector<128x2048xf32> to vector<128x128xf32>
    %273 = arith.maximumf %271, %272 : vector<128x128xf32>
    %274 = vector.extract_strided_slice %268 {offsets = [0, 384], sizes = [128, 128], strides = [1, 1]} : vector<128x2048xf32> to vector<128x128xf32>
    %275 = arith.maximumf %273, %274 : vector<128x128xf32>
    %276 = vector.extract_strided_slice %268 {offsets = [0, 512], sizes = [128, 128], strides = [1, 1]} : vector<128x2048xf32> to vector<128x128xf32>
    %277 = arith.maximumf %275, %276 : vector<128x128xf32>
    %278 = vector.extract_strided_slice %268 {offsets = [0, 640], sizes = [128, 128], strides = [1, 1]} : vector<128x2048xf32> to vector<128x128xf32>
    %279 = arith.maximumf %277, %278 : vector<128x128xf32>
    %280 = vector.extract_strided_slice %268 {offsets = [0, 768], sizes = [128, 128], strides = [1, 1]} : vector<128x2048xf32> to vector<128x128xf32>
    %281 = arith.maximumf %279, %280 : vector<128x128xf32>
    %282 = vector.extract_strided_slice %268 {offsets = [0, 896], sizes = [128, 128], strides = [1, 1]} : vector<128x2048xf32> to vector<128x128xf32>
    %283 = arith.maximumf %281, %282 : vector<128x128xf32>
    %284 = vector.extract_strided_slice %268 {offsets = [0, 1024], sizes = [128, 128], strides = [1, 1]} : vector<128x2048xf32> to vector<128x128xf32>
    %285 = arith.maximumf %283, %284 : vector<128x128xf32>
    %286 = vector.extract_strided_slice %268 {offsets = [0, 1152], sizes = [128, 128], strides = [1, 1]} : vector<128x2048xf32> to vector<128x128xf32>
    %287 = arith.maximumf %285, %286 : vector<128x128xf32>
    %288 = vector.extract_strided_slice %268 {offsets = [0, 1280], sizes = [128, 128], strides = [1, 1]} : vector<128x2048xf32> to vector<128x128xf32>
    %289 = arith.maximumf %287, %288 : vector<128x128xf32>
    %290 = vector.extract_strided_slice %268 {offsets = [0, 1408], sizes = [128, 128], strides = [1, 1]} : vector<128x2048xf32> to vector<128x128xf32>
    %291 = arith.maximumf %289, %290 : vector<128x128xf32>
    %292 = vector.extract_strided_slice %268 {offsets = [0, 1536], sizes = [128, 128], strides = [1, 1]} : vector<128x2048xf32> to vector<128x128xf32>
    %293 = arith.maximumf %291, %292 : vector<128x128xf32>
    %294 = vector.extract_strided_slice %268 {offsets = [0, 1664], sizes = [128, 128], strides = [1, 1]} : vector<128x2048xf32> to vector<128x128xf32>
    %295 = arith.maximumf %293, %294 : vector<128x128xf32>
    %296 = vector.extract_strided_slice %268 {offsets = [0, 1792], sizes = [128, 128], strides = [1, 1]} : vector<128x2048xf32> to vector<128x128xf32>
    %297 = arith.maximumf %295, %296 : vector<128x128xf32>
    %298 = vector.extract_strided_slice %268 {offsets = [0, 1920], sizes = [128, 128], strides = [1, 1]} : vector<128x2048xf32> to vector<128x128xf32>
    %299 = arith.maximumf %297, %298 : vector<128x128xf32>
    %300 = vector.extract_strided_slice %299 {offsets = [0, 0], sizes = [64, 128], strides = [1, 1]} : vector<128x128xf32> to vector<64x128xf32>
    %301 = vector.extract_strided_slice %299 {offsets = [64, 0], sizes = [64, 128], strides = [1, 1]} : vector<128x128xf32> to vector<64x128xf32>
    %302 = arith.addf %300, %301 : vector<64x128xf32>
    %303 = arith.addf %302, %251 : vector<64x128xf32>
    %c0_30 = arith.constant 0 : index
    %c0_31 = arith.constant 0 : index
    %304 = vector.load %arg10[%c0_30, %c0_31] : memref<64x1xf32, #tpu.memory_space<vmem>>, vector<64x1xf32>
    %305 = vector.broadcast %304 : vector<64x1xf32> to vector<64x128xf32>
    %306 = arith.addf %303, %305 : vector<64x128xf32>
    %c0_32 = arith.constant 0 : index
    %c0_33 = arith.constant 0 : index
    %307 = vector.load %arg11[%c0_32, %c0_33] : memref<64x1xf32, #tpu.memory_space<vmem>>, vector<64x1xf32>
    %308 = vector.broadcast %307 : vector<64x1xf32> to vector<64x128xf32>
    %309 = arith.mulf %306, %308 : vector<64x128xf32>
    %c0_34 = arith.constant 0 : index
    %c0_35 = arith.constant 0 : index
    %310 = vector.load %arg12[%c0_34, %c0_35] : memref<64x1xf32, #tpu.memory_space<vmem>>, vector<64x1xf32>
    %311 = vector.broadcast %310 : vector<64x1xf32> to vector<64x128xf32>
    %312 = arith.addf %309, %311 : vector<64x128xf32>
    %313 = arith.addf %1, %312 : vector<64x128xf32>
    %314 = arith.addf %313, %247 : vector<64x128xf32>
    %c0_36 = arith.constant 0 : index
    %c0_37 = arith.constant 0 : index
    %315 = vector.load %arg13[%c0_36, %c0_37] : memref<128x64xf32, #tpu.memory_space<vmem>>, vector<128x64xf32>
    %cst_38 = arith.constant dense<0.000000e+00> : vector<128x128xf32>
    %316 = tpu.matmul %315, %314, %cst_38 {dimension_numbers = #tpu.dot_dimension_numbers<[1], [0], [0], [1], [0, 0, 1, 1], [], []>} : vector<128x64xf32>, vector<64x128xf32>, vector<128x128xf32> -> vector<128x128xf32>
    %c0_39 = arith.constant 0 : index
    %c0_40 = arith.constant 0 : index
    %317 = vector.load %arg14[%c0_39, %c0_40] : memref<128x1xf32, #tpu.memory_space<vmem>>, vector<128x1xf32>
    %318 = vector.broadcast %317 : vector<128x1xf32> to vector<128x128xf32>
    %319 = arith.addf %316, %318 : vector<128x128xf32>
    %320 = arith.mulf %319, %319 : vector<128x128xf32>
    %321 = arith.mulf %319, %320 : vector<128x128xf32>
    %cst_41 = arith.constant 4.471500e-02 : f32
    %322 = vector.broadcast %cst_41 : f32 to vector<128x128xf32>
    %323 = arith.mulf %322, %321 : vector<128x128xf32>
    %324 = arith.addf %319, %323 : vector<128x128xf32>
    %cst_42 = arith.constant 0.797884583 : f32
    %325 = vector.broadcast %cst_42 : f32 to vector<128x128xf32>
    %326 = arith.mulf %325, %324 : vector<128x128xf32>
    %327 = math.tanh %326 : vector<128x128xf32>
    %cst_43 = arith.constant 1.000000e+00 : f32
    %328 = vector.broadcast %cst_43 : f32 to vector<128x128xf32>
    %329 = arith.addf %328, %327 : vector<128x128xf32>
    %cst_44 = arith.constant 5.000000e-01 : f32
    %330 = vector.broadcast %cst_44 : f32 to vector<128x128xf32>
    %331 = arith.mulf %330, %329 : vector<128x128xf32>
    %332 = arith.mulf %319, %331 : vector<128x128xf32>
    %c0_45 = arith.constant 0 : index
    %c0_46 = arith.constant 0 : index
    %333 = vector.load %arg15[%c0_45, %c0_46] : memref<64x128xf32, #tpu.memory_space<vmem>>, vector<64x128xf32>
    %cst_47 = arith.constant dense<0.000000e+00> : vector<64x128xf32>
    %334 = tpu.matmul %333, %332, %cst_47 {dimension_numbers = #tpu.dot_dimension_numbers<[1], [0], [0], [1], [0, 0, 1, 1], [], []>} : vector<64x128xf32>, vector<128x128xf32>, vector<64x128xf32> -> vector<64x128xf32>
    %335 = arith.addf %314, %334 : vector<64x128xf32>
    %c0_48 = arith.constant 0 : index
    %c0_49 = arith.constant 0 : index
    %c0_50 = arith.constant 0 : index
    %336 = vector.load %arg16[%c0_48, %c0_49, %c0_50] : memref<1x64x128xf32, #tpu.memory_space<vmem>>, vector<1x64x128xf32>
    %337 = vector.shape_cast %336 : vector<1x64x128xf32> to vector<64x128xf32>
    %338 = vector.shape_cast %335 : vector<64x128xf32> to vector<1x64x128xf32>
    tpu.vector_store %arg16[%c0_48, %c0_49, %c0_50], %338 {strides = array<i32>} : memref<1x64x128xf32, #tpu.memory_space<vmem>>, vector<1x64x128xf32>,
    return
  }
  func.func @transform_0(%arg0: i32) -> (i32, i32, i32) {
    %c0_i32 = arith.constant 0 : i32
    %c0_i32_0 = arith.constant 0 : i32
    %c0_i32_1 = arith.constant 0 : i32
    return %arg0, %c0_i32, %c0_i32_0 : i32, i32, i32
  }
  func.func @transform_1(%arg0: i32) -> (i32, i32, i32, i32) {
    %c0_i32 = arith.constant 0 : i32
    %c0_i32_0 = arith.constant 0 : i32
    %c0_i32_1 = arith.constant 0 : i32
    %c0_i32_2 = arith.constant 0 : i32
    return %arg0, %c0_i32, %c0_i32_0, %c0_i32_1 : i32, i32, i32, i32
  }
  func.func @transform_2(%arg0: i32) -> (i32, i32, i32) {
    %c0_i32 = arith.constant 0 : i32
    %c0_i32_0 = arith.constant 0 : i32
    %c0_i32_1 = arith.constant 0 : i32
    return %arg0, %c0_i32, %c0_i32_0 : i32, i32, i32
  }
  func.func @transform_3(%arg0: i32) -> (i32, i32, i32) {
    %c0_i32 = arith.constant 0 : i32
    %c0_i32_0 = arith.constant 0 : i32
    %c0_i32_1 = arith.constant 0 : i32
    %c0_i32_2 = arith.constant 0 : i32
    return %c0_i32, %c0_i32_0, %c0_i32_1 : i32, i32, i32
  }
  func.func @transform_4(%arg0: i32) -> (i32, i32) {
    %c0_i32 = arith.constant 0 : i32
    %c0_i32_0 = arith.constant 0 : i32
    %c0_i32_1 = arith.constant 0 : i32
    return %c0_i32, %c0_i32_0 : i32, i32
  }
  func.func @transform_5(%arg0: i32) -> (i32, i32) {
    %c0_i32 = arith.constant 0 : i32
    %c0_i32_0 = arith.constant 0 : i32
    %c0_i32_1 = arith.constant 0 : i32
    return %c0_i32, %c0_i32_0 : i32, i32
  }
  func.func @transform_6(%arg0: i32) -> (i32, i32) {
    %c0_i32 = arith.constant 0 : i32
    %c0_i32_0 = arith.constant 0 : i32
    %c0_i32_1 = arith.constant 0 : i32
    return %c0_i32, %c0_i32_0 : i32, i32
  }
  func.func @transform_7(%arg0: i32) -> (i32, i32) {
    %c0_i32 = arith.constant 0 : i32
    %c0_i32_0 = arith.constant 0 : i32
    %c0_i32_1 = arith.constant 0 : i32
    return %c0_i32, %c0_i32_0 : i32, i32
  }
  func.func @transform_8(%arg0: i32) -> (i32, i32) {
    %c0_i32 = arith.constant 0 : i32
    %c0_i32_0 = arith.constant 0 : i32
    %c0_i32_1 = arith.constant 0 : i32
    return %c0_i32, %c0_i32_0 : i32, i32
  }
  func.func @transform_9(%arg0: i32) -> (i32, i32) {
    %c0_i32 = arith.constant 0 : i32
    %c0_i32_0 = arith.constant 0 : i32
    %c0_i32_1 = arith.constant 0 : i32
    return %c0_i32, %c0_i32_0 : i32, i32
  }
  func.func @transform_10(%arg0: i32) -> (i32, i32) {
    %c0_i32 = arith.constant 0 : i32
    %c0_i32_0 = arith.constant 0 : i32
    %c0_i32_1 = arith.constant 0 : i32
    return %c0_i32, %c0_i32_0 : i32, i32
  }
  func.func @transform_11(%arg0: i32) -> (i32, i32) {
    %c0_i32 = arith.constant 0 : i32
    %c0_i32_0 = arith.constant 0 : i32
    %c0_i32_1 = arith.constant 0 : i32
    return %c0_i32, %c0_i32_0 : i32, i32
  }
  func.func @transform_12(%arg0: i32) -> (i32, i32) {
    %c0_i32 = arith.constant 0 : i32
    %c0_i32_0 = arith.constant 0 : i32
    %c0_i32_1 = arith.constant 0 : i32
    return %c0_i32, %c0_i32_0 : i32, i32
  }
  func.func @transform_13(%arg0: i32) -> (i32, i32) {
    %c0_i32 = arith.constant 0 : i32
    %c0_i32_0 = arith.constant 0 : i32
    %c0_i32_1 = arith.constant 0 : i32
    return %c0_i32, %c0_i32_0 : i32, i32
  }
  func.func @transform_14(%arg0: i32) -> (i32, i32) {
    %c0_i32 = arith.constant 0 : i32
    %c0_i32_0 = arith.constant 0 : i32
    %c0_i32_1 = arith.constant 0 : i32
    return %c0_i32, %c0_i32_0 : i32, i32
  }
  func.func @transform_15(%arg0: i32) -> (i32, i32, i32) {
    %c0_i32 = arith.constant 0 : i32
    %c0_i32_0 = arith.constant 0 : i32
    %c0_i32_1 = arith.constant 0 : i32
    return %arg0, %c0_i32, %c0_i32_0 : i32, i32, i32
  }
}

</mosaic_0001>

<bundles_post_ra>
// kernel: tpu_custom_call.1
= control target key start
LH: loop header
LB: loop body
LE: loop exit
PB: predicated region body
PF: predicated region fallthrough
CT: control target
= control target key end

     0   :  { %s10408_s0 = inlined_call_operand.vmem [shape: f32[2,64,128], index: 0, kind: input, shape index: {}]   ;;  %s10409_s1 = inlined_call_operand.vmem [shape: f32[2,3,16,128], index: 1, kind: input, shape index: {}]   ;;  %s10410_s2 = inlined_call_operand.vmem [shape: s32[2,1,2048], index: 2, kind: input, shape index: {}]   ;;  %s10411_s3 = inlined_call_operand.vmem [shape: f32[3,32,1], index: 3, kind: input, shape index: {}]   ;;  %s10412_s4 = inlined_call_operand.vmem [shape: f32[32,32], index: 4, kind: input, shape index: {}]   ;;  %s10413_s5 = inlined_call_operand.vmem [shape: f32[32,1], index: 5, kind: input, shape index: {}]   ;;  %s10414_s6 = inlined_call_operand.vmem [shape: f32[64,32], index: 6, kind: input, shape index: {}]   ;;  %s10415_s7 = inlined_call_operand.vmem [shape: f32[64,1], index: 7, kind: input, shape index: {}]   ;;  %s10416_s8 = inlined_call_operand.vmem [shape: f32[192,64], index: 8, kind: input, shape index: {}]   ;;  %s10417_s9 = inlined_call_operand.vmem [shape: f32[64,1], index: 9, kind: input, shape index: {}]   ;;  %s10418_s10 = inlined_call_operand.vmem [shape: f32[64,1], index: 10, kind: input, shape index: {}]   ;;  %s10419_s11 = inlined_call_operand.vmem [shape: f32[64,1], index: 11, kind: input, shape index: {}]   ;;  %s10420_s12 = inlined_call_operand.vmem [shape: f32[128,64], index: 12, kind: input, shape index: {}]   ;;  %s10421_s13 = inlined_call_operand.vmem [shape: f32[128,1], index: 13, kind: input, shape index: {}]   ;;  %s10422_s14 = inlined_call_operand.vmem [shape: f32[64,128], index: 14, kind: input, shape index: {}]   ;;  %s10423_s15 = inlined_call_operand.hbm [shape: f32[2,64,128], index: 15, kind: output, shape index: {}]  }
   0x1   :  { %10552 = sst [smem:[#allocation66_spill]] %s10408_s0 }
   0x2   :  { %20 = vsyncpa [#allocation3], 0 }
   0x3   :  { %22 = vsyncpa [#allocation3 + $0x1], 0  ;;  %s7216_s18 = smov 0   ;;  %s7218_s19 = smov 0  }
   0x4   :  { %s7220_s20 = smov 0   ;;  %s7222_s21 = smov 0  }
   0x5 LB: > { %10553 = sst [smem:[#allocation5_spill]] %s7117_s18  ;;  %s7237_s22 = sadd.s32 4294967295, %s7129_s21   ;;  %s7129_s21 = sphi %s7222_s21, %s10833_s21   ;;  %s7125_s20 = sphi %s7220_s20, %s10835_s20   ;;  %s7121_s19 = sphi %s7218_s19, %s10837_s19   ;;  %s7117_s18 = sphi %s7216_s18, %s10836_s18  }
   0x6   : > { %10554 = sst [smem:[#allocation6_spill]] %s7125_s20  ;;  %s5783_s23 = sadd.s32 4294967294, %s7129_s21  }
   0x7   : > { %10555 = sst [smem:[#allocation7_spill]] %s7129_s21  ;;  %s7241_s24 = sadd.s32 1, %s7129_s21  }
   0x8   : > { %10556 = sst [smem:[#allocation8_spill]] %s7241_s24  ;;  %s365_s25 = sadd.s32 1, %s7125_s20 }
   0x9   : > { %s362_s26 = ssub.s32 %s7129_s21, %s7241_s24  ;;  %p375_p0 = scmp.ne.s32.totalorder %s7125_s20, %s7121_s19 }
   0xa   : > { %p363_p1 = scmp.eq.s32.totalorder %s362_s26, 0  ;;  %p376_p2 = scmp.eq.s32.totalorder %s7237_s22, 1 }
   0xb   : > { %p381_p3 = scmp.ne.s32.totalorder %s7121_s19, %s7117_s18  ;;  %p382_p4 = scmp.eq.s32.totalorder %s5783_s23, 1 }
   0xc   : > { %s7252_s27 = scalar_select %p363_p1, %s7125_s20, %s365_s25  }
   0xd   : > { %p7254_p5 = por %p376_p2, %p375_p0  ;;  %p7258_p6 = por %p382_p4, %p381_p3 }
   0xe   : > { %10557 = sst [smem:[#allocation9_spill]] %s7252_s27  ;;  %p5786_p7 = scmp.ge.s32.totalorder %s7129_s21, 1 }
   0xf   : > { %s10559_s29 = scalar_select %p7258_p6, 1, 0 }
  0x10   : > { %p459_p8 = scmp.lt.s32.totalorder %s7129_s21, 3 }
  0x11   : > { %10560 = sst [smem:[#allocation10_spill]] %s10559_s29 }
  0x12   : > { %p460_p9 = pnand %p5786_p7, %p459_p8 }
  0x14   : > { %463 = sbr.rel (%p460_p9) target bundleno = 1812 (0x714), region = 80 }
  0x1b   : > { %v569_v0 = vld [vmem:[%s10411_s3 + $0x20] sm:$0xff]  ;;  %p516_p10 = scmp.lt.s32.totalorder %s7237_s22, 1  ;;  %v637_v2 = vlaneseq  ;;  %v10430_v3 = vmov 0   ;;  %v570_v4 = vld [vmem:[%s10411_s3 + $0x28] sm:$0xff]  ;;  %vm10522_vm0 = vcmask 523264   ;;  %s10562_s0 = sld [smem:[#allocation66_spill]] }
  0x1c   : > { %v565_v1 = vld [vmem:[%s10411_s3] sm:$0xff]  ;;  %7014 = vset.pattern.permute.xlu1 %v10430_v3  ;;  %7013 = vset.pattern.permute.xlu0 %v10430_v3  ;;  %v566_v5 = vld [vmem:[%s10411_s3 + $0x8] sm:$0xff]  ;;  %v568_v28 = vld [vmem:[%s10411_s3 + $0x18] sm:$0xff]  ;;  %vm1237_vm1 = vcmask 261120   ;;  %s6362_s26 = sshll.u32 %s7237_s22, 10  ;;  %s7133_s17 = smov [#allocation2]  }
  0x1d   : > { %599 = vperm.xlu1 %7014, %v569_v0   ;;  %579 = vperm.xlu0 %7013, %v565_v1   ;;  %s7274_s25 = scalar_select %p516_p10, %s7237_s22, 1  ;;  %v7283_v6 = vshrl.u32 %v637_v2, 7  ;;  %v1556_v7 = vld [vmem:[%s10416_s8] sm:$0xff]  ;;  %v574_v11 = vld [vmem:[%s10411_s3 + $0x48] sm:$0xff]  ;;  %v567_v29 = vld [vmem:[%s10411_s3 + $0x10] sm:$0xff] }
  0x1e   : > { %6513 = vmatprep.mubr.msk.f32.mxu0 %vm10522_vm0, %v1556_v7  ;;  %v573_v14 = vld [vmem:[%s10411_s3 + $0x40] sm:$0xff]  ;;  %v572_v45 = vld [vmem:[%s10411_s3 + $0x38] sm:$0xff]  ;;  %v571_v46 = vld [vmem:[%s10411_s3 + $0x30] sm:$0xff] }
  0x1f   : > { %s6361_s23 = sshll.u32 %s7274_s25, 6  ;;  %10561 = vst [vmem:[#allocation11_spill] sm:$0xff] %v7283_v6  ;;  %s5791_s29 = sshll.u32 %s7274_s25, 4  ;;  %v7304_v12 = vsub.s32 0, %v7283_v6  ;;  %v7307_v13 = vsub.s32 1, %v7283_v6  ;;  %v7313_v15 = vsub.s32 4, %v7283_v6 }
  0x20   : > { %s529_s18 = scalar_lea.vmem %s10410_s2, %s5791_s29  ;;  %v7316_v16 = vsub.s32 5, %v7283_v6  ;;  %v7321_v18 = vsub.s32 6, %v7283_v6  ;;  %v7324_v19 = vsub.s32 7, %v7283_v6  ;;  %v7335_v23 = vsub.s32 2, %v7283_v6  ;;  %v576_v50 = vld [vmem:[%s10411_s3 + $0x58] sm:$0xff]  ;;  %v575_v51 = vld [vmem:[%s10411_s3 + $0x50] sm:$0xff] }
  0x21   : > { %s7288_s24 = scalar_lea.vmem %s10562_s0, %s6361_s23  ;;  %604 = vperm.xlu1 %7014, %v570_v4   ;;  %584 = vperm.xlu0 %7013, %v566_v5   ;;  %v7318_v17 = vld [vmem:[%s529_s18] sm:$0xff]  ;;  %v1887_v20 = vld [vmem:[%s529_s18 + $0x8] sm:$0xff]  ;;  %v7338_v24 = vsub.s32 3, %v7283_v6  ;;  %v1216_v55 = vld [vmem:[%s10413_s5 + $0x18] sm:$0xff]  ;;  %s6969_s29 = smul.u32 48, %s7274_s25 }
  0x22   : > { %v531_v8 = vld [vmem:[%s7288_s24] sm:$0xff]  ;;  %v532_v9 = vld [vmem:[%s7288_s24 + $0x8] sm:$0xff]  ;;  %v7328_v21 = vrot.slane %v7318_v17, %v7304_v12  ;;  %v7332_v22 = vrot.slane %v7318_v17, %v7307_v13  ;;  %v7342_v25 = vrot.slane %v7318_v17, %v7313_v15  ;;  %v7346_v26 = vrot.slane %v7318_v17, %v7316_v16  ;;  %v533_v27 = vld [vmem:[%s7288_s24 + $0x10] sm:$0xff]  ;;  %s513_s18 = sand.u32 1, %s7121_s19  }
  0x23   : > { %v6649_v10 = vpack.c.bf16 %v532_v9, %v531_v8  ;;  %v7357_v30 = vrot.slane %v7318_v17, %v7321_v18  ;;  %v7361_v31 = vrot.slane %v7318_v17, %v7324_v19  ;;  %v7364_v32 = vrot.slane %v1887_v20, %v7304_v12  ;;  %v534_v33 = vld [vmem:[%s7288_s24 + $0x18] sm:$0xff]  ;;  %v535_v34 = vld [vmem:[%s7288_s24 + $0x20] sm:$0xff]  ;;  %v536_v35 = vld [vmem:[%s7288_s24 + $0x28] sm:$0xff]  ;;  %s525_s27 = scalar_lea.vmem %s10409_s1, %s6969_s29  ;;  %s5787_s25 = sshll.u32 %s513_s18, 6 }
  0x24   : > { %10563 = vst [vmem:[#allocation12_spill] sm:$0xff] %v7328_v21  ;;  %10564 = vst [vmem:[#allocation13_spill] sm:$0xff] %v7332_v22  ;;  %v7370_v36 = vrot.slane %v1887_v20, %v7307_v13  ;;  %v7373_v37 = vrot.slane %v1887_v20, %v7335_v23  ;;  %v7376_v38 = vrot.slane %v1887_v20, %v7338_v24  ;;  %v537_v47 = vld [vmem:[%s7288_s24 + $0x30] sm:$0xff]  ;;  %v538_v48 = vld [vmem:[%s7288_s24 + $0x38] sm:$0xff]  ;;  %v10628_v22 = vmov 0   ;;  %s515_s21 = scalar_lea.vmem [#allocation2], %s5787_s25  ;;  %s10360_s29 = scalar_lea.hbm %s10423_s15, %s6362_s26 }
  0x25   : > { %6650 = vmatprep.subr.bf16.mxu0 %v6649_v10  ;;  %624 = vperm.xlu1 %7014, %v574_v11   ;;  %10565 = vst [vmem:[#allocation14_spill] sm:$0xff] %v7342_v25  ;;  %10566 = vst [vmem:[#allocation15_spill] sm:$0xff] %v7346_v26  ;;  %v7379_v39 = vrot.slane %v1887_v20, %v7313_v15  ;;  %v7382_v40 = vrot.slane %v1887_v20, %v7316_v16  ;;  %v1214_v52 = vld [vmem:[%s10413_s5 + $0x8] sm:$0xff]  ;;  %v1213_v53 = vld [vmem:[%s10413_s5] sm:$0xff]  ;;  %v10596_v25 = vmov 1.0|1.0  }
  0x26   : > { %619 = vperm.xlu0 %7013, %v573_v14   ;;  %10567 = vst [vmem:[#allocation16_spill] sm:$0xff] %v7357_v30  ;;  %10568 = vst [vmem:[#allocation17_spill] sm:$0xff] %v7361_v31  ;;  %6652 = vmatpush3.bf16.msra.mxu0 %v6649_v10  ;;  %v7385_v41 = vrot.slane %v1887_v20, %v7321_v18  ;;  %v7388_v42 = vrot.slane %v1887_v20, %v7324_v19  ;;  %v1557_v54 = vld [vmem:[%s10416_s8 + $0x8] sm:$0xff]  ;;  %v1558_v56 = vld [vmem:[%s10416_s8 + $0x10] sm:$0xff]  ;;  %s10367_s22 = scalar_lea.sflag [#allocation3], %s513_s18 }
  0x27   : > { %10569 = vst [vmem:[#allocation18_spill] sm:$0xff] %v7364_v32  ;;  %10570 = vst [vmem:[#allocation19_spill] sm:$0xff] %v7370_v36  ;;  %v6653_v43 = vpack.c.bf16 %v534_v33, %v533_v27  ;;  %v6657_v44 = vpack.c.bf16 %v536_v35, %v535_v34  ;;  %v6661_v49 = vpack.c.bf16 %v538_v48, %v537_v47  ;;  %v1215_v57 = vld [vmem:[%s10413_s5 + $0x10] sm:$0xff]  ;;  %v1559_v58 = vld [vmem:[%s10416_s8 + $0x18] sm:$0xff] }
  0x28   : > { %10571 = vst [vmem:[#allocation20_spill] sm:$0xff] %v7373_v37  ;;  %10572 = vst [vmem:[#allocation21_spill] sm:$0xff] %v7376_v38  ;;  %v4922_v59 = vld [vmem:[%s10417_s9 + $0x8] sm:$0xff]  ;;  %v1560_v60 = vld [vmem:[%s10416_s8 + $0x20] sm:$0xff] }
  0x29   : > { %10573 = vst [vmem:[#allocation22_spill] sm:$0xff] %v7379_v39  ;;  %10574 = vst [vmem:[#allocation23_spill] sm:$0xff] %v7382_v40  ;;  %594 = vperm.xlu1 %7014, %v568_v28   ;;  %6654 = vmatprep.subr.bf16.mxu0 %v6653_v43  ;;  %v4921_v61 = vld [vmem:[%s10417_s9] sm:$0xff]  ;;  %v1561_v62 = vld [vmem:[%s10416_s8 + $0x28] sm:$0xff] }
  0x2a   : > { %10575 = vst [vmem:[#allocation24_spill] sm:$0xff] %v7385_v41  ;;  %10576 = vst [vmem:[#allocation25_spill] sm:$0xff] %v7388_v42  ;;  %589 = vperm.xlu0 %7013, %v567_v29   ;;  %6656 = vmatpush3.bf16.msra.mxu0 %v6653_v43  ;;  %v4978_v63 = vld [vmem:[%s10418_s10 + $0x8] sm:$0xff]  ;;  %v1562_v0 = vld [vmem:[%s10416_s8 + $0x30] sm:$0xff] }
  0x2b   : > { %6658 = vmatprep.subr.bf16.mxu0 %v6657_v44  ;;  %v4977_v1 = vld [vmem:[%s10418_s10] sm:$0xff]  ;;  %v1563_v2 = vld [vmem:[%s10416_s8 + $0x38] sm:$0xff]  ;;  %v4923_v7 = vld [vmem:[%s10417_s9 + $0x10] sm:$0xff] }
  0x2c   : > { %v4924_v4 = vld [vmem:[%s10417_s9 + $0x18] sm:$0xff]  ;;  %v1564_v5 = vld [vmem:[%s10416_s8 + $0x40] sm:$0xff]  ;;  %v1565_v8 = vld [vmem:[%s10416_s8 + $0x48] sm:$0xff] }
  0x2d   : > { %614 = vperm.xlu1 %7014, %v572_v45   ;;  %v5034_v9 = vld [vmem:[%s10419_s11 + $0x8] sm:$0xff]  ;;  %v1566_v10 = vld [vmem:[%s10416_s8 + $0x50] sm:$0xff]  ;;  %v5033_v11 = vld [vmem:[%s10419_s11] sm:$0xff] }
  0x2e   : > { %609 = vperm.xlu0 %7013, %v571_v46   ;;  %6660 = vmatpush3.bf16.msra.mxu0 %v6657_v44  ;;  %v1567_v14 = vld [vmem:[%s10416_s8 + $0x58] sm:$0xff]  ;;  %v1380_v20 = vld [vmem:[%s10415_s7 + $0x8] sm:$0xff]  ;;  %v1568_v27 = vld [vmem:[%s10416_s8 + $0x60] sm:$0xff] }
  0x2f   : > { %6662 = vmatprep.subr.bf16.mxu0 %v6661_v49  ;;  %v1379_v28 = vld [vmem:[%s10415_s7] sm:$0xff]  ;;  %v1569_v29 = vld [vmem:[%s10416_s8 + $0x68] sm:$0xff]  ;;  %v4980_v33 = vld [vmem:[%s10418_s10 + $0x18] sm:$0xff] }
  0x30   : > { %v1570_v34 = vld [vmem:[%s10416_s8 + $0x70] sm:$0xff]  ;;  %v1571_v43 = vld [vmem:[%s10416_s8 + $0x78] sm:$0xff]  ;;  %v4926_v44 = vld [vmem:[%s10417_s9 + $0x28] sm:$0xff] }
  0x31   : > { %634 = vperm.xlu1 %7014, %v576_v50   ;;  %v4979_v35 = vld [vmem:[%s10418_s10 + $0x10] sm:$0xff]  ;;  %v4925_v45 = vld [vmem:[%s10417_s9 + $0x20] sm:$0xff]  ;;  %v5036_v46 = vld [vmem:[%s10419_s11 + $0x18] sm:$0xff] }
  0x32   : > { %629 = vperm.xlu0 %7013, %v575_v51   ;;  %6664 = vmatpush3.bf16.msra.mxu0 %v6661_v49  ;;  %v5035_v47 = vld [vmem:[%s10419_s11 + $0x10] sm:$0xff]  ;;  %v1382_v48 = vld [vmem:[%s10415_s7 + $0x18] sm:$0xff]  ;;  %v4982_v50 = vld [vmem:[%s10418_s10 + $0x28] sm:$0xff] }
  0x33   : > { %v1381_v49 = vld [vmem:[%s10415_s7 + $0x10] sm:$0xff]  ;;  %v4981_v51 = vld [vmem:[%s10418_s10 + $0x20] sm:$0xff]  ;;  %v1575_v3 = vld [vmem:[%s10416_s8 + $0x98] sm:$0xff] }
  0x35   : > { %1224 = vperm.xlu1 %7014, %v1214_v52   ;;  %6514 = vmatmul.mubr.msk.f32.vlgmr.msra.gmra.mrb[0].mxu0 %vm10522_vm0, %v1557_v54  ;;  %v539_v52 = vld [vmem:[%s525_s27] sm:$0xff]  ;;  %v4928_v54 = vld [vmem:[%s10417_s9 + $0x38] sm:$0xff] }
  0x36   : > { %1219 = vperm.xlu0 %7013, %v1213_v53   ;;  %6516 = vmatprep.mubr.msk.f32.mxu0 %vm10522_vm0, %v1558_v56  ;;  %v541_v53 = vld [vmem:[%s525_s27 + $0x10] sm:$0xff]  ;;  %v542_v56 = vld [vmem:[%s525_s27 + $0x18] sm:$0xff] }
  0x39   : > { %1234 = vperm.xlu1 %7014, %v1216_v55   ;;  %6517 = vmatmul.mubr.msk.f32.gmra.mrb[2].mxu0 %vm10522_vm0, %v1559_v58  ;;  %v540_v55 = vld [vmem:[%s525_s27 + $0x8] sm:$0xff]  ;;  %v547_v58 = vmul.f32 %v541_v53, %v541_v53 }
  0x3a   : > { %1229 = vperm.xlu0 %7013, %v1215_v57   ;;  %6519 = vmatprep.mubr.msk.f32.mxu0 %vm10522_vm0, %v1560_v60  ;;  %v545_v57 = vmul.f32 %v539_v52, %v539_v52  ;;  %v543_v60 = vld [vmem:[%s525_s27 + $0x20] sm:$0xff] }
  0x3d   : > { %4936 = vperm.xlu1 %7014, %v4922_v59   ;;  %6520 = vmatmul.mubr.msk.f32.gmra.mrb[4].mxu0 %vm10522_vm0, %v1561_v62  ;;  %v4927_v59 = vld [vmem:[%s10417_s9 + $0x30] sm:$0xff]  ;;  %v548_v62 = vmul.f32 %v542_v56, %v542_v56 }
  0x3e   : > { %4931 = vperm.xlu0 %7013, %v4921_v61   ;;  %6522 = vmatprep.mubr.msk.f32.mxu0 %vm10522_vm0, %v1562_v0  ;;  %v546_v61 = vmul.f32 %v540_v55, %v540_v55  ;;  %v544_v0 = vld [vmem:[%s525_s27 + $0x28] sm:$0xff]  ;;  %s5697_s27 = sshll.u32 %s515_s21, 4  ;;  %s10362_s27 = int_to_ptr.vmem [resolvable:$true] %s5697_s27 }
  0x3f   : > { %s7067_s16 = scalar_lea.vmem %s10362_s27, 1024 }
  0x40   : > { %p7068_p11 = scmp.ne.s32.totalorder %s10362_s27, %s7067_s16 }
  0x41   : > { %4992 = vperm.xlu1 %7014, %v4978_v63   ;;  %6523 = vmatmul.mubr.msk.f32.gmra.mrb[6].mxu0 %vm10522_vm0, %v1563_v2  ;;  %v5038_v63 = vld [vmem:[%s10419_s11 + $0x28] sm:$0xff]  ;;  %v551_v2 = vmul.f32 %v543_v60, %v543_v60 }
  0x42   : > { %4987 = vperm.xlu0 %7013, %v4977_v1   ;;  %6525 = vmatprep.mubr.msk.f32.mxu0 %vm10522_vm0, %v1564_v5  ;;  %v549_v1 = vadd.f32 %v547_v58, %v545_v57  ;;  %v550_v5 = vadd.f32 %v548_v62, %v546_v61  ;;  %v5126_v57 = vld [vmem:[%s10421_s13 + $0x28] sm:$0xff]  ;;  %v7601_v61 = vrot.slane %v7318_v17, %v7338_v24  ;;  %p7069_p12 = pnand %p7068_p11, %p7254_p5 }
  0x44   : > { %vm1972_vm2 = vcmp.eq.s32.totalorder %v7283_v6, %v7601_v61  ;;  %p7070_p13 = pneg %p7069_p12 }
  0x45   : > { %4946 = vperm.xlu1 %7014, %v4924_v4   ;;  %6526 = vmatmul.mubr.msk.f32.gmra.mrb[8].mxu0 %vm10522_vm0, %v1565_v8  ;;  %v5037_v4 = vld [vmem:[%s10419_s11 + $0x20] sm:$0xff]  ;;  %v1384_v8 = vld [vmem:[%s10415_s7 + $0x28] sm:$0xff] }
  0x46   : > { %4941 = vperm.xlu0 %7013, %v4923_v7   ;;  %6528 = vmatprep.mubr.msk.f32.mxu0 %vm10522_vm0, %v1566_v10  ;;  %v552_v7 = vmul.f32 %v544_v0, %v544_v0  ;;  %v1383_v10 = vld [vmem:[%s10415_s7 + $0x20] sm:$0xff] }
  0x49   : > { %5048 = vperm.xlu1 %7014, %v5034_v9   ;;  %6529 = vmatmul.mubr.msk.f32.gmra.mrb[10].mxu0 %vm10522_vm0, %v1567_v14  ;;  %v553_v9 = vadd.f32 %v551_v2, %v549_v1  ;;  %v4984_v14 = vld [vmem:[%s10418_s10 + $0x38] sm:$0xff] }
  0x4a   : > { %5043 = vperm.xlu0 %7013, %v5033_v11   ;;  %6531 = vmatprep.mubr.msk.f32.mxu0 %vm10522_vm0, %v1568_v27  ;;  %v554_v11 = vadd.f32 %v552_v7, %v550_v5  ;;  %v4983_v27 = vld [vmem:[%s10418_s10 + $0x30] sm:$0xff]  ;;  %v5128_v2 = vld [vmem:[%s10421_s13 + $0x38] sm:$0xff] }
  0x4d   : > { %1394 = vperm.xlu1 %7014, %v1380_v20   ;;  %6532 = vmatmul.mubr.msk.f32.gmra.mrb[12].mxu0 %vm10522_vm0, %v1569_v29  ;;  %v555_v20 = vmax.f32 %v553_v9, 1e-24  ;;  %v5040_v29 = vld [vmem:[%s10419_s11 + $0x38] sm:$0xff]  ;;  %v5127_v9 = vld [vmem:[%s10421_s13 + $0x30] sm:$0xff] }
  0x4e   : > { %1389 = vperm.xlu0 %7013, %v1379_v28   ;;  %6534 = vmatprep.mubr.msk.f32.mxu0 %vm10522_vm0, %v1570_v34  ;;  %v556_v28 = vmax.f32 %v554_v11, 1e-24  ;;  %v1386_v34 = vld [vmem:[%s10415_s7 + $0x38] sm:$0xff] }
  0x4f   : > { %7015 = vrsqrt.f32 %v555_v20 }
  0x50   : > { %7017 = vrsqrt.f32 %v556_v28 }
  0x51   : > { %5002 = vperm.xlu1 %7014, %v4980_v33   ;;  %6535 = vmatmul.mubr.msk.f32.gmra.mrb[14].mxu0 %vm10522_vm0, %v1571_v43  ;;  %v5039_v33 = vld [vmem:[%s10419_s11 + $0x30] sm:$0xff]  ;;  %v5122_v43 = vld [vmem:[%s10421_s13 + $0x8] sm:$0xff] }
  0x52   : > { %4997 = vperm.xlu0 %7013, %v4979_v35   ;;  %v1385_v35 = vld [vmem:[%s10415_s7 + $0x30] sm:$0xff] }
  0x55   : > { %4956 = vperm.xlu1 %7014, %v4926_v44   ;;  %v5121_v44 = vld [vmem:[%s10421_s13] sm:$0xff] }
  0x56   : > { %4951 = vperm.xlu0 %7013, %v4925_v45  }
  0x59   : > { %5058 = vperm.xlu1 %7014, %v5036_v46   ;;  %v7016_v45 = vpop.eup %7015  ;;  %v5124_v46 = vld [vmem:[%s10421_s13 + $0x18] sm:$0xff] }
  0x5a   : > { %5053 = vperm.xlu0 %7013, %v5035_v47   ;;  %v5123_v47 = vld [vmem:[%s10421_s13 + $0x10] sm:$0xff] }
  0x5d   : > { %1404 = vperm.xlu1 %7014, %v1382_v48   ;;  %v7018_v48 = vpop.eup %7017 }
  0x5e   : > { %1399 = vperm.xlu0 %7013, %v1381_v49   ;;  %v559_v49 = vmul.f32 %v7016_v45, %v539_v52  ;;  %v7595_v58 = vmul.f32 %v7018_v48, %v540_v55  ;;  %v5125_v52 = vld [vmem:[%s10421_s13 + $0x20] sm:$0xff] }
  0x60   : > { %v7612_v55 = vrot.slane %v559_v49, %v7304_v12  ;;  %v7622_v62 = vrot.slane %v559_v49, %v7307_v13  ;;  %v7631_v1 = vrot.slane %v559_v49, %v7335_v23  ;;  %v7643_v7 = vrot.slane %v559_v49, %v7338_v24 }
  0x61   : > { %5012 = vperm.xlu1 %7014, %v4982_v50   ;;  %v561_v50 = vmul.f32 %v7016_v45, %v541_v53  ;;  %v1209_v53 = vld [vmem:[%s10412_s4] sm:$0xff]  ;;  %v7655_v11 = vrot.slane %v559_v49, %v7313_v15  ;;  %v7778_v32 = vrot.slane %v7595_v58, %v7307_v13  ;;  %v7800_v41 = vrot.slane %v7595_v58, %v7335_v23 }
  0x62   : > { %5007 = vperm.xlu0 %7013, %v4981_v51   ;;  %v563_v51 = vmul.f32 %v7016_v45, %v543_v60  ;;  %v7609_v60 = vmul.f32 %v7018_v48, %v544_v0  ;;  %10577 = vst [vmem:[#allocation26_spill] sm:$0xff] %v7612_v55  ;;  %6471 = vmatprep.mubr.msk.f32.mxu1 %vm1237_vm1, %v1209_v53  ;;  %10579 = vst [vmem:[#allocation28_spill] sm:$0xff] %v7622_v62  ;;  %v5130_v45 = vld [vmem:[%s10421_s13 + $0x48] sm:$0xff]  ;;  %v7716_v53 = vadd.s32 40, %v7283_v6 }
  0x63   : > { %10581 = vst [vmem:[#allocation30_spill] sm:$0xff] %v7631_v1  ;;  %10583 = vst [vmem:[#allocation32_spill] sm:$0xff] %v7643_v7  ;;  %v7667_v28 = vrot.slane %v561_v50, %v7316_v16  ;;  %v7859_v37 = vrot.slane %v7595_v58, %v7338_v24  ;;  %v7893_v21 = vrot.slane %v7595_v58, %v7321_v18 }
  0x64   : > { %v7628_v0 = vrot.slane %v563_v51, %v7307_v13  ;;  %v7640_v5 = vrot.slane %v563_v51, %v7335_v23  ;;  %10586 = vst [vmem:[#allocation35_spill] sm:$0xff] %v7655_v11  ;;  %v7661_v20 = vrot.slane %v563_v51, %v7313_v15  ;;  %10593 = vst [vmem:[#allocation42_spill] sm:$0xff] %v7716_v53 }
  0x65   : > { %4966 = vperm.xlu1 %7014, %v4928_v54   ;;  %v7590_v54 = vrot.slane %v7318_v17, %v7335_v23  ;;  %v7618_v17 = vrot.slane %v563_v51, %v7304_v12  ;;  %vm2052_vm13 = vcmp.eq.s32.totalorder %v7716_v53, %v7601_v61  ;;  %v7774_v40 = vrot.slane %v7609_v60, %v7304_v12 }
  0x66   : > { %4961 = vperm.xlu0 %7013, %v4927_v59   ;;  %v7597_v59 = vmul.f32 %v7018_v48, %v542_v56  ;;  %v7615_v56 = vrot.slane %v561_v50, %v7304_v12  ;;  %v1573_v48 = vld [vmem:[%s10416_s8 + $0x88] sm:$0xff]  ;;  %v7796_v26 = vrot.slane %v7609_v60, %v7307_v13  ;;  %v7881_v30 = vrot.slane %v7609_v60, %v7338_v24 }
  0x67   : > { %vm1971_vm3 = vcmp.eq.s32.totalorder %v7283_v6, %v7590_v54  ;;  %10608 = vst [vmem:[#allocation52_spill] sm:$0xff] %v7893_v21  ;;  %v7953_v21 = vrot.slane %v7595_v58, %v7324_v19 }
  0x68   : > { %10578 = vst [vmem:[#allocation27_spill] sm:$0xff] %v7615_v56  ;;  %v7770_v39 = vrot.slane %v7597_v59, %v7304_v12  ;;  %v7782_v36 = vrot.slane %v7597_v59, %v7307_v13  ;;  %v7804_v42 = vrot.slane %v7597_v59, %v7335_v23  ;;  %v7863_v38 = vrot.slane %v7597_v59, %v7338_v24 }
  0x69   : > { %5068 = vperm.xlu1 %7014, %v5038_v63   ;;  %v7625_v63 = vrot.slane %v561_v50, %v7307_v13  ;;  %v7820_v13 = vrot.slane %v7609_v60, %v7335_v23  ;;  %10605 = vst [vmem:[#allocation49_spill] sm:$0xff] %v7881_v30  ;;  %v7889_v31 = vrot.slane %v7597_v59, %v7316_v16  ;;  %10617 = vst [vmem:[#allocation57_spill] sm:$0xff] %v7953_v21 }
  0x6a   : > { %5063 = vperm.xlu0 %7013, %v5037_v4   ;;  %v7637_v4 = vrot.slane %v561_v50, %v7335_v23  ;;  %v5134_v23 = vld [vmem:[%s10421_s13 + $0x68] sm:$0xff] }
  0x6b   : > { %10580 = vst [vmem:[#allocation29_spill] sm:$0xff] %v7625_v63  ;;  %10607 = vst [vmem:[#allocation51_spill] sm:$0xff] %v7889_v31  ;;  %v7910_v31 = vrot.slane %v7597_v59, %v7321_v18 }
  0x6c   : > { %10582 = vst [vmem:[#allocation31_spill] sm:$0xff] %v7637_v4 }
  0x6d   : > { %1414 = vperm.xlu1 %7014, %v1384_v8   ;;  %v7646_v8 = vrot.slane %v561_v50, %v7338_v24  ;;  %10611 = vst [vmem:[#allocation53_spill] sm:$0xff] %v7910_v31  ;;  %v7949_v31 = vrot.slane %v7609_v60, %v7313_v15 }
  0x6e   : > { %1409 = vperm.xlu0 %7013, %v1383_v10   ;;  %v7652_v10 = vrot.slane %v563_v51, %v7338_v24 }
  0x6f   : > { %10584 = vst [vmem:[#allocation33_spill] sm:$0xff] %v7646_v8  ;;  %10616 = vst [vmem:[#allocation56_spill] sm:$0xff] %v7949_v31 }
  0x70   : > { %10585 = vst [vmem:[#allocation34_spill] sm:$0xff] %v7652_v10 }
  0x71   : > { %5022 = vperm.xlu1 %7014, %v4984_v14   ;;  %v7658_v14 = vrot.slane %v561_v50, %v7313_v15 }
  0x72   : > { %5017 = vperm.xlu0 %7013, %v4983_v27   ;;  %v7664_v27 = vrot.slane %v559_v49, %v7316_v16 }
  0x73   : > { %10587 = vst [vmem:[#allocation36_spill] sm:$0xff] %v7658_v14 }
  0x74   : > { %10588 = vst [vmem:[#allocation37_spill] sm:$0xff] %v7664_v27 }
  0x75   : > { %5078 = vperm.xlu1 %7014, %v5040_v29   ;;  %v7670_v29 = vrot.slane %v563_v51, %v7316_v16 }
  0x76   : > { %5073 = vperm.xlu0 %7013, %v5039_v33   ;;  %v7673_v33 = vrot.slane %v559_v49, %v7321_v18 }
  0x79   : > { %1424 = vperm.xlu1 %7014, %v1386_v34   ;;  %v7676_v34 = vrot.slane %v561_v50, %v7321_v18 }
  0x7a   : > { %1419 = vperm.xlu0 %7013, %v1385_v35   ;;  %v7679_v35 = vrot.slane %v563_v51, %v7321_v18 }
  0x7d   : > { %5144 = vperm.xlu1 %7014, %v5122_v43   ;;  %v7682_v43 = vrot.slane %v559_v49, %v7324_v19  ;;  %v5129_v49 = vld [vmem:[%s10421_s13 + $0x40] sm:$0xff] }
  0x7e   : > { %5139 = vperm.xlu0 %7013, %v5121_v44   ;;  %v7685_v44 = vrot.slane %v561_v50, %v7324_v19  ;;  %v7707_v50 = vadd.s32 16, %v7283_v6 }
  0x80   : > { %10590 = vst [vmem:[#allocation39_spill] sm:$0xff] %v7707_v50  ;;  %vm2004_vm7 = vcmp.eq.s32.totalorder %v7707_v50, %v7601_v61  ;;  %vm2003_vm9 = vcmp.eq.s32.totalorder %v7707_v50, %v7590_v54  ;;  %v1578_v50 = vld [vmem:[%s10416_s8 + $0xb0] sm:$0xff] }
  0x81   : > { %5154 = vperm.xlu1 %7014, %v5124_v46   ;;  %v7691_v46 = vadd.s32 8, %v7283_v6 }
  0x82   : > { %5149 = vperm.xlu0 %7013, %v5123_v47   ;;  %v1572_v47 = vld [vmem:[%s10416_s8 + $0x80] sm:$0xff] }
  0x83   : > { %10589 = vst [vmem:[#allocation38_spill] sm:$0xff] %v7691_v46  ;;  %6537 = vmatprep.mubr.msk.f32.mxu0 %vm10522_vm0, %v1572_v47  ;;  %vm1988_vm4 = vcmp.eq.s32.totalorder %v7691_v46, %v7601_v61  ;;  %vm1987_vm5 = vcmp.eq.s32.totalorder %v7691_v46, %v7590_v54  ;;  %v10432_v47 = vmov 1.0|1.0   ;;  %v7885_v46 = vrot.slane %v7595_v58, %v7316_v16 }
  0x84   : > { %6538 = vmatmul.mubr.msk.f32.gmra.mrb[16].mxu0 %vm10522_vm0, %v1573_v48  ;;  %vm6116_vm6 = vmpackc.low %vm1988_vm4, %vm1972_vm2  ;;  %v7757_v48 = vadd.s32 48, %v7283_v6  ;;  %vm2051_vm4 = vcmp.eq.s32.totalorder %v7716_v53, %v7590_v54  ;;  %v7935_v53 = vadd.s32 80, %v7283_v6 }
  0x85   : > { %5164 = vperm.xlu1 %7014, %v5126_v57   ;;  %v7710_v57 = vadd.s32 24, %v7283_v6  ;;  %6117 = vmatprep.subr.msk.bf16.mxu0 %vm6116_vm6, %v10432_v47  ;;  %vm6118_vm11 = vmpackc.low %vm1987_vm5, %vm1971_vm3  ;;  %v5131_v47 = vld [vmem:[%s10421_s13 + $0x50] sm:$0xff]  ;;  %10606 = vst [vmem:[#allocation50_spill] sm:$0xff] %v7885_v46  ;;  %v7962_v46 = vadd.s32 104, %v7283_v6 }
  0x86   : > { %5159 = vperm.xlu0 %7013, %v5125_v52   ;;  %v7713_v52 = vadd.s32 32, %v7283_v6  ;;  %10594 = vst [vmem:[#allocation43_spill] sm:$0xff] %v7757_v48  ;;  %6119 = vmatpush1.bf16.msk.msra.mxu0 %vm6118_vm11, %v10596_v25  ;;  %vm2068_vm5 = vcmp.eq.s32.totalorder %v7757_v48, %v7601_v61  ;;  %10614 = vst [vmem:[#allocation54_spill] sm:$0xff] %v7935_v53 }
  0x87   : > { %10591 = vst [vmem:[#allocation40_spill] sm:$0xff] %v7710_v57  ;;  %vm2020_vm8 = vcmp.eq.s32.totalorder %v7710_v57, %v7601_v61  ;;  %vm2019_vm10 = vcmp.eq.s32.totalorder %v7710_v57, %v7590_v54  ;;  %v7867_v57 = vrot.slane %v7595_v58, %v7313_v15  ;;  %10619 = vst [vmem:[#allocation59_spill] sm:$0xff] %v7962_v46 }
  0x88   : > { %10592 = vst [vmem:[#allocation41_spill] sm:$0xff] %v7713_v52  ;;  %vm2036_vm12 = vcmp.eq.s32.totalorder %v7713_v52, %v7601_v61  ;;  %vm6120_vm14 = vmpackc.low %vm2020_vm8, %vm2004_vm7  ;;  %vm2035_vm3 = vcmp.eq.s32.totalorder %v7713_v52, %v7590_v54  ;;  %v7938_v52 = vadd.s32 88, %v7283_v6 }
  0x89   : > { %5174 = vperm.xlu1 %7014, %v5128_v2   ;;  %v7720_v2 = vrot.slane %v563_v51, %v7324_v19  ;;  %v1574_v51 = vld [vmem:[%s10416_s8 + $0x90] sm:$0xff]  ;;  %6121 = vmatprep.subr.msk.bf16.mxu0 %vm6120_vm14, %v10596_v25  ;;  %vm7813_vm15 = vmpackc.low %vm2019_vm10, %vm2003_vm9  ;;  %10603 = vst [vmem:[#allocation47_spill] sm:$0xff] %v7867_v57  ;;  %vm2067_vm9 = vcmp.eq.s32.totalorder %v7757_v48, %v7590_v54 }
  0x8a   : > { %5169 = vperm.xlu0 %7013, %v5127_v9   ;;  %v7724_v9 = vrot.slane %v7595_v58, %v7304_v12  ;;  %v1576_v12 = vld [vmem:[%s10416_s8 + $0xa0] sm:$0xff]  ;;  %6540 = vmatprep.mubr.msk.f32.mxu0 %vm10522_vm0, %v1574_v51  ;;  %vm7828_vm2 = vmpackc.low %vm2052_vm13, %vm2036_vm12  ;;  %v7845_v51 = vadd.s32 64, %v7283_v6  ;;  %10615 = vst [vmem:[#allocation55_spill] sm:$0xff] %v7938_v52  ;;  %v7982_v58 = vadd.s32 112, %v7283_v6 }
  0x8b   : > { %6541 = vmatmul.mubr.msk.f32.gmra.mrb[18].mxu0 %vm10522_vm0, %v1575_v3  ;;  %v1577_v3 = vld [vmem:[%s10416_s8 + $0xa8] sm:$0xff]  ;;  %vm7904_vm7 = vmpackc.low %vm2051_vm4, %vm2035_vm3  ;;  %vm2132_vm3 = vcmp.eq.s32.totalorder %v7935_v53, %v7601_v61  ;;  %vm2148_vm4 = vcmp.eq.s32.totalorder %v7938_v52, %v7601_v61 }
  0x8c   : > { %10601 = vst [vmem:[#allocation45_spill] sm:$0xff] %v7845_v51  ;;  %6543 = vmatprep.mubr.msk.f32.mxu0 %vm10522_vm0, %v1576_v12  ;;  %v7871_v12 = vrot.slane %v7597_v59, %v7313_v15  ;;  %6123 = vmatpush1.bf16.msk.msra.mxu0 %vm7813_vm15, %v10596_v25  ;;  %vm2100_vm11 = vcmp.eq.s32.totalorder %v7845_v51, %v7601_v61  ;;  %10622 = vst [vmem:[#allocation62_spill] sm:$0xff] %v7982_v58 }
  0x8d   : > { %5184 = vperm.xlu1 %7014, %v5130_v45   ;;  %v5132_v45 = vld [vmem:[%s10421_s13 + $0x58] sm:$0xff]  ;;  %6125 = vmatprep.subr.msk.bf16.mxu0 %vm7828_vm2, %v10596_v25  ;;  %v7970_v15 = vrot.slane %v7597_v59, %v7324_v19  ;;  %v7989_v59 = vrot.slane %v7609_v60, %v7321_v18  ;;  %vm2099_vm15 = vcmp.eq.s32.totalorder %v7845_v51, %v7590_v54 }
  0x8e   : > { %5179 = vperm.xlu0 %7013, %v5129_v49   ;;  %v7760_v49 = vadd.s32 56, %v7283_v6  ;;  %10604 = vst [vmem:[#allocation48_spill] sm:$0xff] %v7871_v12  ;;  %v7966_v12 = vrot.slane %v7609_v60, %v7316_v16  ;;  %v7985_v16 = vadd.s32 120, %v7283_v6  ;;  %v8008_v18 = vrot.slane %v7609_v60, %v7324_v19 }
  0x8f   : > { %6544 = vmatmul.mubr.msk.f32.gmra.mrb[20].mxu0 %vm10522_vm0, %v1577_v3  ;;  %v1579_v3 = vld [vmem:[%s10416_s8 + $0xb8] sm:$0xff]  ;;  %10621 = vst [vmem:[#allocation61_spill] sm:$0xff] %v7970_v15  ;;  %10624 = vst [vmem:[#allocation64_spill] sm:$0xff] %v7989_v59 }
  0x90   : > { %10595 = vst [vmem:[#allocation44_spill] sm:$0xff] %v7760_v49  ;;  %vm2084_vm6 = vcmp.eq.s32.totalorder %v7760_v49, %v7601_v61  ;;  %vm2083_vm10 = vcmp.eq.s32.totalorder %v7760_v49, %v7590_v54  ;;  %6546 = vmatprep.mubr.msk.f32.mxu0 %vm10522_vm0, %v1578_v50  ;;  %6127 = vmatpush1.bf16.msk.msra.mxu0 %vm7904_vm7, %v10596_v25  ;;  %v7959_v50 = vadd.s32 96, %v7283_v6  ;;  %10620 = vst [vmem:[#allocation60_spill] sm:$0xff] %v7966_v12 }
  0x91   : > { %5194 = vperm.xlu1 %7014, %v5132_v45   ;;  %v7848_v45 = vadd.s32 72, %v7283_v6  ;;  %vm7918_vm8 = vmpackc.low %vm2084_vm6, %vm2068_vm5  ;;  %10623 = vst [vmem:[#allocation63_spill] sm:$0xff] %v7985_v16  ;;  %vm2131_vm5 = vcmp.eq.s32.totalorder %v7935_v53, %v7590_v54  ;;  %vm2147_vm6 = vcmp.eq.s32.totalorder %v7938_v52, %v7590_v54 }
  0x92   : > { %5189 = vperm.xlu0 %7013, %v5131_v47   ;;  %v5133_v47 = vld [vmem:[%s10421_s13 + $0x60] sm:$0xff]  ;;  %10618 = vst [vmem:[#allocation58_spill] sm:$0xff] %v7959_v50  ;;  %6129 = vmatprep.subr.msk.bf16.mxu0 %vm7918_vm8, %v10596_v25  ;;  %vm6130_vm13 = vmpackc.low %vm2083_vm10, %vm2067_vm9  ;;  %vm2164_vm7 = vcmp.eq.s32.totalorder %v7959_v50, %v7601_v61  ;;  %vm2180_vm8 = vcmp.eq.s32.totalorder %v7962_v46, %v7601_v61 }
  0x93   : > { %10602 = vst [vmem:[#allocation46_spill] sm:$0xff] %v7848_v45  ;;  %vm2116_vm12 = vcmp.eq.s32.totalorder %v7848_v45, %v7601_v61  ;;  %vm2115_vm2 = vcmp.eq.s32.totalorder %v7848_v45, %v7590_v54  ;;  %6547 = vmatmul.mubr.msk.f32.gmra.mrb[22].mxu0 %vm10522_vm0, %v1579_v3  ;;  %10627 = vst [vmem:[#allocation65_spill] sm:$0xff] %v8008_v18  ;;  %vm2163_vm10 = vcmp.eq.s32.totalorder %v7959_v50, %v7590_v54 }
  0x94   : > { %vm7997_vm14 = vmpackc.low %vm2116_vm12, %vm2100_vm11  ;;  %3090 = vmatprep.mubr.bf16.mxu0 %v10628_v22  ;;  %6131 = vmatpush1.bf16.msk.msra.mxu0 %vm6130_vm13, %v10596_v25  ;;  %vm2179_vm11 = vcmp.eq.s32.totalorder %v7962_v46, %v7590_v54  ;;  %vm2196_vm12 = vcmp.eq.s32.totalorder %v7982_v58, %v7601_v61  ;;  %vm2212_vm13 = vcmp.eq.s32.totalorder %v7985_v16, %v7601_v61 }
  0x95   : > { %5204 = vperm.xlu1 %7014, %v5134_v23   ;;  %v5136_v23 = vld [vmem:[%s10421_s13 + $0x78] sm:$0xff]  ;;  %6133 = vmatprep.subr.msk.bf16.mxu0 %vm7997_vm14, %v10596_v25  ;;  %vm8037_vm9 = vmpackc.low %vm2115_vm2, %vm2099_vm15  ;;  %vm2195_vm15 = vcmp.eq.s32.totalorder %v7982_v58, %v7590_v54  ;;  %vm2211_vm2 = vcmp.eq.s32.totalorder %v7985_v16, %v7590_v54 }
  0x96   : > { %5199 = vperm.xlu0 %7013, %v5133_v47   ;;  %v5135_v47 = vld [vmem:[%s10421_s13 + $0x70] sm:$0xff]  ;;  %vm8063_vm14 = vmpackc.low %vm2148_vm4, %vm2132_vm3 }
  0x97   : > { %vm6138_vm3 = vmpackc.low %vm2147_vm6, %vm2131_vm5 }
  0x98   : > { %6135 = vmatpush1.bf16.msk.msra.mxu0 %vm8037_vm9, %v10596_v25  ;;  %vm6140_vm4 = vmpackc.low %vm2180_vm8, %vm2164_vm7 }
  0x99   : > { %5214 = vperm.xlu1 %7014, %v5136_v23   ;;  %6137 = vmatprep.subr.msk.bf16.mxu0 %vm8063_vm14, %v10596_v25  ;;  %vm6142_vm5 = vmpackc.low %vm2179_vm11, %vm2163_vm10 }
  0x9a   : > { %5209 = vperm.xlu0 %7013, %v5135_v47   ;;  %vm6144_vm6 = vmpackc.low %vm2212_vm13, %vm2196_vm12 }
  0x9b   : > { %vm6146_vm7 = vmpackc.low %vm2211_vm2, %vm2195_vm15 }
  0x9c   : > { %v8024_v19 = vpop.permute.xlu1 %599  ;;  %v8026_v60 = vpop.permute.xlu0 %579  ;;  %6139 = vmatpush1.bf16.msk.msra.mxu0 %vm6138_vm3, %v10596_v25 }
  0x9d   : > { %v641_v3 = vmul.f32 %v7612_v55, %v8026_v60  ;;  %v649_v47 = vmul.f32 %v7615_v56, %v8024_v19  ;;  %v673_v24 = vmul.f32 %v7622_v62, %v8026_v60  ;;  %v681_v45 = vmul.f32 %v7625_v63, %v8024_v19  ;;  %6141 = vmatprep.subr.msk.bf16.mxu0 %vm6140_vm4, %v10596_v25 }
  0x9e   : > { %v709_v49 = vmul.f32 %v7631_v1, %v8026_v60  ;;  %v717_v48 = vmul.f32 %v7637_v4, %v8024_v19  ;;  %v745_v22 = vmul.f32 %v7643_v7, %v8026_v60  ;;  %v753_v6 = vmul.f32 %v7646_v8, %v8024_v19 }
  0x9f   : > { %v653_v18 = vadd.f32 %v649_v47, %v641_v3  ;;  %v685_v15 = vadd.f32 %v681_v45, %v673_v24  ;;  %v781_v21 = vmul.f32 %v7655_v11, %v8026_v60  ;;  %v789_v59 = vmul.f32 %v7658_v14, %v8024_v19 }
  0xa0   : > { %v8086_v12 = vpop.permute.xlu1 %604  ;;  %v8088_v31 = vpop.permute.xlu0 %584  ;;  %v721_v57 = vadd.f32 %v717_v48, %v709_v49  ;;  %v757_v30 = vadd.f32 %v753_v6, %v745_v22  ;;  %v817_v3 = vmul.f32 %v7664_v27, %v8026_v60  ;;  %v825_v45 = vmul.f32 %v7667_v28, %v8024_v19  ;;  %6143 = vmatpush1.bf16.msk.msra.mxu0 %vm6142_vm5, %v10596_v25 }
  0xa1   : > { %v642_v6 = vmul.f32 %v7612_v55, %v8088_v31  ;;  %v650_v48 = vmul.f32 %v7615_v56, %v8086_v12  ;;  %v674_v49 = vmul.f32 %v7622_v62, %v8088_v31  ;;  %v682_v51 = vmul.f32 %v7625_v63, %v8086_v12  ;;  %6145 = vmatprep.subr.msk.bf16.mxu0 %vm6144_vm6, %v10596_v25 }
  0xa2   : > { %v710_v22 = vmul.f32 %v7631_v1, %v8088_v31  ;;  %v718_v23 = vmul.f32 %v7637_v4, %v8086_v12  ;;  %v746_v47 = vmul.f32 %v7643_v7, %v8088_v31  ;;  %v754_v24 = vmul.f32 %v7646_v8, %v8086_v12 }
  0xa3   : > { %v654_v52 = vadd.f32 %v650_v48, %v642_v6  ;;  %v686_v53 = vadd.f32 %v682_v51, %v674_v49  ;;  %v782_v63 = vmul.f32 %v7655_v11, %v8088_v31  ;;  %v790_v62 = vmul.f32 %v7658_v14, %v8086_v12 }
  0xa4   : > { %v8130_v1 = vpop.permute.xlu1 %624  ;;  %v722_v56 = vadd.f32 %v718_v23, %v710_v22  ;;  %v758_v4 = vadd.f32 %v754_v24, %v746_v47  ;;  %v793_v55 = vadd.f32 %v789_v59, %v781_v21  ;;  %v818_v7 = vmul.f32 %v7664_v27, %v8088_v31  ;;  %6147 = vmatpush1.bf16.msk.msra.mxu0 %vm6146_vm7, %v10596_v25 }
  0xa5   : > { %v8141_v6 = vpop.permute.xlu0 %619  ;;  %v662_v48 = vmul.f32 %v7618_v17, %v8130_v1  ;;  %v694_v21 = vmul.f32 %v7628_v0, %v8130_v1  ;;  %v730_v59 = vmul.f32 %v7640_v5, %v8130_v1  ;;  %v766_v49 = vmul.f32 %v7652_v10, %v8130_v1 }
  0xa6   : > { %v661_v51 = vmul.f32 %v7618_v17, %v8141_v6  ;;  %v693_v22 = vmul.f32 %v7628_v0, %v8141_v6  ;;  %v729_v23 = vmul.f32 %v7640_v5, %v8141_v6  ;;  %v765_v47 = vmul.f32 %v7652_v10, %v8141_v6 }
  0xa7   : > { %v666_v24 = vadd.f32 %v662_v48, %v654_v52  ;;  %v698_v46 = vadd.f32 %v694_v21, %v686_v53  ;;  %v734_v50 = vadd.f32 %v730_v59, %v722_v56  ;;  %v770_v27 = vadd.f32 %v766_v49, %v758_v4 }
  0xa8   : > { %v665_v61 = vadd.f32 %v661_v51, %v653_v18  ;;  %v697_v14 = vadd.f32 %v693_v22, %v685_v15  ;;  %v733_v11 = vadd.f32 %v729_v23, %v721_v57  ;;  %v769_v8 = vadd.f32 %v765_v47, %v757_v30 }
  0xa9   : > { %v702_v10 = vmax.f32 %v666_v24, %v698_v46  ;;  %v794_v52 = vadd.f32 %v790_v62, %v782_v63  ;;  %v801_v56 = vmul.f32 %v7661_v20, %v8141_v6  ;;  %v802_v4 = vmul.f32 %v7661_v20, %v8130_v1 }
  0xaa   : > { %v701_v53 = vmax.f32 %v665_v61, %v697_v14  ;;  %v826_v30 = vmul.f32 %v7667_v28, %v8086_v12  ;;  %v829_v57 = vadd.f32 %v825_v45, %v817_v3  ;;  %v837_v15 = vmul.f32 %v7670_v29, %v8141_v6 }
  0xab   : > { %v738_v18 = vmax.f32 %v702_v10, %v734_v50  ;;  %v805_v48 = vadd.f32 %v801_v56, %v793_v55  ;;  %v806_v54 = vadd.f32 %v802_v4, %v794_v52  ;;  %v838_v62 = vmul.f32 %v7670_v29, %v8130_v1 }
  0xac   : > { %v737_v63 = vmax.f32 %v701_v53, %v733_v11  ;;  %v830_v46 = vadd.f32 %v826_v30, %v818_v7  ;;  %v841_v21 = vadd.f32 %v837_v15, %v829_v57  ;;  %v853_v14 = vmul.f32 %v7673_v33, %v8026_v60 }
  0xad   : > { %v774_v59 = vmax.f32 %v738_v18, %v770_v27  ;;  %v854_v3 = vmul.f32 %v7673_v33, %v8088_v31  ;;  %v861_v10 = vmul.f32 %v7676_v34, %v8024_v19  ;;  %v862_v55 = vmul.f32 %v7676_v34, %v8086_v12 }
  0xae   : > { %v773_v50 = vmax.f32 %v737_v63, %v769_v8  ;;  %v842_v45 = vadd.f32 %v838_v62, %v830_v46  ;;  %v873_v11 = vmul.f32 %v7679_v35, %v8141_v6  ;;  %v874_v7 = vmul.f32 %v7679_v35, %v8130_v1 }
  0xaf   : > { %v810_v49 = vmax.f32 %v774_v59, %v806_v54  ;;  %v865_v51 = vadd.f32 %v861_v10, %v853_v14  ;;  %v866_v27 = vadd.f32 %v862_v55, %v854_v3  ;;  %v889_v22 = vmul.f32 %v7682_v43, %v8026_v60 }
  0xb0   : > { %v809_v23 = vmax.f32 %v773_v50, %v805_v48  ;;  %v890_v47 = vmul.f32 %v7682_v43, %v8088_v31  ;;  %v897_v8 = vmul.f32 %v7685_v44, %v8024_v19  ;;  %v898_v24 = vmul.f32 %v7685_v44, %v8086_v12 }
  0xb1   : > { %v846_v61 = vmax.f32 %v810_v49, %v842_v45  ;;  %v877_v52 = vadd.f32 %v873_v11, %v865_v51  ;;  %v878_v56 = vadd.f32 %v874_v7, %v866_v27  ;;  %v909_v4 = vmul.f32 %v7720_v2, %v8141_v6 }
  0xb2   : > { %v845_v53 = vmax.f32 %v809_v23, %v841_v21  ;;  %v901_v30 = vadd.f32 %v897_v8, %v889_v22  ;;  %v902_v57 = vadd.f32 %v898_v24, %v890_v47  ;;  %v910_v15 = vmul.f32 %v7720_v2, %v8130_v1 }
  0xb3   : > { %v882_v18 = vmax.f32 %v846_v61, %v878_v56  ;;  %v925_v48 = vmul.f32 %v7724_v9, %v8026_v60  ;;  %v926_v54 = vmul.f32 %v7724_v9, %v8088_v31  ;;  %v933_v62 = vmul.f32 %v7770_v39, %v8024_v19 }
  0xb4   : > { %v881_v63 = vmax.f32 %v845_v53, %v877_v52  ;;  %v913_v46 = vadd.f32 %v909_v4, %v901_v30  ;;  %v914_v14 = vadd.f32 %v910_v15, %v902_v57  ;;  %v934_v21 = vmul.f32 %v7770_v39, %v8086_v12 }
  0xb5   : > { %v937_v59 = vadd.f32 %v933_v62, %v925_v48  ;;  %v945_v3 = vmul.f32 %v7774_v40, %v8141_v6  ;;  %v946_v10 = vmul.f32 %v7774_v40, %v8130_v1  ;;  %v961_v55 = vmul.f32 %v7778_v32, %v8026_v60 }
  0xb6   : > { %v917_v50 = vmax.f32 %v881_v63, %v913_v46  ;;  %v918_v45 = vmax.f32 %v882_v18, %v914_v14  ;;  %v938_v11 = vadd.f32 %v934_v21, %v926_v54  ;;  %v962_v7 = vmul.f32 %v7778_v32, %v8088_v31 }
  0xb7   : > { %v949_v49 = vadd.f32 %v945_v3, %v937_v59  ;;  %v969_v51 = vmul.f32 %v7782_v36, %v8024_v19  ;;  %v970_v27 = vmul.f32 %v7782_v36, %v8086_v12  ;;  %v981_v22 = vmul.f32 %v7796_v26, %v8141_v6 }
  0xb8   : > { %v950_v23 = vadd.f32 %v946_v10, %v938_v11  ;;  %v982_v47 = vmul.f32 %v7796_v26, %v8130_v1  ;;  %v997_v8 = vmul.f32 %v7800_v41, %v8026_v60  ;;  %v998_v24 = vmul.f32 %v7800_v41, %v8088_v31  ;;  %v8256_v11 = vpop.permute.xlu0 %589 }
  0xb9   : > { %v953_v61 = vmax.f32 %v917_v50, %v949_v49  ;;  %v973_v52 = vadd.f32 %v969_v51, %v961_v55  ;;  %v974_v56 = vadd.f32 %v970_v27, %v962_v7  ;;  %v1005_v4 = vmul.f32 %v7804_v42, %v8024_v19  ;;  %v10633_v55 = vld [vmem:[#allocation49_spill] sm:$0xff] }
  0xba   : > { %v954_v53 = vmax.f32 %v918_v45, %v950_v23  ;;  %v1006_v30 = vmul.f32 %v7804_v42, %v8086_v12  ;;  %v1017_v57 = vmul.f32 %v7820_v13, %v8141_v6  ;;  %v1018_v15 = vmul.f32 %v7820_v13, %v8130_v1  ;;  %v8254_v45 = vpop.permute.xlu1 %594  ;;  %v10634_v23 = vld [vmem:[#allocation47_spill] sm:$0xff] }
  0xbb   : > { %v985_v18 = vadd.f32 %v981_v22, %v973_v52  ;;  %v986_v48 = vadd.f32 %v982_v47, %v974_v56  ;;  %v1009_v54 = vadd.f32 %v1005_v4, %v997_v8  ;;  %v1033_v62 = vmul.f32 %v7859_v37, %v8026_v60 }
  0xbc   : > { %v1010_v63 = vadd.f32 %v1006_v30, %v998_v24  ;;  %v1034_v46 = vmul.f32 %v7859_v37, %v8088_v31  ;;  %v1041_v14 = vmul.f32 %v7863_v38, %v8024_v19  ;;  %v1042_v21 = vmul.f32 %v7863_v38, %v8086_v12  ;;  %v10635_v24 = vld [vmem:[#allocation48_spill] sm:$0xff] }
  0xbd   : > { %v989_v59 = vmax.f32 %v953_v61, %v985_v18  ;;  %v990_v3 = vmax.f32 %v954_v53, %v986_v48  ;;  %v1021_v10 = vadd.f32 %v1017_v57, %v1009_v54  ;;  %v1053_v50 = vmul.f32 %v10633_v55, %v8141_v6  ;;  %v10636_v57 = vld [vmem:[#allocation56_spill] sm:$0xff]  ;;  %v10637_v48 = vld [vmem:[#allocation50_spill] sm:$0xff] }
  0xbe   : > { %v1022_v7 = vadd.f32 %v1018_v15, %v1010_v63  ;;  %v1045_v49 = vadd.f32 %v1041_v14, %v1033_v62  ;;  %v1046_v51 = vadd.f32 %v1042_v21, %v1034_v46  ;;  %v1054_v27 = vmul.f32 %v10633_v55, %v8130_v1 }
  0xbf   : > { %v1025_v22 = vmax.f32 %v989_v59, %v1021_v10  ;;  %v1069_v47 = vmul.f32 %v10634_v23, %v8026_v60  ;;  %v1070_v8 = vmul.f32 %v10634_v23, %v8088_v31  ;;  %v1077_v61 = vmul.f32 %v10635_v24, %v8024_v19  ;;  %v10638_v59 = vld [vmem:[#allocation51_spill] sm:$0xff] }
  0xc0   : > { %v1026_v52 = vmax.f32 %v990_v3, %v1022_v7  ;;  %v1057_v56 = vadd.f32 %v1053_v50, %v1045_v49  ;;  %v1058_v4 = vadd.f32 %v1054_v27, %v1046_v51  ;;  %v1078_v53 = vmul.f32 %v10635_v24, %v8086_v12  ;;  %v10639_v50 = vld [vmem:[#allocation60_spill] sm:$0xff]  ;;  %v8282_v49 = vpop.permute.xlu1 %614  ;;  %v8284_v51 = vpop.permute.xlu0 %609 }
  0xc1   : > { %v1081_v30 = vadd.f32 %v1077_v61, %v1069_v47  ;;  %v1089_v15 = vmul.f32 %v10636_v57, %v8141_v6  ;;  %v1090_v18 = vmul.f32 %v10636_v57, %v8130_v1  ;;  %v1105_v54 = vmul.f32 %v10637_v48, %v8026_v60  ;;  %v10640_v47 = vld [vmem:[#allocation52_spill] sm:$0xff] }
  0xc2   : > { %v1061_v62 = vmax.f32 %v1025_v22, %v1057_v56  ;;  %v1062_v63 = vmax.f32 %v1026_v52, %v1058_v4  ;;  %v1082_v46 = vadd.f32 %v1078_v53, %v1070_v8  ;;  %v1106_v14 = vmul.f32 %v10637_v48, %v8088_v31  ;;  %v10641_v53 = vld [vmem:[#allocation53_spill] sm:$0xff] }
  0xc3   : > { %v1093_v21 = vadd.f32 %v1089_v15, %v1081_v30  ;;  %v1113_v3 = vmul.f32 %v10638_v59, %v8024_v19  ;;  %v1114_v10 = vmul.f32 %v10638_v59, %v8086_v12  ;;  %v1125_v7 = vmul.f32 %v10639_v50, %v8141_v6 }
  0xc4   : > { %v1094_v27 = vadd.f32 %v1090_v18, %v1082_v46  ;;  %v1126_v22 = vmul.f32 %v10639_v50, %v8130_v1  ;;  %v1141_v8 = vmul.f32 %v10640_v47, %v8026_v60  ;;  %v1142_v61 = vmul.f32 %v10640_v47, %v8088_v31  ;;  %v10642_v18 = vld [vmem:[#allocation64_spill] sm:$0xff] }
  0xc5   : > { %v1097_v52 = vmax.f32 %v1061_v62, %v1093_v21  ;;  %v1117_v56 = vadd.f32 %v1113_v3, %v1105_v54  ;;  %v1118_v4 = vadd.f32 %v1114_v10, %v1106_v14  ;;  %v1149_v30 = vmul.f32 %v10641_v53, %v8024_v19  ;;  %v10643_v62 = vld [vmem:[#allocation57_spill] sm:$0xff] }
  0xc6   : > { %v1098_v15 = vmax.f32 %v1062_v63, %v1094_v27  ;;  %v1150_v16 = vmul.f32 %v10641_v53, %v8086_v12  ;;  %v1161_v46 = vmul.f32 %v10642_v18, %v8141_v6  ;;  %v1162_v58 = vmul.f32 %v10642_v18, %v8130_v1  ;;  %v10644_v63 = vld [vmem:[#allocation61_spill] sm:$0xff] }
  0xc7   : > { %v1129_v25 = vadd.f32 %v1125_v7, %v1117_v56  ;;  %v1130_v50 = vadd.f32 %v1126_v22, %v1118_v4  ;;  %v1153_v59 = vadd.f32 %v1149_v30, %v1141_v8  ;;  %v1177_v54 = vmul.f32 %v10643_v62, %v8026_v60  ;;  %v10645_v7 = vld [vmem:[#allocation65_spill] sm:$0xff]  ;;  %v8310_v8 = vpop.permute.xlu1 %634  ;;  %v8312_v56 = vpop.permute.xlu0 %629  ;;  %v10646_v4 = vld [vmem:[#allocation26_spill] sm:$0xff] }
  0xc8   : > { %v1154_v14 = vadd.f32 %v1150_v16, %v1142_v61  ;;  %v1178_v21 = vmul.f32 %v10643_v62, %v8088_v31  ;;  %v1185_v3 = vmul.f32 %v10644_v63, %v8024_v19  ;;  %v1186_v10 = vmul.f32 %v10644_v63, %v8086_v12 }
  0xc9   : > { %v1133_v27 = vmax.f32 %v1097_v52, %v1129_v25  ;;  %v1134_v53 = vmax.f32 %v1098_v15, %v1130_v50  ;;  %v1165_v47 = vadd.f32 %v1161_v46, %v1153_v59  ;;  %v1197_v22 = vmul.f32 %v10645_v7, %v8141_v6  ;;  %v10647_v59 = vld [vmem:[#allocation27_spill] sm:$0xff]  ;;  %v10648_v46 = vld [vmem:[#allocation28_spill] sm:$0xff] }
  0xca   : > { %v1166_v16 = vadd.f32 %v1162_v58, %v1154_v14  ;;  %v1189_v60 = vadd.f32 %v1185_v3, %v1177_v54  ;;  %v1190_v61 = vadd.f32 %v1186_v10, %v1178_v21  ;;  %v1198_v31 = vmul.f32 %v10645_v7, %v8130_v1 }
  0xcb   : > { %v1169_v19 = vmax.f32 %v1133_v27, %v1165_v47  ;;  %v643_v12 = vmul.f32 %v10646_v4, %v8256_v11  ;;  %v644_v25 = vmul.f32 %v10646_v4, %v8254_v45  ;;  %v651_v6 = vmul.f32 %v10647_v59, %v8284_v51  ;;  %v10649_v27 = vld [vmem:[#allocation29_spill] sm:$0xff] }
  0xcc   : > { %v1170_v50 = vmax.f32 %v1134_v53, %v1166_v16  ;;  %v1201_v52 = vadd.f32 %v1197_v22, %v1189_v60  ;;  %v1202_v30 = vadd.f32 %v1198_v31, %v1190_v61  ;;  %v652_v58 = vmul.f32 %v10647_v59, %v8282_v49 }
  0xcd   : > { %v655_v15 = vadd.f32 %v651_v6, %v643_v12  ;;  %v663_v1 = vmul.f32 %v7618_v17, %v8312_v56  ;;  %v664_v47 = vmul.f32 %v7618_v17, %v8310_v8  ;;  %v675_v54 = vmul.f32 %v10648_v46, %v8256_v11  ;;  %v10651_v6 = vld [vmem:[#allocation31_spill] sm:$0xff] }
  0xce   : > { %v1205_v14 = vmax.f32 %v1169_v19, %v1201_v52  ;;  %v1206_v21 = vmax.f32 %v1170_v50, %v1202_v30  ;;  %v656_v3 = vadd.f32 %v652_v58, %v644_v25  ;;  %v676_v53 = vmul.f32 %v10648_v46, %v8254_v45  ;;  %v10650_v19 = vld [vmem:[#allocation30_spill] sm:$0xff]  ;;  %v10652_v58 = vld [vmem:[#allocation32_spill] sm:$0xff] }
  0xcf   : > { %v667_v10 = vadd.f32 %v663_v1, %v655_v15  ;;  %v683_v22 = vmul.f32 %v10649_v27, %v8284_v51  ;;  %v684_v16 = vmul.f32 %v10649_v27, %v8282_v49  ;;  %v695_v60 = vmul.f32 %v7628_v0, %v8312_v56  ;;  %v10654_v27 = vld [vmem:[#allocation34_spill] sm:$0xff] }
  0xd0   : > { %v6633_v17 = vpack.c.bf16 %v1206_v21, %v1205_v14  ;;  %v668_v61 = vadd.f32 %v664_v47, %v656_v3  ;;  %v696_v31 = vmul.f32 %v7628_v0, %v8310_v8  ;;  %v711_v4 = vmul.f32 %v10650_v19, %v8256_v11  ;;  %v10653_v21 = vld [vmem:[#allocation33_spill] sm:$0xff] }
  0xd1   : > { %v687_v12 = vadd.f32 %v683_v22, %v675_v54  ;;  %v688_v25 = vadd.f32 %v684_v16, %v676_v53  ;;  %v712_v59 = vmul.f32 %v10650_v19, %v8254_v45  ;;  %v719_v50 = vmul.f32 %v10651_v6, %v8284_v51 }
  0xd2   : > { %6634 = vmatprep.subr.bf16.mxu1 %v6633_v17  ;;  %v720_v52 = vmul.f32 %v10651_v6, %v8282_v49  ;;  %v731_v30 = vmul.f32 %v7640_v5, %v8312_v56  ;;  %v732_v0 = vmul.f32 %v7640_v5, %v8310_v8  ;;  %v747_v15 = vmul.f32 %v10652_v58, %v8256_v11 }
  0xd3   : > { %6636 = vmatpush3.bf16.msra.mxu1 %v6633_v17  ;;  %v699_v1 = vadd.f32 %v695_v60, %v687_v12  ;;  %v700_v47 = vadd.f32 %v696_v31, %v688_v25  ;;  %v723_v46 = vadd.f32 %v719_v50, %v711_v4  ;;  %v748_v54 = vmul.f32 %v10652_v58, %v8254_v45  ;;  %v10655_v12 = vld [vmem:[#allocation35_spill] sm:$0xff]  ;;  %v10656_v50 = vld [vmem:[#allocation36_spill] sm:$0xff] }
  0xd4   : > { %v724_v14 = vadd.f32 %v720_v52, %v712_v59  ;;  %v755_v3 = vmul.f32 %v10653_v21, %v8284_v51  ;;  %v756_v53 = vmul.f32 %v10653_v21, %v8282_v49  ;;  %v767_v5 = vmul.f32 %v10654_v27, %v8312_v56 }
  0xd5   : > { %v703_v22 = vmax.f32 %v667_v10, %v699_v1  ;;  %v704_v16 = vmax.f32 %v668_v61, %v700_v47  ;;  %v735_v19 = vadd.f32 %v731_v30, %v723_v46  ;;  %v768_v60 = vmul.f32 %v10654_v27, %v8310_v8  ;;  %v10657_v46 = vld [vmem:[#allocation37_spill] sm:$0xff] }
  0xd6   : > { %v736_v17 = vadd.f32 %v732_v0, %v724_v14  ;;  %v759_v31 = vadd.f32 %v755_v3, %v747_v15  ;;  %v760_v4 = vadd.f32 %v756_v53, %v748_v54  ;;  %v783_v25 = vmul.f32 %v10655_v12, %v8256_v11 }
  0xd7   : > { %v739_v59 = vmax.f32 %v703_v22, %v735_v19  ;;  %v784_v6 = vmul.f32 %v10655_v12, %v8254_v45  ;;  %v791_v52 = vmul.f32 %v10656_v50, %v8284_v51  ;;  %v792_v10 = vmul.f32 %v10656_v50, %v8282_v49 }
  0xd8   : > { %v740_v61 = vmax.f32 %v704_v16, %v736_v17  ;;  %v771_v30 = vadd.f32 %v767_v5, %v759_v31  ;;  %v772_v58 = vadd.f32 %v768_v60, %v760_v4  ;;  %v803_v0 = vmul.f32 %v7661_v20, %v8312_v56 }
  0xd9   : > { %v795_v15 = vadd.f32 %v791_v52, %v783_v25  ;;  %v796_v1 = vadd.f32 %v792_v10, %v784_v6  ;;  %v804_v47 = vmul.f32 %v7661_v20, %v8310_v8  ;;  %v819_v54 = vmul.f32 %v10657_v46, %v8256_v11 }
  0xda   : > { %v775_v14 = vmax.f32 %v739_v59, %v771_v30  ;;  %v776_v21 = vmax.f32 %v740_v61, %v772_v58  ;;  %v820_v3 = vmul.f32 %v10657_v46, %v8254_v45  ;;  %v827_v53 = vmul.f32 %v7667_v28, %v8284_v51 }
  0xdb   : > { %v807_v27 = vadd.f32 %v803_v0, %v795_v15  ;;  %v808_v5 = vadd.f32 %v804_v47, %v796_v1  ;;  %v828_v22 = vmul.f32 %v7667_v28, %v8282_v49  ;;  %v839_v16 = vmul.f32 %v7670_v29, %v8312_v56 }
  0xdc   : > { %v831_v20 = vadd.f32 %v827_v53, %v819_v54  ;;  %v840_v19 = vmul.f32 %v7670_v29, %v8310_v8  ;;  %v855_v60 = vmul.f32 %v7673_v33, %v8256_v11  ;;  %v856_v17 = vmul.f32 %v7673_v33, %v8254_v45 }
  0xdd   : > { %v811_v31 = vmax.f32 %v775_v14, %v807_v27  ;;  %v812_v4 = vmax.f32 %v776_v21, %v808_v5  ;;  %v832_v12 = vadd.f32 %v828_v22, %v820_v3  ;;  %v863_v25 = vmul.f32 %v7676_v34, %v8284_v51 }
  0xde   : > { %v843_v28 = vadd.f32 %v839_v16, %v831_v20  ;;  %v864_v59 = vmul.f32 %v7676_v34, %v8282_v49  ;;  %v875_v6 = vmul.f32 %v7679_v35, %v8312_v56  ;;  %v876_v29 = vmul.f32 %v7679_v35, %v8310_v8 }
  0xdf   : > { %v844_v50 = vadd.f32 %v840_v19, %v832_v12  ;;  %v867_v52 = vadd.f32 %v863_v25, %v855_v60  ;;  %v891_v33 = vmul.f32 %v7682_v43, %v8256_v11  ;;  %v892_v10 = vmul.f32 %v7682_v43, %v8254_v45 }
  0xe0   : > { %v847_v61 = vmax.f32 %v811_v31, %v843_v28  ;;  %v868_v30 = vadd.f32 %v864_v59, %v856_v17  ;;  %v899_v58 = vmul.f32 %v7685_v44, %v8284_v51  ;;  %v900_v34 = vmul.f32 %v7685_v44, %v8282_v49 }
  0xe1   : > { %v848_v0 = vmax.f32 %v812_v4, %v844_v50  ;;  %v879_v15 = vadd.f32 %v875_v6, %v867_v52  ;;  %v911_v35 = vmul.f32 %v7720_v2, %v8312_v56  ;;  %v912_v1 = vmul.f32 %v7720_v2, %v8310_v8 }
  0xe2   : > { %v880_v47 = vadd.f32 %v876_v29, %v868_v30  ;;  %v903_v46 = vadd.f32 %v899_v58, %v891_v33  ;;  %v904_v54 = vadd.f32 %v900_v34, %v892_v10  ;;  %v927_v43 = vmul.f32 %v7724_v9, %v8256_v11 }
  0xe3   : > { %v883_v14 = vmax.f32 %v847_v61, %v879_v15  ;;  %v928_v21 = vmul.f32 %v7724_v9, %v8254_v45  ;;  %v935_v44 = vmul.f32 %v7770_v39, %v8284_v51  ;;  %v936_v3 = vmul.f32 %v7770_v39, %v8282_v49 }
  0xe4   : > { %v884_v53 = vmax.f32 %v848_v0, %v880_v47  ;;  %v915_v27 = vadd.f32 %v911_v35, %v903_v46  ;;  %v916_v5 = vadd.f32 %v912_v1, %v904_v54  ;;  %v947_v2 = vmul.f32 %v7774_v40, %v8312_v56 }
  0xe5   : > { %v939_v22 = vadd.f32 %v935_v44, %v927_v43  ;;  %v940_v16 = vadd.f32 %v936_v3, %v928_v21  ;;  %v948_v20 = vmul.f32 %v7774_v40, %v8310_v8  ;;  %v963_v9 = vmul.f32 %v7778_v32, %v8256_v11 }
  0xe6   : > { %v919_v19 = vmax.f32 %v883_v14, %v915_v27  ;;  %v920_v60 = vmax.f32 %v884_v53, %v916_v5  ;;  %v964_v17 = vmul.f32 %v7778_v32, %v8254_v45  ;;  %v971_v39 = vmul.f32 %v7782_v36, %v8284_v51 }
  0xe7   : > { %v951_v31 = vadd.f32 %v947_v2, %v939_v22  ;;  %v952_v4 = vadd.f32 %v948_v20, %v940_v16  ;;  %v972_v12 = vmul.f32 %v7782_v36, %v8282_v49  ;;  %v983_v25 = vmul.f32 %v7796_v26, %v8312_v56 }
  0xe8   : > { %v975_v40 = vadd.f32 %v971_v39, %v963_v9  ;;  %v984_v28 = vmul.f32 %v7796_v26, %v8310_v8  ;;  %v999_v59 = vmul.f32 %v7800_v41, %v8256_v11  ;;  %v1000_v32 = vmul.f32 %v7800_v41, %v8254_v45 }
  0xe9   : > { %v955_v6 = vmax.f32 %v919_v19, %v951_v31  ;;  %v956_v29 = vmax.f32 %v920_v60, %v952_v4  ;;  %v976_v50 = vadd.f32 %v972_v12, %v964_v17  ;;  %v1007_v52 = vmul.f32 %v7804_v42, %v8284_v51  ;;  %v10659_v31 = vld [vmem:[#allocation60_spill] sm:$0xff] }
  0xea   : > { %v987_v36 = vadd.f32 %v983_v25, %v975_v40  ;;  %v1008_v33 = vmul.f32 %v7804_v42, %v8282_v49  ;;  %v1019_v10 = vmul.f32 %v7820_v13, %v8312_v56  ;;  %v1020_v26 = vmul.f32 %v7820_v13, %v8310_v8  ;;  %v10660_v25 = vld [vmem:[#allocation52_spill] sm:$0xff] }
  0xeb   : > { %v988_v61 = vadd.f32 %v984_v28, %v976_v50  ;;  %v1011_v30 = vadd.f32 %v1007_v52, %v999_v59  ;;  %v1035_v41 = vmul.f32 %v7859_v37, %v8256_v11  ;;  %v1036_v58 = vmul.f32 %v7859_v37, %v8254_v45 }
  0xec   : > { %v991_v34 = vmax.f32 %v955_v6, %v987_v36  ;;  %v1012_v0 = vadd.f32 %v1008_v33, %v1000_v32  ;;  %v1043_v15 = vmul.f32 %v7863_v38, %v8284_v51  ;;  %v1044_v42 = vmul.f32 %v7863_v38, %v8282_v49  ;;  %v10661_v6 = vld [vmem:[#allocation53_spill] sm:$0xff] }
  0xed   : > { %v992_v35 = vmax.f32 %v956_v29, %v988_v61  ;;  %v1023_v1 = vadd.f32 %v1019_v10, %v1011_v30  ;;  %v1055_v13 = vmul.f32 %v10633_v55, %v8312_v56  ;;  %v1056_v47 = vmul.f32 %v10633_v55, %v8310_v8 }
  0xee   : > { %v1024_v46 = vadd.f32 %v1020_v26, %v1012_v0  ;;  %v1047_v54 = vadd.f32 %v1043_v15, %v1035_v41  ;;  %v1048_v43 = vadd.f32 %v1044_v42, %v1036_v58  ;;  %v1071_v37 = vmul.f32 %v10634_v23, %v8256_v11 }
  0xef   : > { %v1027_v14 = vmax.f32 %v991_v34, %v1023_v1  ;;  %v1072_v21 = vmul.f32 %v10634_v23, %v8254_v45  ;;  %v1079_v38 = vmul.f32 %v10635_v24, %v8284_v51  ;;  %v1080_v44 = vmul.f32 %v10635_v24, %v8282_v49  ;;  %v10658_v24 = vld [vmem:[#allocation51_spill] sm:$0xff] }
  0xf0   : > { %v1028_v3 = vmax.f32 %v992_v35, %v1024_v46  ;;  %v1059_v53 = vadd.f32 %v1055_v13, %v1047_v54  ;;  %v1060_v27 = vadd.f32 %v1056_v47, %v1048_v43  ;;  %v1091_v55 = vmul.f32 %v10636_v57, %v8312_v56 }
  0xf1   : > { %v1083_v5 = vadd.f32 %v1079_v38, %v1071_v37  ;;  %v1084_v2 = vadd.f32 %v1080_v44, %v1072_v21  ;;  %v1092_v22 = vmul.f32 %v10636_v57, %v8310_v8  ;;  %v1107_v23 = vmul.f32 %v10637_v48, %v8256_v11  ;;  %v10666_v21 = vld [vmem:[#allocation16_spill] sm:$0xff]  ;;  %v10667_v44 = vld [vmem:[#allocation39_spill] sm:$0xff] }
  0xf2   : > { %v1063_v16 = vmax.f32 %v1027_v14, %v1059_v53  ;;  %v1064_v20 = vmax.f32 %v1028_v3, %v1060_v27  ;;  %v1108_v9 = vmul.f32 %v10637_v48, %v8254_v45  ;;  %v1115_v19 = vmul.f32 %v10658_v24, %v8284_v51  ;;  %v1212_v14 = vld [vmem:[%s10412_s4 + $0x18] sm:$0xff]  ;;  %v10668_v3 = vld [vmem:[#allocation40_spill] sm:$0xff] }
  0xf3   : > { %v1095_v60 = vadd.f32 %v1091_v55, %v1083_v5  ;;  %v1096_v17 = vadd.f32 %v1092_v22, %v1084_v2  ;;  %v1116_v39 = vmul.f32 %v10658_v24, %v8282_v49  ;;  %v1127_v4 = vmul.f32 %v10659_v31, %v8312_v56  ;;  %v10670_v22 = vld [vmem:[#allocation41_spill] sm:$0xff] }
  0xf4   : > { %v1119_v57 = vadd.f32 %v1115_v19, %v1107_v23  ;;  %v1128_v12 = vmul.f32 %v10659_v31, %v8310_v8  ;;  %v1143_v40 = vmul.f32 %v10660_v25, %v8256_v11  ;;  %v1144_v48 = vmul.f32 %v10660_v25, %v8254_v45  ;;  %v10671_v23 = vld [vmem:[#allocation42_spill] sm:$0xff] }
  0xf5   : > { %v1099_v28 = vmax.f32 %v1063_v16, %v1095_v60  ;;  %v1100_v59 = vmax.f32 %v1064_v20, %v1096_v17  ;;  %v1120_v32 = vadd.f32 %v1116_v39, %v1108_v9  ;;  %v1151_v29 = vmul.f32 %v10661_v6, %v8284_v51  ;;  %v10674_v60 = vld [vmem:[#allocation43_spill] sm:$0xff] }
  0xf6   : > { %v1131_v50 = vadd.f32 %v1127_v4, %v1119_v57  ;;  %v1152_v52 = vmul.f32 %v10661_v6, %v8282_v49  ;;  %v1163_v36 = vmul.f32 %v10642_v18, %v8312_v56  ;;  %v1164_v33 = vmul.f32 %v10642_v18, %v8310_v8  ;;  %v10676_v57 = vld [vmem:[#allocation44_spill] sm:$0xff] }
  0xf7   : > { %v1132_v10 = vadd.f32 %v1128_v12, %v1120_v32  ;;  %v1155_v26 = vadd.f32 %v1151_v29, %v1143_v40  ;;  %v1179_v61 = vmul.f32 %v10643_v62, %v8256_v11  ;;  %v1180_v30 = vmul.f32 %v10643_v62, %v8254_v45  ;;  %v10662_v45 = vld [vmem:[#allocation17_spill] sm:$0xff]  ;;  %v10663_v62 = vld [vmem:[#allocation11_spill] sm:$0xff] }
  0xf8   : > { %v1135_v41 = vmax.f32 %v1099_v28, %v1131_v50  ;;  %v1156_v58 = vadd.f32 %v1152_v52, %v1144_v48  ;;  %v1187_v34 = vmul.f32 %v10644_v63, %v8284_v51  ;;  %v1188_v0 = vmul.f32 %v10644_v63, %v8282_v49  ;;  %v10664_v51 = vld [vmem:[#allocation38_spill] sm:$0xff] }
  0xf9   : > { %v1136_v15 = vmax.f32 %v1100_v59, %v1132_v10  ;;  %v1167_v42 = vadd.f32 %v1163_v36, %v1155_v26  ;;  %v1199_v18 = vmul.f32 %v10645_v7, %v8312_v56  ;;  %v1200_v35 = vmul.f32 %v10645_v7, %v8310_v8  ;;  %v1210_v7 = vld [vmem:[%s10412_s4 + $0x8] sm:$0xff]  ;;  %v1211_v8 = vld [vmem:[%s10412_s4 + $0x10] sm:$0xff]  ;;  %v10682_v52 = vld [vmem:[#allocation46_spill] sm:$0xff] }
  0xfa   : > { %v1168_v11 = vadd.f32 %v1164_v33, %v1156_v58  ;;  %v1191_v1 = vadd.f32 %v1187_v34, %v1179_v61  ;;  %v1192_v13 = vadd.f32 %v1188_v0, %v1180_v30  ;;  %vm1976_vm8 = vcmp.eq.s32.totalorder %v10663_v62, %v10662_v45  ;;  %v10680_v59 = vld [vmem:[#allocation45_spill] sm:$0xff]  ;;  %v10683_v61 = vld [vmem:[#allocation54_spill] sm:$0xff]  ;;  %v10684_v0 = vld [vmem:[#allocation55_spill] sm:$0xff] }
  0xfb   : > { %v1171_v47 = vmax.f32 %v1135_v41, %v1167_v42  ;;  %vm1992_vm9 = vcmp.eq.s32.totalorder %v10664_v51, %v10662_v45  ;;  %v10665_v54 = vmov 1.0|1.0   ;;  %vm1975_vm11 = vcmp.eq.s32.totalorder %v10663_v62, %v10666_v21 }
  0xfc   : > { %v1172_v46 = vmax.f32 %v1136_v15, %v1168_v11  ;;  %v1203_v49 = vadd.f32 %v1199_v18, %v1191_v1  ;;  %v1204_v63 = vadd.f32 %v1200_v35, %v1192_v13  ;;  %vm6180_vm10 = vmpackc.low %vm1992_vm9, %vm1976_vm8  ;;  %vm1991_vm12 = vcmp.eq.s32.totalorder %v10664_v51, %v10666_v21  ;;  %v10687_v1 = vld [vmem:[#allocation58_spill] sm:$0xff] }
  0xfd   : > { %6181 = vmatprep.subr.msk.bf16.mxu0 %vm6180_vm10, %v10665_v54  ;;  %vm2008_vm13 = vcmp.eq.s32.totalorder %v10667_v44, %v10662_v45  ;;  %vm2024_vm14 = vcmp.eq.s32.totalorder %v10668_v3, %v10662_v45  ;;  %vm6182_vm15 = vmpackc.low %vm1991_vm12, %vm1975_vm11  ;;  %vm2007_vm3 = vcmp.eq.s32.totalorder %v10667_v44, %v10666_v21  ;;  %vm2023_vm4 = vcmp.eq.s32.totalorder %v10668_v3, %v10666_v21 }
  0xfe   : > { %v1207_v56 = vmax.f32 %v1171_v47, %v1203_v49  ;;  %v1208_v43 = vmax.f32 %v1172_v46, %v1204_v63  ;;  %vm6184_vm2 = vmpackc.low %vm2024_vm14, %vm2008_vm13  ;;  %vm2040_vm5 = vcmp.eq.s32.totalorder %v10670_v22, %v10662_v45  ;;  %vm2056_vm6 = vcmp.eq.s32.totalorder %v10671_v23, %v10662_v45  ;;  %v10688_v63 = vld [vmem:[#allocation59_spill] sm:$0xff] }
  0xff   : > { %v10672_v20 = vmov 0   ;;  %vm6186_vm7 = vmpackc.low %vm2023_vm4, %vm2007_vm3  ;;  %vm2039_vm9 = vcmp.eq.s32.totalorder %v10670_v22, %v10666_v21  ;;  %vm2055_vm10 = vcmp.eq.s32.totalorder %v10671_v23, %v10666_v21  ;;  %vm2072_vm11 = vcmp.eq.s32.totalorder %v10674_v60, %v10662_v45 }
 0x100   : > { %v6637_v37 = vpack.c.bf16 %v1208_v43, %v1207_v56  ;;  %vm6188_vm8 = vmpackc.low %vm2056_vm6, %vm2040_vm5  ;;  %vm2088_vm12 = vcmp.eq.s32.totalorder %v10676_v57, %v10662_v45  ;;  %vm2104_vm3 = vcmp.eq.s32.totalorder %v10680_v59, %v10662_v45  ;;  %vm2120_vm4 = vcmp.eq.s32.totalorder %v10682_v52, %v10662_v45 }
 0x101   : > { %vm6190_vm13 = vmpackc.low %vm2055_vm10, %vm2039_vm9  ;;  %vm2136_vm9 = vcmp.eq.s32.totalorder %v10683_v61, %v10662_v45  ;;  %vm2152_vm10 = vcmp.eq.s32.totalorder %v10684_v0, %v10662_v45 }
 0x102   : > { %6638 = vmatprep.subr.bf16.mxu1 %v6637_v37  ;;  %vm8570_vm14 = vmpackc.low %vm2088_vm12, %vm2072_vm11 }
 0x103   : > { %6640 = vmatpush3.bf16.msra.mxu1 %v6637_v37  ;;  %vm6196_vm6 = vmpackc.low %vm2120_vm4, %vm2104_vm3 }
 0x104   : > { %vm8619_vm12 = vmpackc.low %vm2152_vm10, %vm2136_vm9 }
 0x106   : > { %6472 = vmatmul.mubr.msk.f32.vlgmr.msra.gmra.mrb[0].mxu1 %vm1237_vm1, %v1210_v7 }
 0x107   : > { %6474 = vmatprep.mubr.msk.f32.mxu1 %vm1237_vm1, %v1211_v8  ;;  %v10689_v8 = vld [vmem:[#allocation62_spill] sm:$0xff] }
 0x108   : > { %v6515_v38 = vpop.f32.mrb[0].mxu0 }
 0x109   : > { %v1719_v53 = vpop.f32.mrb[1].mxu0 }
 0x10a   : > { %6475 = vmatmul.mubr.msk.f32.gmra.mrb[2].mxu1 %vm1237_vm1, %v1212_v14  ;;  %v8533_v27 = vpack.c.bf16 %v6515_v38, %v1719_v53 }
 0x10c   : > { %10669 = vst [vmem:[#allocation49_spill] sm:$0xff] %v8533_v27  ;;  %v1846_v55 = vunpack.c.l.bf16 %v8533_v27  ;;  %v1847_v5 = vunpack.c.h.bf16 %v8533_v27  ;;  %3091 = vmatmul.mubr.bf16.vlgmr.msra.gmra.mrb[24].mxu0 %v8533_v27  ;;  %v6518_v2 = vpop.f32.mrb[2].mxu0 }
 0x10d   : > { %v1729_v16 = vpop.f32.mrb[3].mxu0  ;;  %3100 = vmatprep.mubr.bf16.mxu0 %v10672_v20  ;;  %6183 = vmatpush1.bf16.msk.msra.mxu0 %vm6182_vm15, %v10665_v54  ;;  %vm2071_vm15 = vcmp.eq.s32.totalorder %v10674_v60, %v10666_v21 }
 0x10e   : > { %v1862_v9 = vsub.f32 %v1719_v53, %v1846_v55  ;;  %v1863_v24 = vsub.f32 %v6515_v38, %v1847_v5  ;;  %v8548_v19 = vpack.c.bf16 %v6518_v2, %v1729_v16  ;;  %6185 = vmatprep.subr.msk.bf16.mxu0 %vm6184_vm2, %v10665_v54  ;;  %vm2087_vm2 = vcmp.eq.s32.totalorder %v10676_v57, %v10666_v21  ;;  %v10691_v5 = vld [vmem:[#allocation63_spill] sm:$0xff] }
 0x10f   : > { %vm6194_vm5 = vmpackc.low %vm2087_vm2, %vm2071_vm15  ;;  %vm2168_vm15 = vcmp.eq.s32.totalorder %v10687_v1, %v10662_v45  ;;  %vm2184_vm2 = vcmp.eq.s32.totalorder %v10688_v63, %v10662_v45 }
 0x110   : > { %10673 = vst [vmem:[#allocation47_spill] sm:$0xff] %v8548_v19  ;;  %v8560_v17 = vpack.c.bf16 %v1863_v24, %v1862_v9  ;;  %v1848_v39 = vunpack.c.l.bf16 %v8548_v19  ;;  %v1849_v31 = vunpack.c.h.bf16 %v8548_v19  ;;  %v6521_v4 = vpop.f32.mrb[4].mxu0  ;;  %vm6204_vm4 = vmpackc.low %vm2184_vm2, %vm2168_vm15 }
 0x111   : > { %v1739_v12 = vpop.f32.mrb[5].mxu0  ;;  %6187 = vmatpush1.bf16.msk.msra.mxu0 %vm6186_vm7, %v10665_v54  ;;  %vm2103_vm7 = vcmp.eq.s32.totalorder %v10680_v59, %v10666_v21 }
 0x112   : > { %10675 = vst [vmem:[#allocation48_spill] sm:$0xff] %v8560_v17  ;;  %v1864_v25 = vsub.f32 %v1729_v16, %v1848_v39  ;;  %v1865_v40 = vsub.f32 %v6518_v2, %v1849_v31  ;;  %v8567_v48 = vpack.c.bf16 %v6521_v4, %v1739_v12  ;;  %6189 = vmatprep.subr.msk.bf16.mxu0 %vm6188_vm8, %v10665_v54 }
 0x113   : > { %vm2119_vm8 = vcmp.eq.s32.totalorder %v10682_v52, %v10666_v21 }
 0x114   : > { %10677 = vst [vmem:[#allocation56_spill] sm:$0xff] %v8567_v48  ;;  %v8580_v32 = vpack.c.bf16 %v1865_v40, %v1864_v25  ;;  %3101 = vmatmul.mubr.bf16.gmra.mrb[28].mxu0 %v8548_v19  ;;  %v1850_v6 = vunpack.c.l.bf16 %v8567_v48  ;;  %v1851_v29 = vunpack.c.h.bf16 %v8567_v48  ;;  %v6524_v50 = vpop.f32.mrb[6].mxu0  ;;  %vm6198_vm11 = vmpackc.low %vm2119_vm8, %vm2103_vm7  ;;  %vm2200_vm7 = vcmp.eq.s32.totalorder %v10689_v8, %v10662_v45 }
 0x115   : > { %3110 = vmatprep.mubr.bf16.mxu0 %v10672_v20  ;;  %v1749_v36 = vpop.f32.mrb[7].mxu0  ;;  %6191 = vmatpush1.bf16.msk.msra.mxu0 %vm6190_vm13, %v10665_v54  ;;  %vm2135_vm13 = vcmp.eq.s32.totalorder %v10683_v61, %v10666_v21  ;;  %vm2216_vm8 = vcmp.eq.s32.totalorder %v10691_v5, %v10662_v45 }
 0x116   : > { %10681 = vst [vmem:[#allocation50_spill] sm:$0xff] %v8580_v32  ;;  %v1866_v33 = vsub.f32 %v1739_v12, %v1850_v6  ;;  %v1867_v10 = vsub.f32 %v6521_v4, %v1851_v29  ;;  %v8589_v26 = vpack.c.bf16 %v6524_v50, %v1749_v36  ;;  %6193 = vmatprep.subr.msk.bf16.mxu0 %vm8570_vm14, %v10665_v54  ;;  %vm6208_vm10 = vmpackc.low %vm2216_vm8, %vm2200_vm7 }
 0x117   : > { %vm2151_vm14 = vcmp.eq.s32.totalorder %v10684_v0, %v10666_v21 }
 0x118   : > { %v8609_v30 = vpack.c.bf16 %v1867_v10, %v1866_v33  ;;  %v1852_v41 = vunpack.c.l.bf16 %v8589_v26  ;;  %v1853_v58 = vunpack.c.h.bf16 %v8589_v26  ;;  %v6527_v34 = vpop.f32.mrb[8].mxu0  ;;  %vm6202_vm3 = vmpackc.low %vm2151_vm14, %vm2135_vm13  ;;  %v1371_v10 = vld [vmem:[%s10414_s6] sm:$0xff] }
 0x119   : > { %v1759_v15 = vpop.f32.mrb[9].mxu0  ;;  %6195 = vmatpush1.bf16.msk.msra.mxu0 %vm6194_vm5, %v10665_v54  ;;  %vm2167_vm5 = vcmp.eq.s32.totalorder %v10687_v1, %v10666_v21  ;;  %6485 = vmatprep.mubr.msk.f32.mxu1 %vm1237_vm1, %v1371_v10 }
 0x11a   : > { %v1868_v42 = vsub.f32 %v1749_v36, %v1852_v41  ;;  %v1869_v18 = vsub.f32 %v6524_v50, %v1853_v58  ;;  %v8616_v35 = vpack.c.bf16 %v6527_v34, %v1759_v15  ;;  %6197 = vmatprep.subr.msk.bf16.mxu0 %vm6196_vm6, %v10665_v54  ;;  %vm2183_vm6 = vcmp.eq.s32.totalorder %v10688_v63, %v10666_v21  ;;  %v10695_v41 = vld [vmem:[#allocation21_spill] sm:$0xff]  ;;  %v10696_v58 = vld [vmem:[#allocation20_spill] sm:$0xff] }
 0x11b   : > { %vm6206_vm9 = vmpackc.low %vm2183_vm6, %vm2167_vm5  ;;  %vm1980_vm14 = vcmp.eq.s32.totalorder %v10663_v62, %v10695_v41  ;;  %vm1996_vm15 = vcmp.eq.s32.totalorder %v10664_v51, %v10695_v41  ;;  %vm1979_vm2 = vcmp.eq.s32.totalorder %v10663_v62, %v10696_v58  ;;  %vm2012_vm6 = vcmp.eq.s32.totalorder %v10667_v44, %v10695_v41 }
 0x11c   : > { %3111 = vmatmul.mubr.bf16.gmra.mrb[32].mxu0 %v8567_v48  ;;  %v8630_v13 = vpack.c.bf16 %v1869_v18, %v1868_v42  ;;  %v1854_v47 = vunpack.c.l.bf16 %v8616_v35  ;;  %v1855_v46 = vunpack.c.h.bf16 %v8616_v35  ;;  %v6530_v49 = vpop.f32.mrb[10].mxu0  ;;  %vm2028_vm7 = vcmp.eq.s32.totalorder %v10668_v3, %v10695_v41 }
 0x11d   : > { %3120 = vmatprep.mubr.bf16.mxu0 %v10672_v20  ;;  %v1769_v56 = vpop.f32.mrb[11].mxu0  ;;  %6199 = vmatpush1.bf16.msk.msra.mxu0 %vm6198_vm11, %v10665_v54  ;;  %vm2199_vm11 = vcmp.eq.s32.totalorder %v10689_v8, %v10666_v21  ;;  %vm2011_vm8 = vcmp.eq.s32.totalorder %v10667_v44, %v10696_v58 }
 0x11e   : > { %v1870_v43 = vsub.f32 %v1759_v15, %v1854_v47  ;;  %v1871_v37 = vsub.f32 %v6527_v34, %v1855_v46  ;;  %v8638_v7 = vpack.c.bf16 %v6530_v49, %v1769_v56  ;;  %6201 = vmatprep.subr.msk.bf16.mxu0 %vm8619_vm12, %v10665_v54  ;;  %vm2215_vm12 = vcmp.eq.s32.totalorder %v10691_v5, %v10666_v21  ;;  %v1225_v34 = vpop.permute.xlu1 %1224  ;;  %v1220_v15 = vpop.permute.xlu0 %1219 }
 0x11f   : > { %vm6210_vm13 = vmpackc.low %vm2215_vm12, %vm2199_vm11  ;;  %vm2044_vm12 = vcmp.eq.s32.totalorder %v10670_v22, %v10695_v41 }
 0x120   : > { %v8658_v14 = vpack.c.bf16 %v1871_v37, %v1870_v43  ;;  %v1856_v38 = vunpack.c.l.bf16 %v8638_v7  ;;  %v1857_v53 = vunpack.c.h.bf16 %v8638_v7  ;;  %v6533_v55 = vpop.f32.mrb[12].mxu0 }
 0x121   : > { %v1779_v2 = vpop.f32.mrb[13].mxu0  ;;  %6203 = vmatpush1.bf16.msk.msra.mxu0 %vm6202_vm3, %v10665_v54  ;;  %vm1995_vm3 = vcmp.eq.s32.totalorder %v10664_v51, %v10696_v58 }
 0x122   : > { %10690 = vst [vmem:[#allocation64_spill] sm:$0xff] %v8658_v14  ;;  %v1872_v16 = vsub.f32 %v1769_v56, %v1856_v38  ;;  %v1873_v9 = vsub.f32 %v6530_v49, %v1857_v53  ;;  %v8665_v24 = vpack.c.bf16 %v6533_v55, %v1779_v2  ;;  %6205 = vmatprep.subr.msk.bf16.mxu0 %vm6204_vm4, %v10665_v54  ;;  %vm6244_vm4 = vmpackc.low %vm1996_vm15, %vm1980_vm14  ;;  %v1235_v49 = vpop.permute.xlu1 %1234  ;;  %v1230_v37 = vpop.permute.xlu0 %1229 }
 0x123   : > { %vm6246_vm5 = vmpackc.low %vm1995_vm3, %vm1979_vm2  ;;  %vm2043_vm14 = vcmp.eq.s32.totalorder %v10670_v22, %v10696_v58  ;;  %vm2059_vm15 = vcmp.eq.s32.totalorder %v10671_v23, %v10696_v58 }
 0x124   : > { %3121 = vmatmul.mubr.bf16.gmra.mrb[36].mxu0 %v8589_v26  ;;  %v8673_v45 = vpack.c.bf16 %v1873_v9, %v1872_v16  ;;  %v1858_v39 = vunpack.c.l.bf16 %v8665_v24  ;;  %v1859_v31 = vunpack.c.h.bf16 %v8665_v24  ;;  %v6536_v4 = vpop.f32.mrb[14].mxu0  ;;  %vm6254_vm3 = vmpackc.low %vm2059_vm15, %vm2043_vm14 }
 0x125   : > { %3130 = vmatprep.mubr.bf16.mxu0 %v10672_v20  ;;  %v1789_v12 = vpop.f32.mrb[15].mxu0  ;;  %6207 = vmatpush1.bf16.msk.msra.mxu0 %vm6206_vm9, %v10665_v54  ;;  %vm2027_vm9 = vcmp.eq.s32.totalorder %v10668_v3, %v10696_v58 }
 0x126   : > { %10692 = vst [vmem:[#allocation57_spill] sm:$0xff] %v8673_v45  ;;  %v1874_v25 = vsub.f32 %v1779_v2, %v1858_v39  ;;  %v1875_v40 = vsub.f32 %v6533_v55, %v1859_v31  ;;  %v8679_v28 = vpack.c.bf16 %v6536_v4, %v1789_v12  ;;  %6209 = vmatprep.subr.msk.bf16.mxu0 %vm6208_vm10, %v10665_v54  ;;  %vm6248_vm10 = vmpackc.low %vm2028_vm7, %vm2012_vm6 }
 0x127   : > { %vm6250_vm11 = vmpackc.low %vm2027_vm9, %vm2011_vm8  ;;  %vm2075_vm6 = vcmp.eq.s32.totalorder %v10674_v60, %v10696_v58  ;;  %vm2091_vm7 = vcmp.eq.s32.totalorder %v10676_v57, %v10696_v58  ;;  %vm2108_vm9 = vcmp.eq.s32.totalorder %v10680_v59, %v10695_v41 }
 0x128   : > { %v8682_v21 = vpack.c.bf16 %v1875_v40, %v1874_v25  ;;  %v1860_v6 = vunpack.c.l.bf16 %v8679_v28  ;;  %v1861_v29 = vunpack.c.h.bf16 %v8679_v28 }
 0x129   : > { %6211 = vmatpush1.bf16.msk.msra.mxu0 %vm6210_vm13, %v10665_v54  ;;  %vm2060_vm13 = vcmp.eq.s32.totalorder %v10671_v23, %v10695_v41 }
 0x12a   : > { %10693 = vst [vmem:[#allocation61_spill] sm:$0xff] %v8682_v21  ;;  %v1876_v50 = vsub.f32 %v1789_v12, %v1860_v6  ;;  %v1877_v36 = vsub.f32 %v6536_v4, %v1861_v29  ;;  %6245 = vmatprep.subr.msk.bf16.mxu0 %vm6244_vm4, %v10665_v54  ;;  %vm6252_vm2 = vmpackc.low %vm2060_vm13, %vm2044_vm12  ;;  %vm2076_vm4 = vcmp.eq.s32.totalorder %v10674_v60, %v10695_v41 }
 0x12b   : > { %vm2107_vm12 = vcmp.eq.s32.totalorder %v10680_v59, %v10696_v58  ;;  %vm2123_vm13 = vcmp.eq.s32.totalorder %v10682_v52, %v10696_v58 }
 0x12c   : > { %3131 = vmatmul.mubr.bf16.gmra.mrb[40].mxu0 %v8616_v35  ;;  %v8688_v33 = vpack.c.bf16 %v1877_v36, %v1876_v50  ;;  %vm6262_vm15 = vmpackc.low %vm2123_vm13, %vm2107_vm12 }
 0x12d   : > { %3140 = vmatprep.mubr.bf16.mxu0 %v10672_v20 }
 0x12e   : > { %10694 = vst [vmem:[#allocation65_spill] sm:$0xff] %v8688_v33 }
 0x134   : > { %3141 = vmatmul.mubr.bf16.gmra.mrb[44].mxu0 %v8638_v7 }
 0x135   : > { %3150 = vmatprep.mubr.bf16.mxu0 %v10672_v20 }
 0x13c   : > { %3151 = vmatmul.mubr.bf16.gmra.mrb[48].mxu0 %v8665_v24 }
 0x13d   : > { %3160 = vmatprep.mubr.bf16.mxu0 %v10672_v20 }
 0x144   : > { %3161 = vmatmul.mubr.bf16.gmra.mrb[52].mxu0 %v8679_v28 }
 0x145   : > { %3170 = vmatprep.mubr.bf16.mxu0 %v10672_v20 }
 0x14c   : > { %3171 = vmatmul.mubr.bf16.gmra.mrb[24].mxu0 %v8560_v17 }
 0x14d   : > { %3180 = vmatprep.mubr.bf16.mxu0 %v10672_v20 }
 0x154   : > { %3181 = vmatmul.mubr.bf16.gmra.mrb[28].mxu0 %v8580_v32 }
 0x155   : > { %3190 = vmatprep.mubr.bf16.mxu0 %v10672_v20 }
 0x15c   : > { %3191 = vmatmul.mubr.bf16.gmra.mrb[32].mxu0 %v8609_v30 }
 0x15d   : > { %3200 = vmatprep.mubr.bf16.mxu0 %v10672_v20 }
 0x164   : > { %3201 = vmatmul.mubr.bf16.gmra.mrb[36].mxu0 %v8630_v13 }
 0x165   : > { %3210 = vmatprep.mubr.bf16.mxu0 %v10672_v20 }
 0x16c   : > { %3211 = vmatmul.mubr.bf16.gmra.mrb[40].mxu0 %v8658_v14 }
 0x16d   : > { %3220 = vmatprep.mubr.bf16.mxu0 %v10672_v20 }
 0x174   : > { %3221 = vmatmul.mubr.bf16.gmra.mrb[44].mxu0 %v8673_v45 }
 0x175   : > { %3230 = vmatprep.mubr.bf16.mxu0 %v10672_v20 }
 0x17c   : > { %3231 = vmatmul.mubr.bf16.gmra.mrb[48].mxu0 %v8682_v21 }
 0x17d   : > { %3240 = vmatprep.mubr.bf16.mxu0 %v10672_v20 }
 0x184   : > { %3241 = vmatmul.mubr.bf16.gmra.mrb[52].mxu0 %v8688_v33 }
 0x185   : > { %3476 = vmatprep.mubr.bf16.mxu0 %v10672_v20 }
 0x18c   : > { %3477 = vmatmul.mubr.bf16.vlgmr.msra.gmra.mrb[56].mxu0 %v8533_v27 }
 0x18d   : > { %3486 = vmatprep.mubr.bf16.mxu0 %v10672_v20  ;;  %6247 = vmatpush1.bf16.msk.msra.mxu0 %vm6246_vm5, %v10665_v54  ;;  %vm2092_vm5 = vcmp.eq.s32.totalorder %v10676_v57, %v10695_v41 }
 0x18e   : > { %6249 = vmatprep.subr.msk.bf16.mxu0 %vm6248_vm10, %v10665_v54  ;;  %vm6256_vm8 = vmpackc.low %vm2092_vm5, %vm2076_vm4  ;;  %vm2124_vm10 = vcmp.eq.s32.totalorder %v10682_v52, %v10695_v41  ;;  %vm2139_vm4 = vcmp.eq.s32.totalorder %v10683_v61, %v10696_v58  ;;  %vm2155_vm5 = vcmp.eq.s32.totalorder %v10684_v0, %v10696_v58 }
 0x18f   : > { %vm6260_vm14 = vmpackc.low %vm2124_vm10, %vm2108_vm9  ;;  %vm2171_vm10 = vcmp.eq.s32.totalorder %v10687_v1, %v10696_v58 }
 0x190   : > { %vm6266_vm9 = vmpackc.low %vm2155_vm5, %vm2139_vm4 }
 0x191   : > { %6251 = vmatpush1.bf16.msk.msra.mxu0 %vm6250_vm11, %v10665_v54  ;;  %vm6258_vm11 = vmpackc.low %vm2091_vm7, %vm2075_vm6  ;;  %vm2172_vm7 = vcmp.eq.s32.totalorder %v10687_v1, %v10695_v41 }
 0x192   : > { %6253 = vmatprep.subr.msk.bf16.mxu0 %vm6252_vm2, %v10665_v54  ;;  %vm2140_vm2 = vcmp.eq.s32.totalorder %v10683_v61, %v10695_v41 }
 0x194   : > { %3487 = vmatmul.mubr.bf16.gmra.mrb[60].mxu0 %v8548_v19 }
 0x195   : > { %3496 = vmatprep.mubr.bf16.mxu0 %v10672_v20  ;;  %6255 = vmatpush1.bf16.msk.msra.mxu0 %vm6254_vm3, %v10665_v54  ;;  %vm2156_vm3 = vcmp.eq.s32.totalorder %v10684_v0, %v10695_v41 }
 0x196   : > { %6257 = vmatprep.subr.msk.bf16.mxu0 %vm6256_vm8, %v10665_v54  ;;  %vm6264_vm6 = vmpackc.low %vm2156_vm3, %vm2140_vm2  ;;  %vm2188_vm8 = vcmp.eq.s32.totalorder %v10688_v63, %v10695_v41  ;;  %vm2203_vm2 = vcmp.eq.s32.totalorder %v10689_v8, %v10696_v58  ;;  %vm2219_vm3 = vcmp.eq.s32.totalorder %v10691_v5, %v10696_v58 }
 0x197   : > { %vm6268_vm12 = vmpackc.low %vm2188_vm8, %vm2172_vm7 }
 0x198   : > { %vm6274_vm5 = vmpackc.low %vm2219_vm3, %vm2203_vm2 }
 0x199   : > { %6259 = vmatpush1.bf16.msk.msra.mxu0 %vm6258_vm11, %v10665_v54  ;;  %vm2187_vm11 = vcmp.eq.s32.totalorder %v10688_v63, %v10696_v58 }
 0x19a   : > { %6261 = vmatprep.subr.msk.bf16.mxu0 %vm6260_vm14, %v10665_v54  ;;  %vm6270_vm13 = vmpackc.low %vm2187_vm11, %vm2171_vm10  ;;  %vm2204_vm14 = vcmp.eq.s32.totalorder %v10689_v8, %v10695_v41 }
 0x19c   : > { %3497 = vmatmul.mubr.bf16.gmra.mrb[64].mxu0 %v8567_v48 }
 0x19d   : > { %3506 = vmatprep.mubr.bf16.mxu0 %v10672_v20  ;;  %6263 = vmatpush1.bf16.msk.msra.mxu0 %vm6262_vm15, %v10665_v54  ;;  %vm2220_vm15 = vcmp.eq.s32.totalorder %v10691_v5, %v10695_v41 }
 0x19e   : > { %6265 = vmatprep.subr.msk.bf16.mxu0 %vm6264_vm6, %v10665_v54  ;;  %vm6272_vm4 = vmpackc.low %vm2220_vm15, %vm2204_vm14 }
 0x1a1   : > { %6267 = vmatpush1.bf16.msk.msra.mxu0 %vm6266_vm9, %v10665_v54 }
 0x1a2   : > { %6269 = vmatprep.subr.msk.bf16.mxu0 %vm6268_vm12, %v10665_v54 }
 0x1a4   : > { %3507 = vmatmul.mubr.bf16.gmra.mrb[68].mxu0 %v8589_v26 }
 0x1a5   : > { %3516 = vmatprep.mubr.bf16.mxu0 %v10672_v20  ;;  %6271 = vmatpush1.bf16.msk.msra.mxu0 %vm6270_vm13, %v10665_v54 }
 0x1a6   : > { %6273 = vmatprep.subr.msk.bf16.mxu0 %vm6272_vm4, %v10665_v54 }
 0x1a9   : > { %6275 = vmatpush1.bf16.msk.msra.mxu0 %vm6274_vm5, %v10665_v54 }
 0x1ac   : > { %3517 = vmatmul.mubr.bf16.gmra.mrb[72].mxu0 %v8616_v35 }
 0x1ad   : > { %3526 = vmatprep.mubr.bf16.mxu0 %v10672_v20 }
 0x1b4   : > { %3527 = vmatmul.mubr.bf16.gmra.mrb[76].mxu0 %v8638_v7 }
 0x1b5   : > { %3536 = vmatprep.mubr.bf16.mxu0 %v10672_v20 }
 0x1bc   : > { %3537 = vmatmul.mubr.bf16.gmra.mrb[80].mxu0 %v8665_v24 }
 0x1bd   : > { %3546 = vmatprep.mubr.bf16.mxu0 %v10672_v20 }
 0x1c4   : > { %3547 = vmatmul.mubr.bf16.gmra.mrb[84].mxu0 %v8679_v28 }
 0x1c5   : > { %3556 = vmatprep.mubr.bf16.mxu0 %v10672_v20 }
 0x1cc   : > { %3557 = vmatmul.mubr.bf16.gmra.mrb[56].mxu0 %v8560_v17 }
 0x1cd   : > { %3566 = vmatprep.mubr.bf16.mxu0 %v10672_v20 }
 0x1d4   : > { %3567 = vmatmul.mubr.bf16.gmra.mrb[60].mxu0 %v8580_v32 }
 0x1d5   : > { %3576 = vmatprep.mubr.bf16.mxu0 %v10672_v20 }
 0x1d9   : > { %v6473_v42 = vpop.f32.mrb[0].mxu1 }
 0x1da   : > { %v1322_v18 = vadd.f32 %v6473_v42, %v1225_v34  ;;  %v1316_v11 = vpop.f32.mrb[1].mxu1 }
 0x1db   : > { %v1317_v47 = vadd.f32 %v1316_v11, %v1220_v15 }
 0x1dc   : > { %v1336_v46 = vmul.f32 %v1322_v18, %v1322_v18  ;;  %3577 = vmatmul.mubr.bf16.gmra.mrb[64].mxu0 %v8609_v30 }
 0x1dd   : > { %v1335_v56 = vmul.f32 %v1317_v47, %v1317_v47  ;;  %v6476_v43 = vpop.f32.mrb[2].mxu1  ;;  %3586 = vmatprep.mubr.bf16.mxu0 %v10672_v20 }
 0x1de   : > { %v1340_v38 = vmul.f32 %v1336_v46, %v1322_v18  ;;  %v1332_v53 = vadd.f32 %v6476_v43, %v1235_v49  ;;  %v1326_v55 = vpop.f32.mrb[3].mxu1 }
 0x1df   : > { %v1339_v2 = vmul.f32 %v1335_v56, %v1317_v47  ;;  %v1327_v16 = vadd.f32 %v1326_v55, %v1230_v37 }
 0x1e0   : > { %v1344_v9 = vmul.f32 0.044715, %v1340_v38  ;;  %v1338_v39 = vmul.f32 %v1332_v53, %v1332_v53 }
 0x1e1   : > { %v1343_v31 = vmul.f32 0.044715, %v1339_v2  ;;  %v1337_v4 = vmul.f32 %v1327_v16, %v1327_v16 }
 0x1e2   : > { %v1348_v12 = vadd.f32 %v1344_v9, %v1322_v18  ;;  %v1342_v25 = vmul.f32 %v1338_v39, %v1332_v53 }
 0x1e3   : > { %v1347_v40 = vadd.f32 %v1343_v31, %v1317_v47  ;;  %v1341_v6 = vmul.f32 %v1337_v4, %v1327_v16 }
 0x1e4   : > { %v1352_v29 = vmul.f32 0.7978846, %v1348_v12  ;;  %v1346_v50 = vmul.f32 0.044715, %v1342_v25  ;;  %3587 = vmatmul.mubr.bf16.gmra.mrb[68].mxu0 %v8630_v13 }
 0x1e5   : > { %v1351_v36 = vmul.f32 0.7978846, %v1347_v40  ;;  %v1345_v10 = vmul.f32 0.044715, %v1341_v6  ;;  %3596 = vmatprep.mubr.bf16.mxu0 %v10672_v20  ;;  %v10697_v6 = vld [vmem:[#allocation13_spill] sm:$0xff] }
 0x1e6   : > { %7019 = vtanh.f32 %v1352_v29  ;;  %v1350_v41 = vadd.f32 %v1346_v50, %v1332_v53  ;;  %vm1970_vm6 = vcmp.eq.s32.totalorder %v10663_v62, %v10697_v6  ;;  %vm1986_vm7 = vcmp.eq.s32.totalorder %v10664_v51, %v10697_v6  ;;  %v1374_v29 = vld [vmem:[%s10414_s6 + $0x18] sm:$0xff]  ;;  %v1375_v50 = vld [vmem:[%s10414_s6 + $0x20] sm:$0xff] }
 0x1e7   : > { %7021 = vtanh.f32 %v1351_v36  ;;  %v1349_v58 = vadd.f32 %v1345_v10, %v1327_v16  ;;  %vm6084_vm8 = vmpackc.low %vm1986_vm7, %vm1970_vm6  ;;  %vm2002_vm11 = vcmp.eq.s32.totalorder %v10667_v44, %v10697_v6  ;;  %vm2018_vm12 = vcmp.eq.s32.totalorder %v10668_v3, %v10697_v6  ;;  %v1376_v36 = vld [vmem:[%s10414_s6 + $0x28] sm:$0xff]  ;;  %v1377_v10 = vld [vmem:[%s10414_s6 + $0x30] sm:$0xff] }
 0x1e8   : > { %v1354_v34 = vmul.f32 0.7978846, %v1350_v41  ;;  %vm6088_vm14 = vmpackc.low %vm2018_vm12, %vm2002_vm11  ;;  %vm2034_vm3 = vcmp.eq.s32.totalorder %v10670_v22, %v10697_v6  ;;  %vm2050_vm4 = vcmp.eq.s32.totalorder %v10671_v23, %v10697_v6  ;;  %v1378_v41 = vld [vmem:[%s10414_s6 + $0x38] sm:$0xff] }
 0x1e9   : > { %v1353_v15 = vmul.f32 0.7978846, %v1349_v58  ;;  %vm6092_vm6 = vmpackc.low %vm2050_vm4, %vm2034_vm3  ;;  %v10699_v58 = vld [vmem:[#allocation25_spill] sm:$0xff] }
 0x1ea   : > { %7023 = vtanh.f32 %v1354_v34  ;;  %v10700_v34 = vld [vmem:[#allocation24_spill] sm:$0xff] }
 0x1eb   : > { %7025 = vtanh.f32 %v1353_v15 }
 0x1ec   : > { %3597 = vmatmul.mubr.bf16.gmra.mrb[72].mxu0 %v8658_v14 }
 0x1ed   : > { %3606 = vmatprep.mubr.bf16.mxu0 %v10672_v20 }
 0x1f0   : > { %v7020_v42 = vpop.eup %7019 }
 0x1f1   : > { %v7022_v11 = vpop.eup %7021  ;;  %v1360_v46 = vadd.f32 1.0, %v7020_v42  ;;  %v10703_v42 = vld [vmem:[#allocation15_spill] sm:$0xff] }
 0x1f2   : > { %v1359_v49 = vadd.f32 1.0, %v7022_v11 }
 0x1f3   : > { %v1364_v56 = vmul.f32 0.5, %v1360_v46 }
 0x1f4   : > { %v7024_v43 = vpop.eup %7023  ;;  %v1363_v37 = vmul.f32 0.5, %v1359_v49  ;;  %3607 = vmatmul.mubr.bf16.gmra.mrb[76].mxu0 %v8673_v45  ;;  %v10708_v49 = vld [vmem:[#allocation14_spill] sm:$0xff] }
 0x1f5   : > { %v7026_v38 = vpop.eup %7025  ;;  %v1368_v55 = vmul.f32 %v1364_v56, %v1322_v18  ;;  %v1362_v2 = vadd.f32 1.0, %v7024_v43  ;;  %3616 = vmatprep.mubr.bf16.mxu0 %v10672_v20 }
 0x1f6   : > { %v1367_v9 = vmul.f32 %v1363_v37, %v1317_v47  ;;  %v1361_v39 = vadd.f32 1.0, %v7026_v38  ;;  %v10698_v47 = vld [vmem:[#allocation12_spill] sm:$0xff] }
 0x1f7   : > { %v1366_v31 = vmul.f32 0.5, %v1362_v2  ;;  %vm1969_vm9 = vcmp.eq.s32.totalorder %v10663_v62, %v10698_v47  ;;  %vm1985_vm10 = vcmp.eq.s32.totalorder %v10664_v51, %v10698_v47  ;;  %vm2001_vm15 = vcmp.eq.s32.totalorder %v10667_v44, %v10698_v47 }
 0x1f8   : > { %v6641_v4 = vpack.c.bf16 %v1368_v55, %v1367_v9  ;;  %v1365_v12 = vmul.f32 0.5, %v1361_v39  ;;  %vm6086_vm13 = vmpackc.low %vm1985_vm10, %vm1969_vm9  ;;  %vm2017_vm2 = vcmp.eq.s32.totalorder %v10668_v3, %v10698_v47  ;;  %vm2033_vm7 = vcmp.eq.s32.totalorder %v10670_v22, %v10698_v47  ;;  %v9193_v55 = vpop.f32.mrb[16].mxu0 }
 0x1f9   : > { %v1370_v25 = vmul.f32 %v1366_v31, %v1332_v53  ;;  %v1372_v53 = vld [vmem:[%s10414_s6 + $0x8] sm:$0xff]  ;;  %vm6090_vm5 = vmpackc.low %vm2017_vm2, %vm2001_vm15  ;;  %vm2066_vm9 = vcmp.eq.s32.totalorder %v10674_v60, %v10697_v6  ;;  %vm2082_vm10 = vcmp.eq.s32.totalorder %v10676_v57, %v10697_v6  ;;  %vm2098_vm15 = vcmp.eq.s32.totalorder %v10680_v59, %v10697_v6  ;;  %10717 = vst [vmem:[#allocation26_spill] sm:$0xff] %v9193_v55  ;;  %v9196_v2 = vpop.f32.mrb[17].mxu0 }
 0x1fa   : > { %6642 = vmatprep.subr.bf16.mxu1 %v6641_v4  ;;  %v1369_v40 = vmul.f32 %v1365_v12, %v1327_v16  ;;  %v1373_v16 = vld [vmem:[%s10414_s6 + $0x10] sm:$0xff]  ;;  %vm6096_vm12 = vmpackc.low %vm2082_vm10, %vm2066_vm9  ;;  %vm2114_vm2 = vcmp.eq.s32.totalorder %v10682_v52, %v10697_v6  ;;  %10718 = vst [vmem:[#allocation27_spill] sm:$0xff] %v9196_v2  ;;  %v9201_v9 = vpop.f32.mrb[18].mxu0 }
 0x1fb   : > { %6644 = vmatpush3.bf16.msra.mxu1 %v6641_v4  ;;  %vm6100_vm4 = vmpackc.low %vm2114_vm2, %vm2098_vm15  ;;  %vm2177_vm15 = vcmp.eq.s32.totalorder %v10688_v63, %v10698_v47  ;;  %10719 = vst [vmem:[#allocation28_spill] sm:$0xff] %v9201_v9  ;;  %v9204_v39 = vpop.f32.mrb[19].mxu0 }
 0x1fc   : > { %v6645_v18 = vpack.c.bf16 %v1370_v25, %v1369_v40  ;;  %3617 = vmatmul.mubr.bf16.gmra.mrb[80].mxu0 %v8682_v21  ;;  %10720 = vst [vmem:[#allocation29_spill] sm:$0xff] %v9204_v39  ;;  %v9206_v31 = vpop.f32.mrb[20].mxu0 }
 0x1fd   : > { %3626 = vmatprep.mubr.bf16.mxu0 %v10672_v20  ;;  %10721 = vst [vmem:[#allocation30_spill] sm:$0xff] %v9206_v31  ;;  %v9208_v4 = vpop.f32.mrb[21].mxu0 }
 0x1fe   : > { %6646 = vmatprep.subr.bf16.mxu1 %v6645_v18  ;;  %10722 = vst [vmem:[#allocation31_spill] sm:$0xff] %v9208_v4  ;;  %v9210_v12 = vpop.f32.mrb[22].mxu0 }
 0x1ff   : > { %6648 = vmatpush3.bf16.msra.mxu1 %v6645_v18  ;;  %10723 = vst [vmem:[#allocation32_spill] sm:$0xff] %v9210_v12  ;;  %v9212_v25 = vpop.f32.mrb[23].mxu0  ;;  %v10727_v12 = vld [vmem:[#allocation19_spill] sm:$0xff] }
 0x200   : > { %6085 = vmatprep.subr.msk.bf16.mxu1 %vm6084_vm8, %v10665_v54  ;;  %vm2049_vm8 = vcmp.eq.s32.totalorder %v10671_v23, %v10698_v47  ;;  %10724 = vst [vmem:[#allocation33_spill] sm:$0xff] %v9212_v25 }
 0x201   : > { %vm6094_vm11 = vmpackc.low %vm2049_vm8, %vm2033_vm7  ;;  %vm2130_vm7 = vcmp.eq.s32.totalorder %v10683_v61, %v10697_v6  ;;  %vm2146_vm8 = vcmp.eq.s32.totalorder %v10684_v0, %v10697_v6 }
 0x202   : > { %6486 = vmatmul.mubr.msk.f32.vlgmr.msra.gmra.mrb[4].mxu1 %vm1237_vm1, %v1372_v53  ;;  %vm6104_vm10 = vmpackc.low %vm2146_vm8, %vm2130_vm7  ;;  %vm1999_vm7 = vcmp.eq.s32.totalorder %v10664_v51, %v10700_v34 }
 0x203   : > { %6087 = vmatpush1.bf16.msk.msra.mxu1 %vm6086_vm13, %v10665_v54  ;;  %6488 = vmatprep.mubr.msk.f32.mxu1 %vm1237_vm1, %v1373_v16  ;;  %vm2065_vm13 = vcmp.eq.s32.totalorder %v10674_v60, %v10698_v47 }
 0x204   : > { %6089 = vmatprep.subr.msk.bf16.mxu1 %vm6088_vm14, %v10665_v54  ;;  %3627 = vmatmul.mubr.bf16.gmra.mrb[84].mxu0 %v8688_v33  ;;  %vm2081_vm14 = vcmp.eq.s32.totalorder %v10676_v57, %v10698_v47 }
 0x205   : > { %3862 = vmatprep.mubr.bf16.mxu0 %v10672_v20  ;;  %vm6098_vm3 = vmpackc.low %vm2081_vm14, %vm2065_vm13  ;;  %vm2178_vm13 = vcmp.eq.s32.totalorder %v10688_v63, %v10697_v6  ;;  %vm2161_vm14 = vcmp.eq.s32.totalorder %v10687_v1, %v10698_v47 }
 0x206   : > { %6489 = vmatmul.mubr.msk.f32.gmra.mrb[6].mxu1 %vm1237_vm1, %v1374_v29  ;;  %vm8935_vm8 = vmpackc.low %vm2177_vm15, %vm2161_vm14  ;;  %vm1974_vm15 = vcmp.eq.s32.totalorder %v10663_v62, %v10703_v42 }
 0x207   : > { %6091 = vmatpush1.bf16.msk.msra.mxu1 %vm6090_vm5, %v10665_v54  ;;  %6491 = vmatprep.mubr.msk.f32.mxu1 %vm1237_vm1, %v1375_v50  ;;  %vm2097_vm5 = vcmp.eq.s32.totalorder %v10680_v59, %v10698_v47 }
 0x208   : > { %6093 = vmatprep.subr.msk.bf16.mxu1 %vm6092_vm6, %v10665_v54  ;;  %vm2113_vm6 = vcmp.eq.s32.totalorder %v10682_v52, %v10698_v47 }
 0x209   : > { %vm6102_vm9 = vmpackc.low %vm2113_vm6, %vm2097_vm5  ;;  %vm1983_vm6 = vcmp.eq.s32.totalorder %v10663_v62, %v10700_v34 }
 0x20a   : > { %6492 = vmatmul.mubr.msk.f32.gmra.mrb[8].mxu1 %vm1237_vm1, %v1376_v36 }
 0x20b   : > { %6095 = vmatpush1.bf16.msk.msra.mxu1 %vm6094_vm11, %v10665_v54  ;;  %6494 = vmatprep.mubr.msk.f32.mxu1 %vm1237_vm1, %v1377_v10  ;;  %vm2129_vm11 = vcmp.eq.s32.totalorder %v10683_v61, %v10698_v47 }
 0x20c   : > { %6097 = vmatprep.subr.msk.bf16.mxu1 %vm6096_vm12, %v10665_v54  ;;  %3863 = vmatmul.mubr.bf16.vlgmr.msra.gmra.mrb[88].mxu0 %v8533_v27  ;;  %vm2162_vm12 = vcmp.eq.s32.totalorder %v10687_v1, %v10697_v6 }
 0x20d   : > { %3872 = vmatprep.mubr.bf16.mxu0 %v10672_v20  ;;  %vm6108_vm5 = vmpackc.low %vm2178_vm13, %vm2162_vm12  ;;  %vm2209_vm12 = vcmp.eq.s32.totalorder %v10691_v5, %v10698_v47 }
 0x20e   : > { %6495 = vmatmul.mubr.msk.f32.gmra.mrb[10].mxu1 %vm1237_vm1, %v1378_v41  ;;  %vm2145_vm1 = vcmp.eq.s32.totalorder %v10684_v0, %v10698_v47  ;;  %vm6310_vm13 = vmpackc.low %vm1999_vm7, %vm1983_vm6  ;;  %vm2015_vm6 = vcmp.eq.s32.totalorder %v10667_v44, %v10700_v34  ;;  %vm2031_vm7 = vcmp.eq.s32.totalorder %v10668_v3, %v10700_v34 }
 0x20f   : > { %6099 = vmatpush1.bf16.msk.msra.mxu1 %vm6098_vm3, %v10665_v54  ;;  %2897 = vmatprep.mubr.bf16.mxu1 %v10672_v20  ;;  %vm6106_vm2 = vmpackc.low %vm2145_vm1, %vm2129_vm11  ;;  %vm1984_vm3 = vcmp.eq.s32.totalorder %v10663_v62, %v10699_v58  ;;  %vm2193_vm1 = vcmp.eq.s32.totalorder %v10689_v8, %v10698_v47 }
 0x210   : > { %6101 = vmatprep.subr.msk.bf16.mxu1 %vm6100_vm4, %v10665_v54  ;;  %vm2000_vm4 = vcmp.eq.s32.totalorder %v10664_v51, %v10699_v58 }
 0x211   : > { %vm6308_vm11 = vmpackc.low %vm2000_vm4, %vm1984_vm3  ;;  %vm2016_vm4 = vcmp.eq.s32.totalorder %v10667_v44, %v10699_v58 }
 0x212   : > { %6309 = vmatprep.subr.msk.bf16.mxu0 %vm6308_vm11, %v10665_v54  ;;  %vm8960_vm3 = vmpackc.low %vm2209_vm12, %vm2193_vm1  ;;  %vm2006_vm11 = vcmp.eq.s32.totalorder %v10667_v44, %v10703_v42  ;;  %vm2022_vm1 = vcmp.eq.s32.totalorder %v10668_v3, %v10703_v42 }
 0x213   : > { %6103 = vmatpush1.bf16.msk.msra.mxu1 %vm6102_vm9, %v10665_v54  ;;  %vm2194_vm9 = vcmp.eq.s32.totalorder %v10689_v8, %v10697_v6  ;;  %6311 = vmatpush1.bf16.msk.msra.mxu0 %vm6310_vm13, %v10665_v54  ;;  %vm6314_vm13 = vmpackc.low %vm2031_vm7, %vm2015_vm6  ;;  %vm2021_vm7 = vcmp.eq.s32.totalorder %v10668_v3, %v10708_v49 }
 0x214   : > { %6105 = vmatprep.subr.msk.bf16.mxu1 %vm6104_vm10, %v10665_v54  ;;  %vm2210_vm10 = vcmp.eq.s32.totalorder %v10691_v5, %v10697_v6  ;;  %3873 = vmatmul.mubr.bf16.gmra.mrb[92].mxu0 %v8548_v19  ;;  %vm9006_vm6 = vmpackc.low %vm2022_vm1, %vm2006_vm11  ;;  %vm2080_vm1 = vcmp.eq.s32.totalorder %v10674_v60, %v10699_v58 }
 0x215   : > { %vm6112_vm14 = vmpackc.low %vm2210_vm10, %vm2194_vm9  ;;  %3882 = vmatprep.mubr.bf16.mxu0 %v10672_v20  ;;  %vm1989_vm10 = vcmp.eq.s32.totalorder %v10664_v51, %v10708_v49 }
 0x217   : > { %6107 = vmatpush1.bf16.msk.msra.mxu1 %vm6106_vm2, %v10665_v54  ;;  %vm1990_vm2 = vcmp.eq.s32.totalorder %v10664_v51, %v10703_v42 }
 0x218   : > { %6109 = vmatprep.subr.msk.bf16.mxu1 %vm6108_vm5, %v10665_v54  ;;  %vm2032_vm5 = vcmp.eq.s32.totalorder %v10668_v3, %v10699_v58  ;;  %vm8973_vm9 = vmpackc.low %vm1990_vm2, %vm1974_vm15  ;;  %vm2064_vm15 = vcmp.eq.s32.totalorder %v10671_v23, %v10699_v58 }
 0x219   : > { %vm6312_vm12 = vmpackc.low %vm2032_vm5, %vm2016_vm4  ;;  %vm2047_vm4 = vcmp.eq.s32.totalorder %v10670_v22, %v10700_v34  ;;  %vm2063_vm5 = vcmp.eq.s32.totalorder %v10671_v23, %v10700_v34 }
 0x21a   : > { %6313 = vmatprep.subr.msk.bf16.mxu0 %vm6312_vm12, %v10665_v54  ;;  %vm6318_vm11 = vmpackc.low %vm2063_vm5, %vm2047_vm4  ;;  %vm2096_vm12 = vcmp.eq.s32.totalorder %v10676_v57, %v10699_v58  ;;  %vm2128_vm5 = vcmp.eq.s32.totalorder %v10682_v52, %v10699_v58 }
 0x21b   : > { %6111 = vmatpush1.bf16.msk.msra.mxu1 %vm8935_vm8, %v10665_v54  ;;  %vm1973_vm8 = vcmp.eq.s32.totalorder %v10663_v62, %v10708_v49  ;;  %6315 = vmatpush1.bf16.msk.msra.mxu0 %vm6314_vm13, %v10665_v54  ;;  %vm6320_vm13 = vmpackc.low %vm2096_vm12, %vm2080_vm1 }
 0x21c   : > { %6113 = vmatprep.subr.msk.bf16.mxu1 %vm6112_vm14, %v10665_v54  ;;  %vm2048_vm14 = vcmp.eq.s32.totalorder %v10670_v22, %v10699_v58  ;;  %vm8993_vm2 = vmpackc.low %vm1989_vm10, %vm1973_vm8  ;;  %3883 = vmatmul.mubr.bf16.gmra.mrb[96].mxu0 %v8567_v48  ;;  %vm2038_vm8 = vcmp.eq.s32.totalorder %v10670_v22, %v10703_v42 }
 0x21d   : > { %3892 = vmatprep.mubr.bf16.mxu0 %v10672_v20  ;;  %vm6316_vm10 = vmpackc.low %vm2064_vm15, %vm2048_vm14  ;;  %vm2079_vm14 = vcmp.eq.s32.totalorder %v10674_v60, %v10700_v34  ;;  %vm2095_vm15 = vcmp.eq.s32.totalorder %v10676_v57, %v10700_v34 }
 0x21e   : > { %6317 = vmatprep.subr.msk.bf16.mxu0 %vm6316_vm10, %v10665_v54  ;;  %vm2037_vm10 = vcmp.eq.s32.totalorder %v10670_v22, %v10708_v49  ;;  %vm6322_vm1 = vmpackc.low %vm2095_vm15, %vm2079_vm14  ;;  %vm2069_vm14 = vcmp.eq.s32.totalorder %v10674_v60, %v10708_v49  ;;  %vm2085_vm15 = vcmp.eq.s32.totalorder %v10676_v57, %v10708_v49 }
 0x21f   : > { %6115 = vmatpush1.bf16.msk.msra.mxu1 %vm8960_vm3, %v10665_v54  ;;  %vm2005_vm3 = vcmp.eq.s32.totalorder %v10667_v44, %v10708_v49  ;;  %6319 = vmatpush1.bf16.msk.msra.mxu0 %vm6318_vm11, %v10665_v54  ;;  %vm2086_vm11 = vcmp.eq.s32.totalorder %v10676_v57, %v10703_v42  ;;  %v9215_v40 = vpop.f32.mrb[24].mxu0 }
 0x220   : > { %6149 = vmatprep.subr.msk.bf16.mxu1 %vm8973_vm9, %v10665_v54  ;;  %vm2054_vm9 = vcmp.eq.s32.totalorder %v10671_v23, %v10703_v42  ;;  %vm6154_vm4 = vmpackc.low %vm2021_vm7, %vm2005_vm3  ;;  %vm2053_vm3 = vcmp.eq.s32.totalorder %v10671_v23, %v10708_v49  ;;  %6321 = vmatprep.subr.msk.bf16.mxu0 %vm6320_vm13, %v10665_v54  ;;  %vm2070_vm7 = vcmp.eq.s32.totalorder %v10674_v60, %v10703_v42  ;;  %v9218_v6 = vpop.f32.mrb[25].mxu0 }
 0x221   : > { %vm6158_vm13 = vmpackc.low %vm2053_vm3, %vm2037_vm10  ;;  %vm2160_vm10 = vcmp.eq.s32.totalorder %v10684_v0, %v10699_v58  ;;  %v9223_v47 = vpop.f32.mrb[26].mxu0 }
 0x222   : > { %2898 = vmatmul.mubr.bf16.vlgmr.msra.gmra.mrb[12].mxu1 %v8533_v27  ;;  %vm9070_vm0 = vmpackc.low %vm2086_vm11, %vm2070_vm7  ;;  %vm2143_vm7 = vcmp.eq.s32.totalorder %v10683_v61, %v10700_v34  ;;  %vm2159_vm11 = vcmp.eq.s32.totalorder %v10684_v0, %v10700_v34  ;;  %v9226_v53 = vpop.f32.mrb[27].mxu0 }
 0x223   : > { %2907 = vmatprep.mubr.bf16.mxu1 %v10672_v20  ;;  %6151 = vmatpush1.bf16.msk.msra.mxu1 %vm8993_vm2, %v10665_v54  ;;  %vm2112_vm2 = vcmp.eq.s32.totalorder %v10680_v59, %v10699_v58 }
 0x224   : > { %6153 = vmatprep.subr.msk.bf16.mxu1 %vm9006_vm6, %v10665_v54  ;;  %vm6156_vm6 = vmpackc.low %vm2054_vm9, %vm2038_vm8  ;;  %vm2111_vm8 = vcmp.eq.s32.totalorder %v10680_v59, %v10700_v34  ;;  %vm2127_vm9 = vcmp.eq.s32.totalorder %v10682_v52, %v10700_v34  ;;  %3893 = vmatmul.mubr.bf16.gmra.mrb[100].mxu0 %v8589_v26 }
 0x225   : > { %vm6324_vm12 = vmpackc.low %vm2128_vm5, %vm2112_vm2  ;;  %3902 = vmatprep.mubr.bf16.mxu0 %v10672_v20  ;;  %6323 = vmatpush1.bf16.msk.msra.mxu0 %vm6322_vm1, %v10665_v54  ;;  %vm2118_vm2 = vcmp.eq.s32.totalorder %v10682_v52, %v10703_v42 }
 0x226   : > { %6325 = vmatprep.subr.msk.bf16.mxu0 %vm6324_vm12, %v10665_v54  ;;  %vm6326_vm5 = vmpackc.low %vm2127_vm9, %vm2111_vm8  ;;  %vm2176_vm12 = vcmp.eq.s32.totalorder %v10687_v1, %v10699_v58  ;;  %vm2192_vm8 = vcmp.eq.s32.totalorder %v10688_v63, %v10699_v58 }
 0x227   : > { %6155 = vmatpush1.bf16.msk.msra.mxu1 %vm6154_vm4, %v10665_v54  ;;  %vm2102_vm4 = vcmp.eq.s32.totalorder %v10680_v59, %v10703_v42  ;;  %vm6162_vm1 = vmpackc.low %vm2085_vm15, %vm2069_vm14  ;;  %vm2134_vm14 = vcmp.eq.s32.totalorder %v10683_v61, %v10703_v42  ;;  %vm2150_vm15 = vcmp.eq.s32.totalorder %v10684_v0, %v10703_v42  ;;  %v9230_v29 = vpop.f32.mrb[28].mxu0 }
 0x228   : > { %6157 = vmatprep.subr.msk.bf16.mxu1 %vm6156_vm6, %v10665_v54  ;;  %vm2144_vm6 = vcmp.eq.s32.totalorder %v10683_v61, %v10699_v58  ;;  %vm6164_vm9 = vmpackc.low %vm2118_vm2, %vm2102_vm4  ;;  %vm2175_vm2 = vcmp.eq.s32.totalorder %v10687_v1, %v10700_v34  ;;  %v9232_v50 = vpop.f32.mrb[29].mxu0 }
 0x229   : > { %vm6328_vm3 = vmpackc.low %vm2160_vm10, %vm2144_vm6  ;;  %6327 = vmatpush1.bf16.msk.msra.mxu0 %vm6326_vm5, %v10665_v54  ;;  %vm2191_vm10 = vcmp.eq.s32.totalorder %v10688_v63, %v10700_v34  ;;  %v9237_v10 = vpop.f32.mrb[30].mxu0 }
 0x22a   : > { %2908 = vmatmul.mubr.bf16.gmra.mrb[16].mxu1 %v8548_v19  ;;  %6329 = vmatprep.subr.msk.bf16.mxu0 %vm6328_vm3, %v10665_v54  ;;  %vm6330_vm6 = vmpackc.low %vm2159_vm11, %vm2143_vm7  ;;  %vm2133_vm7 = vcmp.eq.s32.totalorder %v10683_v61, %v10708_v49  ;;  %vm2149_vm11 = vcmp.eq.s32.totalorder %v10684_v0, %v10708_v49  ;;  %v9240_v41 = vpop.f32.mrb[31].mxu0 }
 0x22b   : > { %2917 = vmatprep.mubr.bf16.mxu1 %v10672_v20  ;;  %6159 = vmatpush1.bf16.msk.msra.mxu1 %vm6158_vm13, %v10665_v54  ;;  %vm2117_vm13 = vcmp.eq.s32.totalorder %v10682_v52, %v10708_v49  ;;  %vm6332_vm4 = vmpackc.low %vm2192_vm8, %vm2176_vm12  ;;  %vm2182_vm12 = vcmp.eq.s32.totalorder %v10688_v63, %v10703_v42 }
 0x22c   : > { %6161 = vmatprep.subr.msk.bf16.mxu1 %vm9070_vm0, %v10665_v54  ;;  %vm2101_vm0 = vcmp.eq.s32.totalorder %v10680_v59, %v10708_v49  ;;  %3903 = vmatmul.mubr.bf16.gmra.mrb[104].mxu0 %v8616_v35  ;;  %vm9129_vm3 = vmpackc.low %vm2150_vm15, %vm2134_vm14  ;;  %vm2207_vm14 = vcmp.eq.s32.totalorder %v10689_v8, %v10700_v34  ;;  %vm2223_vm15 = vcmp.eq.s32.totalorder %v10691_v5, %v10700_v34 }
 0x22d   : > { %vm6166_vm5 = vmpackc.low %vm2117_vm13, %vm2101_vm0  ;;  %3912 = vmatprep.mubr.bf16.mxu0 %v10672_v20  ;;  %6331 = vmatpush1.bf16.msk.msra.mxu0 %vm6330_vm6, %v10665_v54  ;;  %vm2224_vm0 = vcmp.eq.s32.totalorder %v10691_v5, %v10699_v58 }
 0x22e   : > { %6333 = vmatprep.subr.msk.bf16.mxu0 %vm6332_vm4, %v10665_v54  ;;  %vm6334_vm8 = vmpackc.low %vm2191_vm10, %vm2175_vm2  ;;  %vm2165_vm2 = vcmp.eq.s32.totalorder %v10687_v1, %v10708_v49  ;;  %vm2181_vm10 = vcmp.eq.s32.totalorder %v10688_v63, %v10708_v49 }
 0x22f   : > { %6163 = vmatpush1.bf16.msk.msra.mxu1 %vm6162_vm1, %v10665_v54  ;;  %vm2166_vm1 = vcmp.eq.s32.totalorder %v10687_v1, %v10703_v42  ;;  %vm6170_vm6 = vmpackc.low %vm2149_vm11, %vm2133_vm7  ;;  %v9245_v34 = vpop.f32.mrb[32].mxu0 }
 0x230   : > { %6165 = vmatprep.subr.msk.bf16.mxu1 %vm6164_vm9, %v10665_v54  ;;  %vm2208_vm9 = vcmp.eq.s32.totalorder %v10689_v8, %v10699_v58  ;;  %vm6172_vm4 = vmpackc.low %vm2182_vm12, %vm2166_vm1  ;;  %vm2197_vm12 = vcmp.eq.s32.totalorder %v10689_v8, %v10708_v49  ;;  %v9248_v15 = vpop.f32.mrb[33].mxu0 }
 0x231   : > { %vm6336_vm13 = vmpackc.low %vm2224_vm0, %vm2208_vm9  ;;  %6335 = vmatpush1.bf16.msk.msra.mxu0 %vm6334_vm8, %v10665_v54  ;;  %vm2213_vm8 = vcmp.eq.s32.totalorder %v10691_v5, %v10708_v49  ;;  %v9252_v11 = vpop.f32.mrb[34].mxu0  ;;  %vm1978_vm0 = vcmp.eq.s32.totalorder %v10663_v62, %v10727_v12 }
 0x232   : > { %2918 = vmatmul.mubr.bf16.gmra.mrb[20].mxu1 %v8567_v48  ;;  %6337 = vmatprep.subr.msk.bf16.mxu0 %vm6336_vm13, %v10665_v54  ;;  %vm6338_vm7 = vmpackc.low %vm2223_vm15, %vm2207_vm14  ;;  %v9254_v46 = vpop.f32.mrb[35].mxu0  ;;  %vm1994_vm13 = vcmp.eq.s32.totalorder %v10664_v51, %v10727_v12 }
 0x233   : > { %2927 = vmatprep.mubr.bf16.mxu1 %v10672_v20  ;;  %6167 = vmatpush1.bf16.msk.msra.mxu1 %vm6166_vm5, %v10665_v54  ;;  %vm2198_vm5 = vcmp.eq.s32.totalorder %v10689_v8, %v10703_v42  ;;  %vm6174_vm11 = vmpackc.low %vm2181_vm10, %vm2165_vm2  ;;  %vm2026_vm2 = vcmp.eq.s32.totalorder %v10668_v3, %v10727_v12 }
 0x234   : > { %6169 = vmatprep.subr.msk.bf16.mxu1 %vm9129_vm3, %v10665_v54  ;;  %vm2214_vm3 = vcmp.eq.s32.totalorder %v10691_v5, %v10703_v42  ;;  %3913 = vmatmul.mubr.bf16.gmra.mrb[108].mxu0 %v8638_v7  ;;  %vm6178_vm9 = vmpackc.low %vm2213_vm8, %vm2197_vm12 }
 0x235   : > { %3922 = vmatprep.mubr.bf16.mxu0 %v10672_v20  ;;  %vm6176_vm1 = vmpackc.low %vm2214_vm3, %vm2198_vm5  ;;  %6339 = vmatpush1.bf16.msk.msra.mxu0 %vm6338_vm7, %v10665_v54 }
 0x236   : > { %vm6212_vm14 = vmpackc.low %vm1994_vm13, %vm1978_vm0  ;;  %vm2074_vm13 = vcmp.eq.s32.totalorder %v10674_v60, %v10727_v12 }
 0x237   : > { %6171 = vmatpush1.bf16.msk.msra.mxu1 %vm6170_vm6, %v10665_v54  ;;  %v9258_v56 = vpop.f32.mrb[36].mxu0 }
 0x238   : > { %6173 = vmatprep.subr.msk.bf16.mxu1 %vm6172_vm4, %v10665_v54  ;;  %v9260_v43 = vpop.f32.mrb[37].mxu0  ;;  %vm2010_vm4 = vcmp.eq.s32.totalorder %v10667_v44, %v10727_v12 }
 0x239   : > { %v9265_v38 = vpop.f32.mrb[38].mxu0  ;;  %vm6216_vm5 = vmpackc.low %vm2026_vm2, %vm2010_vm4 }
 0x23a   : > { %2928 = vmatmul.mubr.bf16.gmra.mrb[24].mxu1 %v8589_v26  ;;  %v9268_v42 = vpop.f32.mrb[39].mxu0 }
 0x23b   : > { %2937 = vmatprep.mubr.bf16.mxu1 %v10672_v20  ;;  %6175 = vmatpush1.bf16.msk.msra.mxu1 %vm6174_vm11, %v10665_v54  ;;  %vm2042_vm11 = vcmp.eq.s32.totalorder %v10670_v22, %v10727_v12 }
 0x23c   : > { %6177 = vmatprep.subr.msk.bf16.mxu1 %vm6176_vm1, %v10665_v54  ;;  %3923 = vmatmul.mubr.bf16.gmra.mrb[112].mxu0 %v8665_v24  ;;  %vm2058_vm1 = vcmp.eq.s32.totalorder %v10671_v23, %v10727_v12 }
 0x23d   : > { %3932 = vmatprep.mubr.bf16.mxu0 %v10672_v20  ;;  %vm6220_vm8 = vmpackc.low %vm2058_vm1, %vm2042_vm11 }
 0x23f   : > { %6179 = vmatpush1.bf16.msk.msra.mxu1 %vm6178_vm9, %v10665_v54  ;;  %v9273_v58 = vpop.f32.mrb[40].mxu0 }
 0x240   : > { %v9276_v36 = vpop.f32.mrb[41].mxu0  ;;  %6213 = vmatprep.subr.msk.bf16.mxu1 %vm6212_vm14, %v10665_v54  ;;  %vm2090_vm14 = vcmp.eq.s32.totalorder %v10676_v57, %v10727_v12 }
 0x241   : > { %v9280_v16 = vpop.f32.mrb[42].mxu0 }
 0x242   : > { %2938 = vmatmul.mubr.bf16.gmra.mrb[28].mxu1 %v8616_v35  ;;  %v9282_v18 = vpop.f32.mrb[43].mxu0 }
 0x243   : > { %2947 = vmatprep.mubr.bf16.mxu1 %v10672_v20 }
 0x244   : > { %3933 = vmatmul.mubr.bf16.gmra.mrb[116].mxu0 %v8679_v28 }
 0x245   : > { %3942 = vmatprep.mubr.bf16.mxu0 %v10672_v20 }
 0x247   : > { %v9286_v25 = vpop.f32.mrb[44].mxu0 }
 0x248   : > { %10725 = vst [vmem:[#allocation34_spill] sm:$0xff] %v9286_v25  ;;  %v9288_v31 = vpop.f32.mrb[45].mxu0 }
 0x249   : > { %v9293_v4 = vpop.f32.mrb[46].mxu0 }
 0x24a   : > { %2948 = vmatmul.mubr.bf16.gmra.mrb[32].mxu1 %v8638_v7  ;;  %10726 = vst [vmem:[#allocation35_spill] sm:$0xff] %v9293_v4  ;;  %v9296_v37 = vpop.f32.mrb[47].mxu0 }
 0x24b   : > { %2957 = vmatprep.mubr.bf16.mxu1 %v10672_v20 }
 0x24c   : > { %3943 = vmatmul.mubr.bf16.gmra.mrb[88].mxu0 %v8560_v17 }
 0x24d   : > { %3952 = vmatprep.mubr.bf16.mxu0 %v10672_v20 }
 0x24f   : > { %v9301_v9 = vpop.f32.mrb[48].mxu0 }
 0x250   : > { %v9304_v39 = vpop.f32.mrb[49].mxu0 }
 0x251   : > { %v9308_v55 = vpop.f32.mrb[50].mxu0 }
 0x252   : > { %2958 = vmatmul.mubr.bf16.gmra.mrb[36].mxu1 %v8665_v24  ;;  %v9310_v2 = vpop.f32.mrb[51].mxu0 }
 0x253   : > { %2967 = vmatprep.mubr.bf16.mxu1 %v10672_v20 }
 0x254   : > { %3953 = vmatmul.mubr.bf16.gmra.mrb[92].mxu0 %v8580_v32 }
 0x255   : > { %3962 = vmatprep.mubr.bf16.mxu0 %v10672_v20 }
 0x25a   : > { %2968 = vmatmul.mubr.bf16.gmra.mrb[40].mxu1 %v8679_v28 }
 0x25b   : > { %2977 = vmatprep.mubr.bf16.mxu1 %v10672_v20 }
 0x25c   : > { %3963 = vmatmul.mubr.bf16.gmra.mrb[96].mxu0 %v8609_v30 }
 0x25d   : > { %3972 = vmatprep.mubr.bf16.mxu0 %v10672_v20 }
 0x262   : > { %2978 = vmatmul.mubr.bf16.gmra.mrb[12].mxu1 %v8560_v17  ;;  %v10728_v17 = vld [vmem:[#allocation18_spill] sm:$0xff] }
 0x263   : > { %2987 = vmatprep.mubr.bf16.mxu1 %v10672_v20  ;;  %vm1977_vm15 = vcmp.eq.s32.totalorder %v10663_v62, %v10728_v17  ;;  %vm1993_vm6 = vcmp.eq.s32.totalorder %v10664_v51, %v10728_v17  ;;  %vm2009_vm3 = vcmp.eq.s32.totalorder %v10667_v44, %v10728_v17  ;;  %vm2025_vm7 = vcmp.eq.s32.totalorder %v10668_v3, %v10728_v17 }
 0x264   : > { %3973 = vmatmul.mubr.bf16.gmra.mrb[100].mxu0 %v8630_v13  ;;  %vm6214_vm10 = vmpackc.low %vm1993_vm6, %vm1977_vm15  ;;  %v10729_v51 = vmax.f32 %v9218_v6, %v9215_v40  ;;  %vm2041_vm9 = vcmp.eq.s32.totalorder %v10670_v22, %v10728_v17  ;;  %vm2057_vm0 = vcmp.eq.s32.totalorder %v10671_v23, %v10728_v17  ;;  %vm2073_vm4 = vcmp.eq.s32.totalorder %v10674_v60, %v10728_v17 }
 0x265   : > { %3982 = vmatprep.mubr.bf16.mxu0 %v10672_v20  ;;  %vm6218_vm12 = vmpackc.low %vm2025_vm7, %vm2009_vm3  ;;  %vm2089_vm2 = vcmp.eq.s32.totalorder %v10676_v57, %v10728_v17  ;;  %vm2105_vm11 = vcmp.eq.s32.totalorder %v10680_v59, %v10728_v17  ;;  %vm2121_vm1 = vcmp.eq.s32.totalorder %v10682_v52, %v10728_v17 }
 0x266   : > { %vm6222_vm15 = vmpackc.low %vm2057_vm0, %vm2041_vm9 }
 0x267   : > { %vm6224_vm6 = vmpackc.low %vm2090_vm14, %vm2074_vm13  ;;  %vm2137_vm13 = vcmp.eq.s32.totalorder %v10683_v61, %v10728_v17  ;;  %vm2153_vm14 = vcmp.eq.s32.totalorder %v10684_v0, %v10728_v17 }
 0x268   : > { %vm6226_vm3 = vmpackc.low %vm2089_vm2, %vm2073_vm4 }
 0x269   : > { %vm6230_vm9 = vmpackc.low %vm2121_vm1, %vm2105_vm11 }
 0x26a   : > { %2988 = vmatmul.mubr.bf16.gmra.mrb[16].mxu1 %v8580_v32  ;;  %v9314_v32 = vpop.f32.mrb[52].mxu0  ;;  %vm6234_vm4 = vmpackc.low %vm2153_vm14, %vm2137_vm13 }
 0x26b   : > { %2997 = vmatprep.mubr.bf16.mxu1 %v10672_v20  ;;  %v9316_v25 = vpop.f32.mrb[53].mxu0 }
 0x26c   : > { %3983 = vmatmul.mubr.bf16.gmra.mrb[104].mxu0 %v8658_v14  ;;  %v9321_v4 = vpop.f32.mrb[54].mxu0 }
 0x26d   : > { %3992 = vmatprep.mubr.bf16.mxu0 %v10672_v20  ;;  %v9324_v49 = vpop.f32.mrb[55].mxu0 }
 0x272   : > { %2998 = vmatmul.mubr.bf16.gmra.mrb[20].mxu1 %v8609_v30 }
 0x273   : > { %3007 = vmatprep.mubr.bf16.mxu1 %v10672_v20 }
 0x274   : > { %3993 = vmatmul.mubr.bf16.gmra.mrb[108].mxu0 %v8673_v45 }
 0x275   : > { %4002 = vmatprep.mubr.bf16.mxu0 %v10672_v20 }
 0x27a   : > { %3008 = vmatmul.mubr.bf16.gmra.mrb[24].mxu1 %v8630_v13 }
 0x27b   : > { %3017 = vmatprep.mubr.bf16.mxu1 %v10672_v20 }
 0x27c   : > { %4003 = vmatmul.mubr.bf16.gmra.mrb[112].mxu0 %v8682_v21 }
 0x27d   : > { %4012 = vmatprep.mubr.bf16.mxu0 %v10672_v20 }
 0x282   : > { %3018 = vmatmul.mubr.bf16.gmra.mrb[28].mxu1 %v8658_v14 }
 0x283   : > { %3027 = vmatprep.mubr.bf16.mxu1 %v10672_v20 }
 0x284   : > { %4013 = vmatmul.mubr.bf16.gmra.mrb[116].mxu0 %v8688_v33 }
 0x285   : > { %4248 = vmatprep.mubr.bf16.mxu0 %v10672_v20 }
 0x28a   : > { %3028 = vmatmul.mubr.bf16.gmra.mrb[32].mxu1 %v8673_v45 }
 0x28b   : > { %3037 = vmatprep.mubr.bf16.mxu1 %v10672_v20 }
 0x28c   : > { %4249 = vmatmul.mubr.bf16.vlgmr.msra.gmra.mrb[120].mxu0 %v8533_v27 }
 0x28d   : > { %4258 = vmatprep.mubr.bf16.mxu0 %v10672_v20 }
 0x292   : > { %3038 = vmatmul.mubr.bf16.gmra.mrb[36].mxu1 %v8682_v21  ;;  %v10730_v21 = vmax.f32 %v9226_v53, %v9223_v47  ;;  %v10732_v53 = vmax.f32 %v9240_v41, %v9237_v10  ;;  %v10733_v10 = vmax.f32 %v9248_v15, %v9245_v34  ;;  %v10735_v15 = vmax.f32 %v9260_v43, %v9258_v56 }
 0x293   : > { %3047 = vmatprep.mubr.bf16.mxu1 %v10672_v20 }
 0x294   : > { %4259 = vmatmul.mubr.bf16.gmra.mrb[124].mxu0 %v8548_v19 }
 0x295   : > { %4268 = vmatprep.mubr.bf16.mxu0 %v10672_v20 }
 0x29a   : > { %3048 = vmatmul.mubr.bf16.gmra.mrb[40].mxu1 %v8688_v33 }
 0x29b   : > { %3283 = vmatprep.mubr.bf16.mxu1 %v10672_v20 }
 0x29c   : > { %4269 = vmatmul.mubr.bf16.gmra.mrb[128].mxu0 %v8567_v48 }
 0x29d   : > { %4278 = vmatprep.mubr.bf16.mxu0 %v10672_v20 }
 0x29f   : > { %v3558_v33 = vpop.f32.mrb[56].mxu0 }
 0x2a0   : > { %v9378_v62 = vmax.f32 %v10729_v51, %v3558_v33  ;;  %v9380_v44 = vpop.f32.mrb[57].mxu0 }
 0x2a1   : > { %v3562_v3 = vpop.f32.mrb[58].mxu0 }
 0x2a2   : > { %3284 = vmatmul.mubr.bf16.vlgmr.msra.gmra.mrb[44].mxu1 %v8533_v27  ;;  %v9389_v45 = vmax.f32 %v10730_v21, %v3562_v3  ;;  %v9391_v14 = vpop.f32.mrb[59].mxu0  ;;  %v10731_v21 = vmax.f32 %v9232_v50, %v9230_v29 }
 0x2a3   : > { %3293 = vmatprep.mubr.bf16.mxu1 %v10672_v20  ;;  %6215 = vmatpush1.bf16.msk.msra.mxu1 %vm6214_vm10, %v10665_v54  ;;  %vm2106_vm10 = vcmp.eq.s32.totalorder %v10680_v59, %v10727_v12 }
 0x2a4   : > { %6217 = vmatprep.subr.msk.bf16.mxu1 %vm6216_vm5, %v10665_v54  ;;  %4279 = vmatmul.mubr.bf16.gmra.mrb[132].mxu0 %v8589_v26  ;;  %vm2122_vm5 = vcmp.eq.s32.totalorder %v10682_v52, %v10727_v12 }
 0x2a5   : > { %4288 = vmatprep.mubr.bf16.mxu0 %v10672_v20  ;;  %vm6228_vm7 = vmpackc.low %vm2122_vm5, %vm2106_vm10  ;;  %vm2169_vm10 = vcmp.eq.s32.totalorder %v10687_v1, %v10728_v17  ;;  %vm2185_vm5 = vcmp.eq.s32.totalorder %v10688_v63, %v10728_v17 }
 0x2a6   : > { %vm6238_vm11 = vmpackc.low %vm2185_vm5, %vm2169_vm10 }
 0x2a7   : > { %6219 = vmatpush1.bf16.msk.msra.mxu1 %vm6218_vm12, %v10665_v54  ;;  %v3568_v3 = vpop.f32.mrb[60].mxu0  ;;  %vm2138_vm12 = vcmp.eq.s32.totalorder %v10683_v61, %v10727_v12 }
 0x2a8   : > { %6221 = vmatprep.subr.msk.bf16.mxu1 %vm6220_vm8, %v10665_v54  ;;  %v9420_v33 = vmax.f32 %v10731_v21, %v3568_v3  ;;  %v9422_v40 = vpop.f32.mrb[61].mxu0  ;;  %vm2154_vm8 = vcmp.eq.s32.totalorder %v10684_v0, %v10727_v12 }
 0x2a9   : > { %v3572_v6 = vpop.f32.mrb[62].mxu0  ;;  %vm6232_vm0 = vmpackc.low %vm2154_vm8, %vm2138_vm12  ;;  %vm2201_vm12 = vcmp.eq.s32.totalorder %v10689_v8, %v10728_v17  ;;  %vm2217_vm8 = vcmp.eq.s32.totalorder %v10691_v5, %v10728_v17 }
 0x2aa   : > { %3294 = vmatmul.mubr.bf16.gmra.mrb[48].mxu1 %v8548_v19  ;;  %v9431_v51 = vmax.f32 %v10732_v53, %v3572_v6  ;;  %v9433_v27 = vpop.f32.mrb[63].mxu0  ;;  %v10734_v53 = vmax.f32 %v9254_v46, %v9252_v11 }
 0x2ab   : > { %3303 = vmatprep.mubr.bf16.mxu1 %v10672_v20  ;;  %6223 = vmatpush1.bf16.msk.msra.mxu1 %vm6222_vm15, %v10665_v54  ;;  %vm2170_vm15 = vcmp.eq.s32.totalorder %v10687_v1, %v10727_v12 }
 0x2ac   : > { %6225 = vmatprep.subr.msk.bf16.mxu1 %vm6224_vm6, %v10665_v54  ;;  %4289 = vmatmul.mubr.bf16.gmra.mrb[136].mxu0 %v8616_v35  ;;  %vm2186_vm6 = vcmp.eq.s32.totalorder %v10688_v63, %v10727_v12 }
 0x2ad   : > { %4298 = vmatprep.mubr.bf16.mxu0 %v10672_v20  ;;  %vm6236_vm2 = vmpackc.low %vm2186_vm6, %vm2170_vm15 }
 0x2af   : > { %6227 = vmatpush1.bf16.msk.msra.mxu1 %vm6226_vm3, %v10665_v54  ;;  %v3578_v50 = vpop.f32.mrb[64].mxu0  ;;  %vm2202_vm3 = vcmp.eq.s32.totalorder %v10689_v8, %v10727_v12 }
 0x2b0   : > { %6229 = vmatprep.subr.msk.bf16.mxu1 %vm6228_vm7, %v10665_v54  ;;  %v9462_v41 = vmax.f32 %v10733_v10, %v3578_v50  ;;  %v9464_v3 = vpop.f32.mrb[65].mxu0  ;;  %vm2218_vm7 = vcmp.eq.s32.totalorder %v10691_v5, %v10727_v12  ;;  %v10736_v10 = vmax.f32 %v9268_v42, %v9265_v38  ;;  %v10737_v42 = vmax.f32 %v9276_v36, %v9273_v58  ;;  %v10741_v58 = vld [vmem:[#allocation34_spill] sm:$0xff] }
 0x2b1   : > { %v3582_v21 = vpop.f32.mrb[66].mxu0  ;;  %vm6240_vm1 = vmpackc.low %vm2218_vm7, %vm2202_vm3 }
 0x2b2   : > { %3304 = vmatmul.mubr.bf16.gmra.mrb[52].mxu1 %v8567_v48  ;;  %v9473_v29 = vmax.f32 %v10734_v53, %v3582_v21  ;;  %v9475_v47 = vpop.f32.mrb[67].mxu0 }
 0x2b3   : > { %3313 = vmatprep.mubr.bf16.mxu1 %v10672_v20  ;;  %6231 = vmatpush1.bf16.msk.msra.mxu1 %vm6230_vm9, %v10665_v54  ;;  %vm6242_vm9 = vmpackc.low %vm2217_vm8, %vm2201_vm12 }
 0x2b4   : > { %6233 = vmatprep.subr.msk.bf16.mxu1 %vm6232_vm0, %v10665_v54  ;;  %4299 = vmatmul.mubr.bf16.gmra.mrb[140].mxu0 %v8638_v7 }
 0x2b5   : > { %4308 = vmatprep.mubr.bf16.mxu0 %v10672_v20 }
 0x2b7   : > { %6235 = vmatpush1.bf16.msk.msra.mxu1 %vm6234_vm4, %v10665_v54  ;;  %v3588_v12 = vpop.f32.mrb[68].mxu0 }
 0x2b8   : > { %6237 = vmatprep.subr.msk.bf16.mxu1 %vm6236_vm2, %v10665_v54  ;;  %v9500_v11 = vmax.f32 %v10735_v15, %v3588_v12  ;;  %v9502_v46 = vpop.f32.mrb[69].mxu0 }
 0x2b9   : > { %v3592_v50 = vpop.f32.mrb[70].mxu0 }
 0x2ba   : > { %3314 = vmatmul.mubr.bf16.gmra.mrb[56].mxu1 %v8589_v26  ;;  %v9511_v21 = vmax.f32 %v10736_v10, %v3592_v50  ;;  %v9513_v53 = vpop.f32.mrb[71].mxu0  ;;  %v10738_v10 = vmax.f32 %v9282_v18, %v9280_v16 }
 0x2bb   : > { %3323 = vmatprep.mubr.bf16.mxu1 %v10672_v20  ;;  %6239 = vmatpush1.bf16.msk.msra.mxu1 %vm6238_vm11, %v10665_v54 }
 0x2bc   : > { %6241 = vmatprep.subr.msk.bf16.mxu1 %vm6240_vm1, %v10665_v54  ;;  %4309 = vmatmul.mubr.bf16.gmra.mrb[144].mxu0 %v8665_v24 }
 0x2bd   : > { %4318 = vmatprep.mubr.bf16.mxu0 %v10672_v20 }
 0x2bf   : > { %6243 = vmatpush1.bf16.msk.msra.mxu1 %vm6242_vm9, %v10665_v54  ;;  %v3598_v43 = vpop.f32.mrb[72].mxu0 }
 0x2c0   : > { %v9525_v38 = vmax.f32 %v10737_v42, %v3598_v43  ;;  %v9527_v12 = vpop.f32.mrb[73].mxu0  ;;  %v10742_v43 = vmax.f32 %v9288_v31, %v10741_v58 }
 0x2c1   : > { %v3602_v15 = vpop.f32.mrb[74].mxu0 }
 0x2c2   : > { %3324 = vmatmul.mubr.bf16.gmra.mrb[60].mxu1 %v8616_v35  ;;  %v9534_v56 = vmax.f32 %v10738_v10, %v3602_v15  ;;  %v9536_v17 = vpop.f32.mrb[75].mxu0  ;;  %v10743_v10 = vld [vmem:[#allocation35_spill] sm:$0xff] }
 0x2c3   : > { %3333 = vmatprep.mubr.bf16.mxu1 %v10672_v20  ;;  %10740 = vst [vmem:[#allocation37_spill] sm:$0xff] %v9536_v17  ;;  %v10744_v34 = vmax.f32 %v9296_v37, %v10743_v10  ;;  %v10749_v10 = vmax.f32 %v9310_v2, %v9308_v55  ;;  %v10755_v2 = vmax.f32 %v9316_v25, %v9314_v32  ;;  %v10766_v32 = vld [vmem:[#allocation38_spill] sm:$0xff] }
 0x2c4   : > { %10739 = vst [vmem:[#allocation36_spill] sm:$0xff] %v9534_v56  ;;  %4319 = vmatmul.mubr.bf16.gmra.mrb[148].mxu0 %v8679_v28  ;;  %v10746_v56 = vld [vmem:[#allocation48_spill] sm:$0xff] }
 0x2c5   : > { %4328 = vmatprep.mubr.bf16.mxu0 %v10672_v20 }
 0x2c7   : > { %v3608_v36 = vpop.f32.mrb[76].mxu0 }
 0x2c8   : > { %v9547_v18 = vmax.f32 %v10742_v43, %v3608_v36  ;;  %v9549_v16 = vpop.f32.mrb[77].mxu0  ;;  %v10747_v36 = vmax.f32 %v9304_v39, %v9301_v9  ;;  %v10752_v39 = vld [vmem:[#allocation50_spill] sm:$0xff] }
 0x2c9   : > { %v3612_v42 = vpop.f32.mrb[78].mxu0 }
 0x2ca   : > { %3334 = vmatmul.mubr.bf16.gmra.mrb[64].mxu1 %v8638_v7  ;;  %v9556_v50 = vmax.f32 %v10744_v34, %v3612_v42  ;;  %v9558_v6 = vpop.f32.mrb[79].mxu0 }
 0x2cb   : > { %3343 = vmatprep.mubr.bf16.mxu1 %v10672_v20  ;;  %10745 = vst [vmem:[#allocation51_spill] sm:$0xff] %v9558_v6 }
 0x2cc   : > { %4329 = vmatmul.mubr.bf16.gmra.mrb[120].mxu0 %v10746_v56 }
 0x2cd   : > { %4338 = vmatprep.mubr.bf16.mxu0 %v10672_v20 }
 0x2cf   : > { %v3618_v31 = vpop.f32.mrb[80].mxu0 }
 0x2d0   : > { %v9569_v37 = vmax.f32 %v10747_v36, %v3618_v31  ;;  %v9571_v34 = vpop.f32.mrb[81].mxu0 }
 0x2d1   : > { %v3622_v58 = vpop.f32.mrb[82].mxu0 }
 0x2d2   : > { %3344 = vmatmul.mubr.bf16.gmra.mrb[68].mxu1 %v8665_v24  ;;  %v9580_v17 = vmax.f32 %v10749_v10, %v3622_v58  ;;  %v9582_v15 = vpop.f32.mrb[83].mxu0 }
 0x2d3   : > { %3353 = vmatprep.mubr.bf16.mxu1 %v10672_v20  ;;  %10750 = vst [vmem:[#allocation52_spill] sm:$0xff] %v9582_v15 }
 0x2d4   : > { %4339 = vmatmul.mubr.bf16.gmra.mrb[124].mxu0 %v10752_v39 }
 0x2d5   : > { %v9573_v43 = vpop.f32.mrb[4].mxu1  ;;  %4348 = vmatprep.mubr.bf16.mxu0 %v10672_v20 }
 0x2d6   : > { %10748 = vst [vmem:[#allocation60_spill] sm:$0xff] %v9573_v43  ;;  %v9584_v6 = vpop.f32.mrb[5].mxu1 }
 0x2d7   : > { %10751 = vst [vmem:[#allocation53_spill] sm:$0xff] %v9584_v6  ;;  %v3628_v55 = vpop.f32.mrb[84].mxu0  ;;  %v10758_v6 = vmax.f32 %v9324_v49, %v9321_v4  ;;  %v10761_v4 = vld [vmem:[#allocation64_spill] sm:$0xff]  ;;  %v10762_v49 = vld [vmem:[#allocation57_spill] sm:$0xff] }
 0x2d8   : > { %v9599_v58 = vmax.f32 %v10755_v2, %v3628_v55  ;;  %v9601_v10 = vpop.f32.mrb[85].mxu0  ;;  %v10765_v2 = vld [vmem:[#allocation11_spill] sm:$0xff] }
 0x2d9   : > { %v9589_v31 = vpop.f32.mrb[6].mxu1  ;;  %v3632_v42 = vpop.f32.mrb[86].mxu0 }
 0x2da   : > { %10753 = vst [vmem:[#allocation17_spill] sm:$0xff] %v9589_v31  ;;  %v9592_v36 = vpop.f32.mrb[7].mxu1  ;;  %3354 = vmatmul.mubr.bf16.gmra.mrb[72].mxu1 %v8679_v28  ;;  %v9612_v43 = vmax.f32 %v10758_v6, %v3632_v42  ;;  %v9614_v15 = vpop.f32.mrb[87].mxu0  ;;  %v10763_v6 = vld [vmem:[#allocation61_spill] sm:$0xff]  ;;  %v10764_v42 = vld [vmem:[#allocation23_spill] sm:$0xff] }
 0x2db   : > { %10754 = vst [vmem:[#allocation16_spill] sm:$0xff] %v9592_v36  ;;  %3363 = vmatprep.mubr.bf16.mxu1 %v10672_v20  ;;  %vm1982_vm0 = vcmp.eq.s32.totalorder %v10765_v2, %v10764_v42  ;;  %vm1998_vm13 = vcmp.eq.s32.totalorder %v10766_v32, %v10764_v42  ;;  %v10767_v36 = vld [vmem:[#allocation65_spill] sm:$0xff]  ;;  %vm2046_vm11 = vcmp.eq.s32.totalorder %v10670_v22, %v10764_v42 }
 0x2dc   : > { %4349 = vmatmul.mubr.bf16.gmra.mrb[128].mxu0 %v8609_v30  ;;  %vm6276_vm14 = vmpackc.low %vm1998_vm13, %vm1982_vm0  ;;  %vm2062_vm1 = vcmp.eq.s32.totalorder %v10671_v23, %v10764_v42  ;;  %vm2078_vm13 = vcmp.eq.s32.totalorder %v10674_v60, %v10764_v42 }
 0x2dd   : > { %v9603_v9 = vpop.f32.mrb[8].mxu1  ;;  %4358 = vmatprep.mubr.bf16.mxu0 %v10672_v20  ;;  %6277 = vmatprep.subr.msk.bf16.mxu1 %vm6276_vm14, %v10665_v54  ;;  %vm6284_vm8 = vmpackc.low %vm2062_vm1, %vm2046_vm11  ;;  %vm2094_vm14 = vcmp.eq.s32.totalorder %v10676_v57, %v10764_v42 }
 0x2de   : > { %10756 = vst [vmem:[#allocation41_spill] sm:$0xff] %v9603_v9  ;;  %v9605_v31 = vpop.f32.mrb[9].mxu1  ;;  %v10770_v9 = vld [vmem:[#allocation40_spill] sm:$0xff] }
 0x2df   : > { %10757 = vst [vmem:[#allocation42_spill] sm:$0xff] %v9605_v31  ;;  %vm2030_vm2 = vcmp.eq.s32.totalorder %v10770_v9, %v10764_v42  ;;  %v10771_v31 = vld [vmem:[#allocation49_spill] sm:$0xff] }
 0x2e1   : > { %v9619_v25 = vpop.f32.mrb[10].mxu1 }
 0x2e2   : > { %10759 = vst [vmem:[#allocation43_spill] sm:$0xff] %v9619_v25  ;;  %v9622_v55 = vpop.f32.mrb[11].mxu1  ;;  %3364 = vmatmul.mubr.bf16.gmra.mrb[44].mxu1 %v10746_v56  ;;  %v10768_v25 = vld [vmem:[#allocation22_spill] sm:$0xff] }
 0x2e3   : > { %10760 = vst [vmem:[#allocation44_spill] sm:$0xff] %v9622_v55  ;;  %3373 = vmatprep.mubr.bf16.mxu1 %v10672_v20  ;;  %vm1981_vm15 = vcmp.eq.s32.totalorder %v10765_v2, %v10768_v25  ;;  %vm1997_vm6 = vcmp.eq.s32.totalorder %v10766_v32, %v10768_v25  ;;  %v10769_v55 = vld [vmem:[#allocation39_spill] sm:$0xff]  ;;  %vm2029_vm7 = vcmp.eq.s32.totalorder %v10770_v9, %v10768_v25 }
 0x2e4   : > { %4359 = vmatmul.mubr.bf16.gmra.mrb[132].mxu0 %v8630_v13  ;;  %vm2014_vm4 = vcmp.eq.s32.totalorder %v10769_v55, %v10764_v42  ;;  %vm6278_vm10 = vmpackc.low %vm1997_vm6, %vm1981_vm15  ;;  %vm2013_vm3 = vcmp.eq.s32.totalorder %v10769_v55, %v10768_v25  ;;  %vm2045_vm9 = vcmp.eq.s32.totalorder %v10670_v22, %v10768_v25  ;;  %vm2061_vm0 = vcmp.eq.s32.totalorder %v10671_v23, %v10768_v25 }
 0x2e5   : > { %4368 = vmatprep.mubr.bf16.mxu0 %v10672_v20  ;;  %vm6280_vm5 = vmpackc.low %vm2030_vm2, %vm2014_vm4  ;;  %vm2077_vm4 = vcmp.eq.s32.totalorder %v10674_v60, %v10768_v25  ;;  %vm2093_vm2 = vcmp.eq.s32.totalorder %v10676_v57, %v10768_v25  ;;  %vm2109_vm11 = vcmp.eq.s32.totalorder %v10680_v59, %v10768_v25  ;;  %vm2125_vm1 = vcmp.eq.s32.totalorder %v10682_v52, %v10768_v25 }
 0x2e6   : > { %vm6282_vm12 = vmpackc.low %vm2029_vm7, %vm2013_vm3 }
 0x2e7   : > { %vm6286_vm15 = vmpackc.low %vm2061_vm0, %vm2045_vm9 }
 0x2e8   : > { %vm6288_vm6 = vmpackc.low %vm2094_vm14, %vm2078_vm13  ;;  %vm2141_vm13 = vcmp.eq.s32.totalorder %v10683_v61, %v10768_v25  ;;  %vm2157_vm14 = vcmp.eq.s32.totalorder %v10684_v0, %v10768_v25 }
 0x2e9   : > { %vm6290_vm3 = vmpackc.low %vm2093_vm2, %vm2077_vm4 }
 0x2ea   : > { %3374 = vmatmul.mubr.bf16.gmra.mrb[48].mxu1 %v10752_v39  ;;  %vm6294_vm9 = vmpackc.low %vm2125_vm1, %vm2109_vm11 }
 0x2eb   : > { %3383 = vmatprep.mubr.bf16.mxu1 %v10672_v20  ;;  %vm6298_vm4 = vmpackc.low %vm2157_vm14, %vm2141_vm13 }
 0x2ec   : > { %4369 = vmatmul.mubr.bf16.gmra.mrb[136].mxu0 %v10761_v4 }
 0x2ed   : > { %4378 = vmatprep.mubr.bf16.mxu0 %v10672_v20 }
 0x2f2   : > { %3384 = vmatmul.mubr.bf16.gmra.mrb[52].mxu1 %v8609_v30 }
 0x2f3   : > { %3393 = vmatprep.mubr.bf16.mxu1 %v10672_v20 }
 0x2f4   : > { %4379 = vmatmul.mubr.bf16.gmra.mrb[140].mxu0 %v10762_v49 }
 0x2f5   : > { %4388 = vmatprep.mubr.bf16.mxu0 %v10672_v20 }
 0x2fa   : > { %3394 = vmatmul.mubr.bf16.gmra.mrb[56].mxu1 %v8630_v13 }
 0x2fb   : > { %3403 = vmatprep.mubr.bf16.mxu1 %v10672_v20 }
 0x2fc   : > { %4389 = vmatmul.mubr.bf16.gmra.mrb[144].mxu0 %v10763_v6 }
 0x2fd   : > { %4398 = vmatprep.mubr.bf16.mxu0 %v10672_v20 }
 0x302   : > { %3404 = vmatmul.mubr.bf16.gmra.mrb[60].mxu1 %v10761_v4 }
 0x303   : > { %3413 = vmatprep.mubr.bf16.mxu1 %v10672_v20 }
 0x304   : > { %4399 = vmatmul.mubr.bf16.gmra.mrb[148].mxu0 %v10767_v36 }
 0x30a   : > { %3414 = vmatmul.mubr.bf16.gmra.mrb[64].mxu1 %v10762_v49 }
 0x30b   : > { %3423 = vmatprep.mubr.bf16.mxu1 %v10672_v20 }
 0x312   : > { %3424 = vmatmul.mubr.bf16.gmra.mrb[68].mxu1 %v10763_v6 }
 0x313   : > { %3433 = vmatprep.mubr.bf16.mxu1 %v10672_v20 }
 0x31a   : > { %3434 = vmatmul.mubr.bf16.gmra.mrb[72].mxu1 %v10767_v36 }
 0x31b   : > { %3669 = vmatprep.mubr.bf16.mxu1 %v10672_v20 }
 0x31f   : > { %v9672_v32 = vpop.f32.mrb[88].mxu0 }
 0x320   : > { %v9675_v2 = vpop.f32.mrb[89].mxu0 }
 0x321   : > { %v9678_v9 = vpop.f32.mrb[90].mxu0 }
 0x322   : > { %3670 = vmatmul.mubr.bf16.vlgmr.msra.gmra.mrb[76].mxu1 %v10771_v31  ;;  %v9684_v55 = vpop.f32.mrb[91].mxu0 }
 0x323   : > { %3679 = vmatprep.mubr.bf16.mxu1 %v10672_v20  ;;  %6279 = vmatpush1.bf16.msk.msra.mxu1 %vm6278_vm10, %v10665_v54  ;;  %vm2110_vm10 = vcmp.eq.s32.totalorder %v10680_v59, %v10764_v42 }
 0x324   : > { %6281 = vmatprep.subr.msk.bf16.mxu1 %vm6280_vm5, %v10665_v54  ;;  %vm2126_vm5 = vcmp.eq.s32.totalorder %v10682_v52, %v10764_v42 }
 0x325   : > { %vm6292_vm7 = vmpackc.low %vm2126_vm5, %vm2110_vm10  ;;  %vm2173_vm10 = vcmp.eq.s32.totalorder %v10687_v1, %v10768_v25  ;;  %vm2189_vm5 = vcmp.eq.s32.totalorder %v10688_v63, %v10768_v25 }
 0x326   : > { %vm6302_vm11 = vmpackc.low %vm2189_vm5, %vm2173_vm10 }
 0x327   : > { %6283 = vmatpush1.bf16.msk.msra.mxu1 %vm6282_vm12, %v10665_v54  ;;  %v9702_v22 = vpop.f32.mrb[92].mxu0  ;;  %vm2142_vm12 = vcmp.eq.s32.totalorder %v10683_v61, %v10764_v42 }
 0x328   : > { %6285 = vmatprep.subr.msk.bf16.mxu1 %vm6284_vm8, %v10665_v54  ;;  %v9705_v23 = vpop.f32.mrb[93].mxu0  ;;  %vm2158_vm8 = vcmp.eq.s32.totalorder %v10684_v0, %v10764_v42 }
 0x329   : > { %v9708_v60 = vpop.f32.mrb[94].mxu0  ;;  %vm6296_vm0 = vmpackc.low %vm2158_vm8, %vm2142_vm12  ;;  %vm2205_vm12 = vcmp.eq.s32.totalorder %v10689_v8, %v10768_v25  ;;  %vm2221_vm8 = vcmp.eq.s32.totalorder %v10691_v5, %v10768_v25 }
 0x32a   : > { %3680 = vmatmul.mubr.bf16.gmra.mrb[80].mxu1 %v8548_v19  ;;  %v9714_v57 = vpop.f32.mrb[95].mxu0 }
 0x32b   : > { %3689 = vmatprep.mubr.bf16.mxu1 %v10672_v20  ;;  %6287 = vmatpush1.bf16.msk.msra.mxu1 %vm6286_vm15, %v10665_v54  ;;  %vm2174_vm15 = vcmp.eq.s32.totalorder %v10687_v1, %v10764_v42  ;;  %v10772_v1 = vmax.f32 %v9378_v62, %v9380_v44 }
 0x32c   : > { %6289 = vmatprep.subr.msk.bf16.mxu1 %vm6288_vm6, %v10665_v54  ;;  %vm2190_vm6 = vcmp.eq.s32.totalorder %v10688_v63, %v10764_v42 }
 0x32d   : > { %vm6300_vm2 = vmpackc.low %vm2190_vm6, %vm2174_vm15 }
 0x32f   : > { %6291 = vmatpush1.bf16.msk.msra.mxu1 %vm6290_vm3, %v10665_v54  ;;  %v9732_v59 = vpop.f32.mrb[96].mxu0  ;;  %vm2206_vm3 = vcmp.eq.s32.totalorder %v10689_v8, %v10764_v42 }
 0x330   : > { %6293 = vmatprep.subr.msk.bf16.mxu1 %vm6292_vm7, %v10665_v54  ;;  %v9735_v52 = vpop.f32.mrb[97].mxu0  ;;  %vm2222_vm7 = vcmp.eq.s32.totalorder %v10691_v5, %v10764_v42 }
 0x331   : > { %v9738_v0 = vpop.f32.mrb[98].mxu0  ;;  %vm6304_vm1 = vmpackc.low %vm2222_vm7, %vm2206_vm3 }
 0x332   : > { %3690 = vmatmul.mubr.bf16.gmra.mrb[84].mxu1 %v8567_v48  ;;  %v9744_v19 = vpop.f32.mrb[99].mxu0 }
 0x333   : > { %3699 = vmatprep.mubr.bf16.mxu1 %v10672_v20  ;;  %6295 = vmatpush1.bf16.msk.msra.mxu1 %vm6294_vm9, %v10665_v54  ;;  %vm6306_vm9 = vmpackc.low %vm2221_vm8, %vm2205_vm12 }
 0x334   : > { %6297 = vmatprep.subr.msk.bf16.mxu1 %vm6296_vm0, %v10665_v54  ;;  %vm10798_vm0 = vcmask 523264  }
 0x335   : > { %v2979_v61 = vpop.f32.mrb[12].mxu1  ;;  %vm10815_vm13 = vmmov %vm10798_vm0 }
 0x336   : > { %v2981_v48 = vpop.f32.mrb[13].mxu1  ;;  %vm10816_vm14 = vmmov %vm10798_vm0 }
 0x337   : > { %v4665_v31 = vmax.f32 %v2979_v61, %v2981_v48  ;;  %v2983_v36 = vpop.f32.mrb[14].mxu1  ;;  %6299 = vmatpush1.bf16.msk.msra.mxu1 %vm6298_vm4, %v10665_v54  ;;  %v10773_v48 = vmax.f32 %v9389_v45, %v9391_v14  ;;  %v3974_v62 = vpop.f32.mrb[100].mxu0  ;;  %vm10817_vm15 = vmmov %vm10798_vm0 }
 0x338   : > { %v2985_v6 = vpop.f32.mrb[15].mxu1  ;;  %6301 = vmatprep.subr.msk.bf16.mxu1 %vm6300_vm2, %v10665_v54  ;;  %v3976_v44 = vpop.f32.mrb[101].mxu0  ;;  %vm10818_vm6 = vmmov %vm10798_vm0 }
 0x339   : > { %v4729_v63 = vmax.f32 %v10772_v1, %v4665_v31  ;;  %v4666_v49 = vmax.f32 %v2983_v36, %v2985_v6  ;;  %v3978_v36 = vpop.f32.mrb[102].mxu0  ;;  %v10774_v1 = vmax.f32 %v9420_v33, %v9422_v40  ;;  %vm10819_vm4 = vmmov %vm10798_vm0 }
 0x33a   : > { %3700 = vmatmul.mubr.bf16.gmra.mrb[88].mxu1 %v8589_v26  ;;  %v3980_v45 = vpop.f32.mrb[103].mxu0  ;;  %vm10820_vm2 = vmmov %vm10798_vm0 }
 0x33b   : > { %v4730_v42 = vmax.f32 %v10773_v48, %v4666_v49  ;;  %3709 = vmatprep.mubr.bf16.mxu1 %v10672_v20  ;;  %v4745_v61 = vmax.f32 %v4729_v63, %v9672_v32  ;;  %6303 = vmatpush1.bf16.msk.msra.mxu1 %vm6302_vm11, %v10665_v54  ;;  %vm10821_vm10 = vmmov %vm10798_vm0 }
 0x33c   : > { %6305 = vmatprep.subr.msk.bf16.mxu1 %vm6304_vm1, %v10665_v54  ;;  %vm10822_vm5 = vmmov %vm10798_vm0 }
 0x33d   : > { %v2989_v8 = vpop.f32.mrb[16].mxu1  ;;  %v9768_v5 = vmax.f32 %v4745_v61, %v9675_v2  ;;  %v4746_v31 = vmax.f32 %v4730_v42, %v9678_v9  ;;  %v10775_v2 = vmax.f32 %v9431_v51, %v9433_v27  ;;  %vm10823_vm3 = vmmov %vm10798_vm0 }
 0x33e   : > { %v2991_v14 = vpop.f32.mrb[17].mxu1  ;;  %vm10824_vm7 = vmmov %vm10798_vm0 }
 0x33f   : > { %v4667_v25 = vmax.f32 %v2989_v8, %v2991_v14  ;;  %v2993_v49 = vpop.f32.mrb[18].mxu1  ;;  %v9772_v6 = vmax.f32 %v4746_v31, %v9684_v55  ;;  %6307 = vmatpush1.bf16.msk.msra.mxu1 %vm6306_vm9, %v10665_v54  ;;  %v3984_v55 = vpop.f32.mrb[104].mxu0  ;;  %vm10825_vm11 = vmmov %vm10798_vm0 }
 0x340   : > { %v2995_v32 = vpop.f32.mrb[19].mxu1  ;;  %v3986_v61 = vpop.f32.mrb[105].mxu0  ;;  %vm10826_vm1 = vmmov %vm10798_vm0 }
 0x341   : > { %v4731_v63 = vmax.f32 %v10774_v1, %v4667_v25  ;;  %v4668_v48 = vmax.f32 %v2993_v49, %v2995_v32  ;;  %v3988_v40 = vpop.f32.mrb[106].mxu0  ;;  %vm10827_vm12 = vmmov %vm10798_vm0 }
 0x342   : > { %3710 = vmatmul.mubr.bf16.gmra.mrb[92].mxu1 %v8616_v35  ;;  %v3990_v14 = vpop.f32.mrb[107].mxu0  ;;  %vm10828_vm8 = vmmov %vm10798_vm0 }
 0x343   : > { %v4732_v9 = vmax.f32 %v10775_v2, %v4668_v48  ;;  %3719 = vmatprep.mubr.bf16.mxu1 %v10672_v20  ;;  %v4747_v42 = vmax.f32 %v4731_v63, %v9702_v22  ;;  %v10776_v22 = vmax.f32 %v9462_v41, %v9464_v3  ;;  %vm10829_vm9 = vmmov %vm10798_vm0 }
 0x345   : > { %v2999_v8 = vpop.f32.mrb[20].mxu1  ;;  %v9785_v54 = vmax.f32 %v4747_v42, %v9705_v23  ;;  %v4748_v33 = vmax.f32 %v4732_v9, %v9708_v60  ;;  %v10777_v23 = vmax.f32 %v9473_v29, %v9475_v47 }
 0x346   : > { %v3001_v31 = vpop.f32.mrb[21].mxu1 }
 0x347   : > { %v4669_v25 = vmax.f32 %v2999_v8, %v3001_v31  ;;  %v3003_v49 = vpop.f32.mrb[22].mxu1  ;;  %v9789_v27 = vmax.f32 %v4748_v33, %v9714_v57  ;;  %v3994_v48 = vpop.f32.mrb[108].mxu0 }
 0x348   : > { %v3005_v51 = vpop.f32.mrb[23].mxu1  ;;  %v3996_v2 = vpop.f32.mrb[109].mxu0 }
 0x349   : > { %v4733_v32 = vmax.f32 %v10776_v22, %v4669_v25  ;;  %v4670_v1 = vmax.f32 %v3003_v49, %v3005_v51  ;;  %v3998_v3 = vpop.f32.mrb[110].mxu0 }
 0x34a   : > { %3720 = vmatmul.mubr.bf16.gmra.mrb[96].mxu1 %v8638_v7  ;;  %v4000_v8 = vpop.f32.mrb[111].mxu0 }
 0x34b   : > { %v4734_v60 = vmax.f32 %v10777_v23, %v4670_v1  ;;  %3729 = vmatprep.mubr.bf16.mxu1 %v10672_v20  ;;  %v4749_v63 = vmax.f32 %v4733_v32, %v9732_v59  ;;  %v10778_v59 = vmax.f32 %v9500_v11, %v9502_v46 }
 0x34d   : > { %v3009_v57 = vpop.f32.mrb[24].mxu1  ;;  %v9801_v9 = vmax.f32 %v4749_v63, %v9735_v52  ;;  %v4750_v41 = vmax.f32 %v4734_v60, %v9738_v0  ;;  %v10779_v52 = vmax.f32 %v9511_v21, %v9513_v53  ;;  %v10780_v21 = vmax.f32 %v9525_v38, %v9527_v12 }
 0x34e   : > { %v3011_v42 = vpop.f32.mrb[25].mxu1 }
 0x34f   : > { %v4671_v33 = vmax.f32 %v3009_v57, %v3011_v42  ;;  %v3013_v31 = vpop.f32.mrb[26].mxu1  ;;  %v9805_v47 = vmax.f32 %v4750_v41, %v9744_v19  ;;  %v4004_v22 = vpop.f32.mrb[112].mxu0 }
 0x350   : > { %v3015_v29 = vpop.f32.mrb[27].mxu1  ;;  %v4006_v32 = vpop.f32.mrb[113].mxu0 }
 0x351   : > { %v4735_v25 = vmax.f32 %v10778_v59, %v4671_v33  ;;  %v4672_v49 = vmax.f32 %v3013_v31, %v3015_v29  ;;  %v4008_v60 = vpop.f32.mrb[114].mxu0  ;;  %v10782_v31 = vld [vmem:[#allocation37_spill] sm:$0xff] }
 0x352   : > { %3730 = vmatmul.mubr.bf16.gmra.mrb[100].mxu1 %v8665_v24  ;;  %v4010_v11 = vpop.f32.mrb[115].mxu0 }
 0x353   : > { %v4736_v0 = vmax.f32 %v10779_v52, %v4672_v49  ;;  %3739 = vmatprep.mubr.bf16.mxu1 %v10672_v20  ;;  %v4751_v51 = vmax.f32 %v4735_v25, %v3974_v62  ;;  %v10781_v62 = vld [vmem:[#allocation36_spill] sm:$0xff] }
 0x355   : > { %v3019_v1 = vpop.f32.mrb[28].mxu1  ;;  %v9815_v19 = vmax.f32 %v4751_v51, %v3976_v44  ;;  %v4752_v23 = vmax.f32 %v4736_v0, %v3978_v36  ;;  %v10783_v44 = vmax.f32 %v10781_v62, %v10782_v31 }
 0x356   : > { %v3021_v63 = vpop.f32.mrb[29].mxu1 }
 0x357   : > { %v4673_v46 = vmax.f32 %v3019_v1, %v3021_v63  ;;  %v3023_v57 = vpop.f32.mrb[30].mxu1  ;;  %v9817_v41 = vmax.f32 %v4752_v23, %v3980_v45  ;;  %v4014_v59 = vpop.f32.mrb[116].mxu0 }
 0x358   : > { %v3025_v42 = vpop.f32.mrb[31].mxu1  ;;  %v4016_v25 = vpop.f32.mrb[117].mxu0 }
 0x359   : > { %v4737_v53 = vmax.f32 %v10780_v21, %v4673_v46  ;;  %v4674_v33 = vmax.f32 %v3023_v57, %v3025_v42  ;;  %v4018_v0 = vpop.f32.mrb[118].mxu0  ;;  %v10784_v46 = vmax.f32 %v9547_v18, %v9549_v16  ;;  %v10787_v16 = vmax.f32 %v9569_v37, %v9571_v34 }
 0x35a   : > { %3740 = vmatmul.mubr.bf16.gmra.mrb[104].mxu1 %v8679_v28  ;;  %v4020_v38 = vpop.f32.mrb[119].mxu0  ;;  %v10790_v34 = vmax.f32 %v9599_v58, %v9601_v10  ;;  %v10792_v58 = vld [vmem:[#allocation57_spill] sm:$0xff] }
 0x35b   : > { %v4738_v29 = vmax.f32 %v10783_v44, %v4674_v33  ;;  %3749 = vmatprep.mubr.bf16.mxu1 %v10672_v20  ;;  %v4753_v36 = vmax.f32 %v4737_v53, %v3984_v55  ;;  %v10785_v55 = vld [vmem:[#allocation51_spill] sm:$0xff]  ;;  %v10795_v10 = vld [vmem:[#allocation49_spill] sm:$0xff] }
 0x35d   : > { %v3029_v49 = vpop.f32.mrb[32].mxu1  ;;  %v9827_v45 = vmax.f32 %v4753_v36, %v3986_v61  ;;  %v4754_v52 = vmax.f32 %v4738_v29, %v3988_v40  ;;  %v10786_v61 = vmax.f32 %v9556_v50, %v10785_v55  ;;  %v10788_v50 = vld [vmem:[#allocation52_spill] sm:$0xff] }
 0x35e   : > { %v3031_v51 = vpop.f32.mrb[33].mxu1 }
 0x35f   : > { %v4675_v12 = vmax.f32 %v3029_v49, %v3031_v51  ;;  %v3033_v1 = vpop.f32.mrb[34].mxu1  ;;  %v9829_v23 = vmax.f32 %v4754_v52, %v3990_v14 }
 0x360   : > { %v3035_v63 = vpop.f32.mrb[35].mxu1 }
 0x361   : > { %v4739_v57 = vmax.f32 %v10784_v46, %v4675_v12  ;;  %v4676_v42 = vmax.f32 %v3033_v1, %v3035_v63 }
 0x362   : > { %3750 = vmatmul.mubr.bf16.gmra.mrb[76].mxu1 %v10746_v56 }
 0x363   : > { %v4740_v21 = vmax.f32 %v10786_v61, %v4676_v42  ;;  %3759 = vmatprep.mubr.bf16.mxu1 %v10672_v20  ;;  %v4755_v40 = vmax.f32 %v4739_v57, %v3994_v48  ;;  %v10789_v48 = vmax.f32 %v9580_v17, %v10788_v50  ;;  %v10791_v17 = vmax.f32 %v9612_v43, %v9614_v15  ;;  %v10793_v15 = vld [vmem:[#allocation61_spill] sm:$0xff]  ;;  %v10796_v61 = vld [vmem:[#allocation47_spill] sm:$0xff] }
 0x364   : > { %v10794_v43 = vld [vmem:[#allocation65_spill] sm:$0xff] }
 0x365   : > { %v3039_v53 = vpop.f32.mrb[36].mxu1  ;;  %v9839_v33 = vmax.f32 %v4755_v40, %v3996_v2  ;;  %v4756_v14 = vmax.f32 %v4740_v21, %v3998_v3 }
 0x366   : > { %v3041_v62 = vpop.f32.mrb[37].mxu1 }
 0x367   : > { %v4677_v31 = vmax.f32 %v3039_v53, %v3041_v62  ;;  %v3043_v44 = vpop.f32.mrb[38].mxu1  ;;  %v9841_v29 = vmax.f32 %v4756_v14, %v4000_v8  ;;  %v10797_v62 = vld [vmem:[#allocation56_spill] sm:$0xff] }
 0x368   : > { %v3045_v18 = vpop.f32.mrb[39].mxu1 }
 0x369   : > { %v4741_v36 = vmax.f32 %v10787_v16, %v4677_v31  ;;  %v4678_v49 = vmax.f32 %v3043_v44, %v3045_v18 }
 0x36a   : > { %3760 = vmatmul.mubr.bf16.gmra.mrb[80].mxu1 %v10752_v39 }
 0x36b   : > { %v4742_v52 = vmax.f32 %v10789_v48, %v4678_v49  ;;  %3769 = vmatprep.mubr.bf16.mxu1 %v10672_v20  ;;  %v4757_v2 = vmax.f32 %v4741_v36, %v4004_v22 }
 0x36d   : > { %v3049_v3 = vpop.f32.mrb[40].mxu1  ;;  %v9851_v51 = vmax.f32 %v4757_v2, %v4006_v32  ;;  %v4758_v8 = vmax.f32 %v4742_v52, %v4008_v60 }
 0x36e   : > { %v3051_v12 = vpop.f32.mrb[41].mxu1 }
 0x36f   : > { %v4679_v1 = vmax.f32 %v3049_v3, %v3051_v12  ;;  %v3053_v63 = vpop.f32.mrb[42].mxu1  ;;  %v9853_v46 = vmax.f32 %v4758_v8, %v4010_v11 }
 0x370   : > { %v3055_v37 = vpop.f32.mrb[43].mxu1 }
 0x371   : > { %v4743_v57 = vmax.f32 %v10790_v34, %v4679_v1  ;;  %v4680_v42 = vmax.f32 %v3053_v63, %v3055_v37 }
 0x372   : > { %3770 = vmatmul.mubr.bf16.gmra.mrb[84].mxu1 %v8609_v30 }
 0x373   : > { %v4744_v22 = vmax.f32 %v10791_v17, %v4680_v42  ;;  %3779 = vmatprep.mubr.bf16.mxu1 %v10672_v20  ;;  %v4759_v32 = vmax.f32 %v4743_v57, %v4014_v59 }
 0x375   : > { %v9863_v60 = vmax.f32 %v4759_v32, %v4016_v25  ;;  %v4760_v55 = vmax.f32 %v4744_v22, %v4018_v0 }
 0x377   : > { %v9865_v11 = vmax.f32 %v4760_v55, %v4020_v38 }
 0x37a   : > { %3780 = vmatmul.mubr.bf16.gmra.mrb[88].mxu1 %v8630_v13 }
 0x37b   : > { %3789 = vmatprep.mubr.bf16.mxu1 %v10672_v20 }
 0x382   : > { %3790 = vmatmul.mubr.bf16.gmra.mrb[92].mxu1 %v10761_v4 }
 0x383   : > { %3799 = vmatprep.mubr.bf16.mxu1 %v10672_v20 }
 0x38a   : > { %3800 = vmatmul.mubr.bf16.gmra.mrb[96].mxu1 %v10792_v58 }
 0x38b   : > { %3809 = vmatprep.mubr.bf16.mxu1 %v10672_v20 }
 0x392   : > { %3810 = vmatmul.mubr.bf16.gmra.mrb[100].mxu1 %v10793_v15 }
 0x393   : > { %3819 = vmatprep.mubr.bf16.mxu1 %v10672_v20 }
 0x39a   : > { %3820 = vmatmul.mubr.bf16.gmra.mrb[104].mxu1 %v10794_v43 }
 0x39b   : > { %4055 = vmatprep.mubr.bf16.mxu1 %v10672_v20 }
 0x39f   : > { %v4330_v59 = vpop.f32.mrb[120].mxu0 }
 0x3a0   : > { %v4332_v25 = vpop.f32.mrb[121].mxu0 }
 0x3a1   : > { %v4334_v0 = vpop.f32.mrb[122].mxu0 }
 0x3a2   : > { %4056 = vmatmul.mubr.bf16.vlgmr.msra.gmra.mrb[108].mxu1 %v10795_v10  ;;  %v4336_v38 = vpop.f32.mrb[123].mxu0 }
 0x3a3   : > { %4065 = vmatprep.mubr.bf16.mxu1 %v10672_v20 }
 0x3a7   : > { %v4340_v21 = vpop.f32.mrb[124].mxu0 }
 0x3a8   : > { %v4342_v40 = vpop.f32.mrb[125].mxu0 }
 0x3a9   : > { %v4344_v53 = vpop.f32.mrb[126].mxu0 }
 0x3aa   : > { %4066 = vmatmul.mubr.bf16.gmra.mrb[112].mxu1 %v10796_v61  ;;  %v4346_v14 = vpop.f32.mrb[127].mxu0 }
 0x3ab   : > { %4075 = vmatprep.mubr.bf16.mxu1 %v10672_v20 }
 0x3af   : > { %v4350_v31 = vpop.f32.mrb[128].mxu0 }
 0x3b0   : > { %v4352_v44 = vpop.f32.mrb[129].mxu0 }
 0x3b1   : > { %v4354_v16 = vpop.f32.mrb[130].mxu0 }
 0x3b2   : > { %4076 = vmatmul.mubr.bf16.gmra.mrb[116].mxu1 %v10797_v62  ;;  %v4356_v50 = vpop.f32.mrb[131].mxu0 }
 0x3b3   : > { %4085 = vmatprep.mubr.bf16.mxu1 %v10672_v20 }
 0x3b5   : > { %v3365_v18 = vpop.f32.mrb[44].mxu1 }
 0x3b6   : > { %v4777_v36 = vmax.f32 %v9768_v5, %v3365_v18  ;;  %v3367_v49 = vpop.f32.mrb[45].mxu1 }
 0x3b7   : > { %v3369_v48 = vpop.f32.mrb[46].mxu1  ;;  %v4360_v1 = vpop.f32.mrb[132].mxu0 }
 0x3b8   : > { %v4793_v52 = vmax.f32 %v4777_v36, %v3367_v49  ;;  %v4778_v2 = vmax.f32 %v9772_v6, %v3369_v48  ;;  %v3371_v3 = vpop.f32.mrb[47].mxu1  ;;  %v4362_v34 = vpop.f32.mrb[133].mxu0 }
 0x3b9   : > { %v4364_v5 = vpop.f32.mrb[134].mxu0 }
 0x3ba   : > { %v4794_v8 = vmax.f32 %v4778_v2, %v3371_v3  ;;  %4086 = vmatmul.mubr.bf16.gmra.mrb[120].mxu1 %v8589_v26  ;;  %v4809_v12 = vmax.f32 %v4793_v52, %v4330_v59  ;;  %v4366_v6 = vpop.f32.mrb[135].mxu0 }
 0x3bb   : > { %4095 = vmatprep.mubr.bf16.mxu1 %v10672_v20 }
 0x3bc   : > { %v9887_v63 = vmax.f32 %v4809_v12, %v4332_v25  ;;  %v4810_v37 = vmax.f32 %v4794_v8, %v4334_v0 }
 0x3bd   : > { %v3375_v57 = vpop.f32.mrb[48].mxu1 }
 0x3be   : > { %v4779_v42 = vmax.f32 %v9785_v54, %v3375_v57  ;;  %v3377_v17 = vpop.f32.mrb[49].mxu1  ;;  %v9890_v22 = vmax.f32 %v4810_v37, %v4336_v38 }
 0x3bf   : > { %v3379_v32 = vpop.f32.mrb[50].mxu1  ;;  %v4370_v0 = vpop.f32.mrb[136].mxu0 }
 0x3c0   : > { %v4795_v55 = vmax.f32 %v4779_v42, %v3377_v17  ;;  %v4780_v26 = vmax.f32 %v9789_v27, %v3379_v32  ;;  %v3381_v10 = vpop.f32.mrb[51].mxu1  ;;  %v4372_v54 = vpop.f32.mrb[137].mxu0 }
 0x3c1   : > { %v4374_v38 = vpop.f32.mrb[138].mxu0 }
 0x3c2   : > { %v4796_v59 = vmax.f32 %v4780_v26, %v3381_v10  ;;  %4096 = vmatmul.mubr.bf16.gmra.mrb[124].mxu1 %v8616_v35  ;;  %v4811_v25 = vmax.f32 %v4795_v55, %v4340_v21  ;;  %v4376_v27 = vpop.f32.mrb[139].mxu0 }
 0x3c3   : > { %4105 = vmatprep.mubr.bf16.mxu1 %v10672_v20 }
 0x3c4   : > { %v9895_v61 = vmax.f32 %v4811_v25, %v4342_v40  ;;  %v4812_v62 = vmax.f32 %v4796_v59, %v4344_v53 }
 0x3c5   : > { %v3385_v18 = vpop.f32.mrb[52].mxu1 }
 0x3c6   : > { %v4781_v36 = vmax.f32 %v9801_v9, %v3385_v18  ;;  %v3387_v49 = vpop.f32.mrb[53].mxu1  ;;  %v9898_v48 = vmax.f32 %v4812_v62, %v4346_v14 }
 0x3c7   : > { %v3389_v52 = vpop.f32.mrb[54].mxu1  ;;  %v4380_v53 = vpop.f32.mrb[140].mxu0 }
 0x3c8   : > { %v4797_v2 = vmax.f32 %v4781_v36, %v3387_v49  ;;  %v4782_v35 = vmax.f32 %v9805_v47, %v3389_v52  ;;  %v3391_v21 = vpop.f32.mrb[55].mxu1  ;;  %v4382_v9 = vpop.f32.mrb[141].mxu0 }
 0x3c9   : > { %v4384_v14 = vpop.f32.mrb[142].mxu0 }
 0x3ca   : > { %v4798_v3 = vmax.f32 %v4782_v35, %v3391_v21  ;;  %4106 = vmatmul.mubr.bf16.gmra.mrb[128].mxu1 %v8638_v7  ;;  %v4813_v40 = vmax.f32 %v4797_v2, %v4350_v31  ;;  %v4386_v47 = vpop.f32.mrb[143].mxu0 }
 0x3cb   : > { %4115 = vmatprep.mubr.bf16.mxu1 %v10672_v20 }
 0x3cc   : > { %v9903_v8 = vmax.f32 %v4813_v40, %v4352_v44  ;;  %v4814_v12 = vmax.f32 %v4798_v3, %v4354_v16 }
 0x3cd   : > { %v3395_v37 = vpop.f32.mrb[56].mxu1 }
 0x3ce   : > { %v4783_v57 = vmax.f32 %v9815_v19, %v3395_v37  ;;  %v3397_v42 = vpop.f32.mrb[57].mxu1  ;;  %v9906_v17 = vmax.f32 %v4814_v12, %v4356_v50 }
 0x3cf   : > { %v3399_v32 = vpop.f32.mrb[58].mxu1  ;;  %v4390_v16 = vpop.f32.mrb[144].mxu0 }
 0x3d0   : > { %v4799_v55 = vmax.f32 %v4783_v57, %v3397_v42  ;;  %v4784_v7 = vmax.f32 %v9817_v41, %v3399_v32  ;;  %v3401_v31 = vpop.f32.mrb[59].mxu1  ;;  %v4392_v19 = vpop.f32.mrb[145].mxu0 }
 0x3d1   : > { %v4394_v50 = vpop.f32.mrb[146].mxu0 }
 0x3d2   : > { %v4800_v26 = vmax.f32 %v4784_v7, %v3401_v31  ;;  %4116 = vmatmul.mubr.bf16.gmra.mrb[132].mxu1 %v8665_v24  ;;  %v4815_v44 = vmax.f32 %v4799_v55, %v4360_v1  ;;  %v4396_v41 = vpop.f32.mrb[147].mxu0 }
 0x3d3   : > { %4125 = vmatprep.mubr.bf16.mxu1 %v10672_v20 }
 0x3d4   : > { %v9911_v10 = vmax.f32 %v4815_v44, %v4362_v34  ;;  %v4816_v59 = vmax.f32 %v4800_v26, %v4364_v5 }
 0x3d5   : > { %v3405_v25 = vpop.f32.mrb[60].mxu1 }
 0x3d6   : > { %v4785_v62 = vmax.f32 %v9827_v45, %v3405_v25  ;;  %v3407_v18 = vpop.f32.mrb[61].mxu1  ;;  %v9914_v36 = vmax.f32 %v4816_v59, %v4366_v6 }
 0x3d7   : > { %v3409_v49 = vpop.f32.mrb[62].mxu1  ;;  %v4400_v5 = vpop.f32.mrb[148].mxu0 }
 0x3d8   : > { %v4801_v52 = vmax.f32 %v4785_v62, %v3407_v18  ;;  %v4786_v24 = vmax.f32 %v9829_v23, %v3409_v49  ;;  %v3411_v1 = vpop.f32.mrb[63].mxu1  ;;  %v4402_v45 = vpop.f32.mrb[149].mxu0 }
 0x3d9   : > { %v4404_v6 = vpop.f32.mrb[150].mxu0 }
 0x3da   : > { %v4802_v2 = vmax.f32 %v4786_v24, %v3411_v1  ;;  %4126 = vmatmul.mubr.bf16.gmra.mrb[136].mxu1 %v8679_v28  ;;  %v4817_v34 = vmax.f32 %v4801_v52, %v4370_v0  ;;  %v4406_v23 = vpop.f32.mrb[151].mxu0 }
 0x3db   : > { %4135 = vmatprep.mubr.bf16.mxu1 %v10672_v20 }
 0x3dc   : > { %v9919_v35 = vmax.f32 %v4817_v34, %v4372_v54  ;;  %v4818_v21 = vmax.f32 %v4802_v2, %v4374_v38 }
 0x3dd   : > { %v3415_v3 = vpop.f32.mrb[64].mxu1 }
 0x3de   : > { %v4787_v40 = vmax.f32 %v9839_v33, %v3415_v3  ;;  %v3417_v12 = vpop.f32.mrb[65].mxu1  ;;  %v9922_v37 = vmax.f32 %v4818_v21, %v4376_v27 }
 0x3df   : > { %v3419_v57 = vpop.f32.mrb[66].mxu1 }
 0x3e0   : > { %v4803_v42 = vmax.f32 %v4787_v40, %v3417_v12  ;;  %v4788_v28 = vmax.f32 %v9841_v29, %v3419_v57  ;;  %v3421_v0 = vpop.f32.mrb[67].mxu1 }
 0x3e2   : > { %v4804_v32 = vmax.f32 %v4788_v28, %v3421_v0  ;;  %4136 = vmatmul.mubr.bf16.gmra.mrb[108].mxu1 %v10746_v56  ;;  %v4819_v54 = vmax.f32 %v4803_v42, %v4380_v53 }
 0x3e3   : > { %4145 = vmatprep.mubr.bf16.mxu1 %v10672_v20 }
 0x3e4   : > { %v9927_v38 = vmax.f32 %v4819_v54, %v4382_v9  ;;  %v4820_v55 = vmax.f32 %v4804_v32, %v4384_v14 }
 0x3e5   : > { %v3425_v7 = vpop.f32.mrb[68].mxu1 }
 0x3e6   : > { %v4789_v33 = vmax.f32 %v9851_v51, %v3425_v7  ;;  %v3427_v27 = vpop.f32.mrb[69].mxu1  ;;  %v9930_v31 = vmax.f32 %v4820_v55, %v4386_v47 }
 0x3e7   : > { %v3429_v26 = vpop.f32.mrb[70].mxu1 }
 0x3e8   : > { %v4805_v44 = vmax.f32 %v4789_v33, %v3427_v27  ;;  %v4790_v29 = vmax.f32 %v9853_v46, %v3429_v26  ;;  %v3431_v59 = vpop.f32.mrb[71].mxu1 }
 0x3ea   : > { %v4806_v25 = vmax.f32 %v4790_v29, %v3431_v59  ;;  %4146 = vmatmul.mubr.bf16.gmra.mrb[112].mxu1 %v10752_v39  ;;  %v4821_v56 = vmax.f32 %v4805_v44, %v4390_v16 }
 0x3eb   : > { %4155 = vmatprep.mubr.bf16.mxu1 %v10672_v20 }
 0x3ec   : > { %v9935_v53 = vmax.f32 %v4821_v56, %v4392_v19  ;;  %v4822_v9 = vmax.f32 %v4806_v25, %v4394_v50 }
 0x3ed   : > { %v3435_v14 = vpop.f32.mrb[72].mxu1 }
 0x3ee   : > { %v4791_v51 = vmax.f32 %v9863_v60, %v3435_v14  ;;  %v3437_v62 = vpop.f32.mrb[73].mxu1  ;;  %v9938_v47 = vmax.f32 %v4822_v9, %v4396_v41 }
 0x3ef   : > { %v3439_v18 = vpop.f32.mrb[74].mxu1 }
 0x3f0   : > { %v4807_v49 = vmax.f32 %v4791_v51, %v3437_v62  ;;  %v4792_v46 = vmax.f32 %v9865_v11, %v3439_v18  ;;  %v3441_v52 = vpop.f32.mrb[75].mxu1 }
 0x3f2   : > { %v4808_v24 = vmax.f32 %v4792_v46, %v3441_v52  ;;  %4156 = vmatmul.mubr.bf16.gmra.mrb[116].mxu1 %v8609_v30  ;;  %v4823_v39 = vmax.f32 %v4807_v49, %v4400_v5 }
 0x3f3   : > { %4165 = vmatprep.mubr.bf16.mxu1 %v10672_v20 }
 0x3f4   : > { %v9943_v16 = vmax.f32 %v4823_v39, %v4402_v45  ;;  %v4824_v19 = vmax.f32 %v4808_v24, %v4404_v6 }
 0x3f6   : > { %v9945_v50 = vmax.f32 %v4824_v19, %v4406_v23 }
 0x3fa   : > { %4166 = vmatmul.mubr.bf16.gmra.mrb[120].mxu1 %v8630_v13 }
 0x3fb   : > { %4175 = vmatprep.mubr.bf16.mxu1 %v10672_v20 }
 0x402   : > { %4176 = vmatmul.mubr.bf16.gmra.mrb[124].mxu1 %v10761_v4 }
 0x403   : > { %4185 = vmatprep.mubr.bf16.mxu1 %v10672_v20 }
 0x40a   : > { %4186 = vmatmul.mubr.bf16.gmra.mrb[128].mxu1 %v10792_v58 }
 0x40b   : > { %4195 = vmatprep.mubr.bf16.mxu1 %v10672_v20 }
 0x412   : > { %4196 = vmatmul.mubr.bf16.gmra.mrb[132].mxu1 %v10793_v15 }
 0x413   : > { %4205 = vmatprep.mubr.bf16.mxu1 %v10672_v20 }
 0x41a   : > { %4206 = vmatmul.mubr.bf16.gmra.mrb[136].mxu1 %v10794_v43 }
 0x435   : > { %v3751_v30 = vpop.f32.mrb[76].mxu1 }
 0x436   : > { %v4841_v60 = vmax.f32 %v9887_v63, %v3751_v30  ;;  %v3753_v13 = vpop.f32.mrb[77].mxu1 }
 0x437   : > { %v3755_v11 = vpop.f32.mrb[78].mxu1 }
 0x438   : > { %v9957_v41 = vmax.f32 %v4841_v60, %v3753_v13  ;;  %v4842_v4 = vmax.f32 %v9890_v22, %v3755_v11  ;;  %v3757_v1 = vpop.f32.mrb[79].mxu1  ;;  %v5105_v11 = vld [vmem:[%s10420_s12] sm:$0xff] }
 0x439   : > { %6565 = vmatprep.mubr.msk.f32.mxu1 %vm10798_vm0, %v5105_v11 }
 0x43a   : > { %v9960_v2 = vmax.f32 %v4842_v4, %v3757_v1  ;;  %v10010_v4 = vpop.permute.xlu1 %4936 }
 0x43d   : > { %v3761_v58 = vpop.f32.mrb[80].mxu1 }
 0x43e   : > { %v4843_v34 = vmax.f32 %v9895_v61, %v3761_v58  ;;  %v3763_v15 = vpop.f32.mrb[81].mxu1  ;;  %v10014_v1 = vpop.permute.xlu1 %4992 }
 0x43f   : > { %v3765_v5 = vpop.f32.mrb[82].mxu1 }
 0x440   : > { %v9963_v20 = vmax.f32 %v4843_v34, %v3763_v15  ;;  %v4844_v43 = vmax.f32 %v9898_v48, %v3765_v5  ;;  %v3767_v21 = vpop.f32.mrb[83].mxu1 }
 0x442   : > { %v9966_v63 = vmax.f32 %v4844_v43, %v3767_v21 }
 0x445   : > { %v3771_v45 = vpop.f32.mrb[84].mxu1 }
 0x446   : > { %v4845_v3 = vmax.f32 %v9903_v8, %v3771_v45  ;;  %v3773_v6 = vpop.f32.mrb[85].mxu1 }
 0x447   : > { %v3775_v22 = vpop.f32.mrb[86].mxu1 }
 0x448   : > { %v9969_v40 = vmax.f32 %v4845_v3, %v3773_v6  ;;  %v4846_v12 = vmax.f32 %v9906_v17, %v3775_v22  ;;  %v3777_v23 = vpop.f32.mrb[87].mxu1 }
 0x44a   : > { %v9972_v61 = vmax.f32 %v4846_v12, %v3777_v23 }
 0x44d   : > { %v3781_v57 = vpop.f32.mrb[88].mxu1 }
 0x44e   : > { %v4847_v42 = vmax.f32 %v9911_v10, %v3781_v57  ;;  %v3783_v28 = vpop.f32.mrb[89].mxu1 }
 0x44f   : > { %v3785_v48 = vpop.f32.mrb[90].mxu1 }
 0x450   : > { %v9975_v0 = vmax.f32 %v4847_v42, %v3783_v28  ;;  %v4848_v32 = vmax.f32 %v9914_v36, %v3785_v48  ;;  %v3787_v54 = vpop.f32.mrb[91].mxu1 }
 0x452   : > { %v9978_v8 = vmax.f32 %v4848_v32, %v3787_v54 }
 0x455   : > { %v3791_v55 = vpop.f32.mrb[92].mxu1 }
 0x456   : > { %v4849_v7 = vmax.f32 %v9919_v35, %v3791_v55  ;;  %v3793_v33 = vpop.f32.mrb[93].mxu1 }
 0x457   : > { %v3795_v17 = vpop.f32.mrb[94].mxu1 }
 0x458   : > { %v9981_v27 = vmax.f32 %v4849_v7, %v3793_v33  ;;  %v4850_v26 = vmax.f32 %v9922_v37, %v3795_v17  ;;  %v3797_v44 = vpop.f32.mrb[95].mxu1 }
 0x45a   : > { %v9984_v10 = vmax.f32 %v4850_v26, %v3797_v44 }
 0x45d   : > { %v3801_v29 = vpop.f32.mrb[96].mxu1 }
 0x45e   : > { %v4851_v59 = vmax.f32 %v9927_v38, %v3801_v29  ;;  %v3803_v25 = vpop.f32.mrb[97].mxu1 }
 0x45f   : > { %v3805_v36 = vpop.f32.mrb[98].mxu1 }
 0x460   : > { %v9987_v56 = vmax.f32 %v4851_v59, %v3803_v25  ;;  %v4852_v9 = vmax.f32 %v9930_v31, %v3805_v36  ;;  %v3807_v14 = vpop.f32.mrb[99].mxu1 }
 0x462   : > { %v9990_v35 = vmax.f32 %v4852_v9, %v3807_v14 }
 0x465   : > { %v3811_v51 = vpop.f32.mrb[100].mxu1 }
 0x466   : > { %v4853_v62 = vmax.f32 %v9935_v53, %v3811_v51  ;;  %v3813_v18 = vpop.f32.mrb[101].mxu1 }
 0x467   : > { %v3815_v37 = vpop.f32.mrb[102].mxu1 }
 0x468   : > { %v9993_v49 = vmax.f32 %v4853_v62, %v3813_v18  ;;  %v4854_v46 = vmax.f32 %v9938_v47, %v3815_v37  ;;  %v3817_v52 = vpop.f32.mrb[103].mxu1  ;;  %v10008_v47 = vpop.permute.xlu0 %4931 }
 0x46a   : > { %v9996_v38 = vmax.f32 %v4854_v46, %v3817_v52 }
 0x46d   : > { %v3821_v24 = vpop.f32.mrb[104].mxu1 }
 0x46e   : > { %v4855_v39 = vmax.f32 %v9943_v16, %v3821_v24  ;;  %v3823_v19 = vpop.f32.mrb[105].mxu1  ;;  %v10012_v16 = vpop.permute.xlu0 %4987 }
 0x46f   : > { %v3825_v31 = vpop.f32.mrb[106].mxu1 }
 0x470   : > { %v9999_v30 = vmax.f32 %v4855_v39, %v3823_v19  ;;  %v4856_v60 = vmax.f32 %v9945_v50, %v3825_v31  ;;  %v3827_v13 = vpop.f32.mrb[107].mxu1  ;;  %v10018_v50 = vpop.permute.xlu1 %4946 }
 0x472   : > { %v10002_v53 = vmax.f32 %v4856_v60, %v3827_v13  ;;  %v10016_v58 = vpop.permute.xlu0 %4941 }
 0x474   : > { %v10022_v15 = vpop.permute.xlu1 %5048 }
 0x476   : > { %v10020_v34 = vpop.permute.xlu0 %5043 }
 0x478   : > { %v10028_v57 = vpop.permute.xlu1 %1394 }
 0x47a   : > { %v10026_v12 = vpop.permute.xlu0 %1389 }
 0x47c   : > { %v10034_v33 = vpop.permute.xlu1 %5002 }
 0x47e   : > { %v10031_v32 = vpop.permute.xlu0 %4997 }
 0x480   : > { %v10039_v59 = vpop.permute.xlu1 %4956 }
 0x482   : > { %v10036_v17 = vpop.permute.xlu0 %4951 }
 0x484   : > { %v10048_v51 = vpop.permute.xlu1 %5058 }
 0x488   : > { %v10058_v19 = vpop.permute.xlu1 %1404 }
 0x4b5   : > { %v4137_v5 = vpop.f32.mrb[108].mxu1 }
 0x4b6   : > { %v4873_v43 = vmax.f32 %v9957_v41, %v4137_v5  ;;  %v4139_v21 = vpop.f32.mrb[109].mxu1 }
 0x4b7   : > { %v4141_v45 = vpop.f32.mrb[110].mxu1 }
 0x4b8   : > { %v4889_v3 = vmax.f32 %v4873_v43, %v4139_v21  ;;  %v4874_v6 = vmax.f32 %v9960_v2, %v4141_v45  ;;  %v4143_v22 = vpop.f32.mrb[111].mxu1  ;;  %v10064_v45 = vpop.permute.xlu1 %5012 }
 0x4ba   : > { %v4890_v23 = vmax.f32 %v4874_v6, %v4143_v22  ;;  %v10799_v22 = vld [vmem:[#allocation27_spill] sm:$0xff] }
 0x4bd   : > { %v4147_v42 = vpop.f32.mrb[112].mxu1 }
 0x4be   : > { %v4875_v28 = vmax.f32 %v9963_v20, %v4147_v42  ;;  %v4149_v48 = vpop.f32.mrb[113].mxu1 }
 0x4bf   : > { %v4151_v54 = vpop.f32.mrb[114].mxu1 }
 0x4c0   : > { %v4891_v55 = vmax.f32 %v4875_v28, %v4149_v48  ;;  %v4876_v41 = vmax.f32 %v9966_v63, %v4151_v54  ;;  %v4153_v7 = vpop.f32.mrb[115].mxu1  ;;  %v10046_v63 = vpop.permute.xlu0 %5053 }
 0x4c2   : > { %v4892_v2 = vmax.f32 %v4876_v41, %v4153_v7  ;;  %v10800_v41 = vld [vmem:[#allocation26_spill] sm:$0xff] }
 0x4c4   : > { %v10054_v39 = vpop.permute.xlu0 %1399 }
 0x4c5   : > { %v4157_v26 = vpop.f32.mrb[116].mxu1 }
 0x4c6   : > { %v4877_v44 = vmax.f32 %v9969_v40, %v4157_v26  ;;  %v4159_v29 = vpop.f32.mrb[117].mxu1 }
 0x4c7   : > { %v4161_v20 = vpop.f32.mrb[118].mxu1 }
 0x4c8   : > { %v10041_v25 = vmax.f32 %v4877_v44, %v4159_v29  ;;  %v4878_v36 = vmax.f32 %v9972_v61, %v4161_v20  ;;  %v4163_v9 = vpop.f32.mrb[119].mxu1  ;;  %v10061_v11 = vpop.permute.xlu0 %5007 }
 0x4ca   : > { %v10044_v14 = vmax.f32 %v4878_v36, %v4163_v9 }
 0x4cc   : > { %v10067_v48 = vpop.permute.xlu0 %4961 }
 0x4cd   : > { %v4167_v62 = vpop.f32.mrb[120].mxu1 }
 0x4ce   : > { %v4879_v18 = vmax.f32 %v9975_v0, %v4167_v62  ;;  %v4169_v37 = vpop.f32.mrb[121].mxu1 }
 0x4cf   : > { %v4171_v40 = vpop.f32.mrb[122].mxu1 }
 0x4d0   : > { %v10051_v46 = vmax.f32 %v4879_v18, %v4169_v37  ;;  %v4880_v52 = vmax.f32 %v9978_v8, %v4171_v40  ;;  %v4173_v24 = vpop.f32.mrb[123].mxu1  ;;  %v5064_v37 = vpop.permute.xlu0 %5063  ;;  %v10801_v40 = vld [vmem:[#allocation29_spill] sm:$0xff] }
 0x4d2   : > { %v10056_v61 = vmax.f32 %v4880_v52, %v4173_v24 }
 0x4d5   : > { %v4177_v31 = vpop.f32.mrb[124].mxu1 }
 0x4d6   : > { %v4881_v60 = vmax.f32 %v9981_v27, %v4177_v31  ;;  %v4179_v13 = vpop.f32.mrb[125].mxu1 }
 0x4d7   : > { %v4181_v0 = vpop.f32.mrb[126].mxu1 }
 0x4d8   : > { %v4897_v5 = vmax.f32 %v4881_v60, %v4179_v13  ;;  %v4882_v43 = vmax.f32 %v9984_v10, %v4181_v0  ;;  %v4183_v21 = vpop.f32.mrb[127].mxu1  ;;  %v10072_v10 = vpop.permute.xlu1 %4966 }
 0x4da   : > { %v4905_v8 = vadd.f32 %v4897_v5, %v4889_v3  ;;  %v4898_v6 = vmax.f32 %v4882_v43, %v4183_v21  ;;  %v10804_v43 = vld [vmem:[#allocation28_spill] sm:$0xff] }
 0x4dc   : > { %v4913_v42 = vadd.f32 %v4905_v8, %v10799_v22  ;;  %v4906_v28 = vadd.f32 %v4898_v6, %v4890_v23  ;;  %v5069_v13 = vpop.permute.xlu1 %5068 }
 0x4dd   : > { %v4187_v54 = vpop.f32.mrb[128].mxu1 }
 0x4de   : > { %v4969_v27 = vadd.f32 %v10008_v47, %v4913_v42  ;;  %v4914_v7 = vadd.f32 %v10800_v41, %v4906_v28  ;;  %v4883_v26 = vmax.f32 %v9987_v56, %v4187_v54  ;;  %v4189_v44 = vpop.f32.mrb[129].mxu1 }
 0x4df   : > { %v4191_v29 = vpop.f32.mrb[130].mxu1 }
 0x4e0   : > { %v4970_v3 = vadd.f32 %v10010_v4, %v4914_v7  ;;  %v4899_v20 = vmax.f32 %v4883_v26, %v4189_v44  ;;  %v4884_v36 = vmax.f32 %v9990_v35, %v4191_v29  ;;  %v4193_v23 = vpop.f32.mrb[131].mxu1  ;;  %v5025_v9 = vmul.f32 %v10012_v16, %v4969_v27  ;;  %v7059_v4 = vld [vmem:[%s7288_s24] sm:$0xff]  ;;  %v10802_v35 = vld [vmem:[#allocation60_spill] sm:$0xff]  ;;  %v10803_v16 = vld [vmem:[#allocation53_spill] sm:$0xff]  ;;  %v1410_v27 = vpop.permute.xlu0 %1409 }
 0x4e1   : > { %v1523_v0 = vadd.f32 %v10802_v35, %v10028_v57  ;;  %v1415_v44 = vpop.permute.xlu1 %1414 }
 0x4e2   : > { %v4907_v62 = vadd.f32 %v4899_v20, %v4891_v55  ;;  %v4900_v18 = vmax.f32 %v4884_v36, %v4193_v23  ;;  %v5026_v47 = vmul.f32 %v10014_v1, %v4970_v3  ;;  %v5081_v56 = vadd.f32 %v10020_v34, %v5025_v9  ;;  %v10807_v36 = vld [vmem:[#allocation16_spill] sm:$0xff] }
 0x4e3   : > { %v1518_v55 = vadd.f32 %v10803_v16, %v10026_v12  ;;  %v1528_v23 = vadd.f32 %v10807_v36, %v10054_v39 }
 0x4e4   : > { %v4915_v52 = vadd.f32 %v4907_v62, %v10801_v40  ;;  %v4908_v24 = vadd.f32 %v4900_v18, %v4892_v2  ;;  %v5082_v31 = vadd.f32 %v10022_v15, %v5026_v47  ;;  %v5089_v60 = vadd.f32 %v7059_v4, %v5081_v56  ;;  %v7060_v2 = vld [vmem:[%s7288_s24 + $0x8] sm:$0xff]  ;;  %v7062_v40 = vld [vmem:[%s7288_s24 + $0x18] sm:$0xff] }
 0x4e5   : > { %v4197_v5 = vpop.f32.mrb[132].mxu1 }
 0x4e6   : > { %v4971_v1 = vadd.f32 %v10016_v58, %v4915_v52  ;;  %v4916_v34 = vadd.f32 %v10804_v43, %v4908_v24  ;;  %v4885_v21 = vmax.f32 %v9993_v49, %v4197_v5  ;;  %v4199_v8 = vpop.f32.mrb[133].mxu1  ;;  %v5090_v6 = vadd.f32 %v7060_v2, %v5082_v31 }
 0x4e7   : > { %v4201_v15 = vpop.f32.mrb[134].mxu1  ;;  %v10090_v22 = vadd.f32 %v5089_v60, %v1518_v55 }
 0x4e8   : > { %v4972_v42 = vadd.f32 %v10018_v50, %v4916_v34  ;;  %v4901_v28 = vmax.f32 %v4885_v21, %v4199_v8  ;;  %v4886_v57 = vmax.f32 %v9996_v38, %v4201_v15  ;;  %v4203_v54 = vpop.f32.mrb[135].mxu1  ;;  %v10094_v12 = vadd.f32 %v5090_v6, %v1523_v0  ;;  %v10805_v38 = vld [vmem:[#allocation31_spill] sm:$0xff]  ;;  %v10810_v8 = vld [vmem:[#allocation42_spill] sm:$0xff]  ;;  %v10811_v6 = vld [vmem:[#allocation41_spill] sm:$0xff] }
 0x4e9   : > { %v5027_v58 = vmul.f32 %v10031_v32, %v4971_v1  ;;  %v10806_v32 = vld [vmem:[#allocation17_spill] sm:$0xff]  ;;  %v1538_v2 = vadd.f32 %v10810_v8, %v1410_v27  ;;  %v1543_v15 = vadd.f32 %v10811_v6, %v1415_v44 }
 0x4ea   : > { %v4909_v49 = vadd.f32 %v4901_v28, %v10041_v25  ;;  %v4902_v41 = vmax.f32 %v4886_v57, %v4203_v54  ;;  %v6665_v7 = vpack.c.bf16 %v10094_v12, %v10090_v22  ;;  %v5028_v26 = vmul.f32 %v10034_v33, %v4972_v42  ;;  %v7061_v33 = vld [vmem:[%s7288_s24 + $0x10] sm:$0xff]  ;;  %v10812_v28 = vld [vmem:[#allocation32_spill] sm:$0xff] }
 0x4eb   : > { %v5083_v50 = vadd.f32 %v10046_v63, %v5027_v58  ;;  %v1533_v25 = vadd.f32 %v10806_v32, %v10058_v19  ;;  %v10808_v63 = vld [vmem:[#allocation30_spill] sm:$0xff]  ;;  %v10809_v1 = vld [vmem:[#allocation33_spill] sm:$0xff] }
 0x4ec   : > { %v4917_v29 = vadd.f32 %v4909_v49, %v10805_v38  ;;  %v4910_v3 = vadd.f32 %v4902_v41, %v10044_v14  ;;  %6666 = vmatprep.subr.bf16.mxu1 %v6665_v7  ;;  %v5084_v20 = vadd.f32 %v10048_v51, %v5028_v26  ;;  %v5018_v51 = vpop.permute.xlu0 %5017  ;;  %v10813_v26 = vld [vmem:[#allocation44_spill] sm:$0xff]  ;;  %v7065_v38 = vld [vmem:[%s7288_s24 + $0x30] sm:$0xff] }
 0x4ed   : > { %v4207_v9 = vpop.f32.mrb[136].mxu1  ;;  %6668 = vmatpush3.bf16.msra.mxu1 %v6665_v7  ;;  %v5091_v62 = vadd.f32 %v7061_v33, %v5083_v50  ;;  %v5106_v33 = vld [vmem:[%s10420_s12 + $0x8] sm:$0xff] }
 0x4ee   : > { %v4973_v18 = vadd.f32 %v10036_v17, %v4917_v29  ;;  %v4918_v47 = vadd.f32 %v10808_v63, %v4910_v3  ;;  %v4887_v56 = vmax.f32 %v9999_v30, %v4207_v9  ;;  %v4209_v14 = vpop.f32.mrb[137].mxu1  ;;  %v5092_v52 = vadd.f32 %v7062_v40, %v5084_v20  ;;  %v5023_v17 = vpop.permute.xlu1 %5022  ;;  %v10814_v20 = vld [vmem:[#allocation43_spill] sm:$0xff] }
 0x4ef   : > { %v4211_v24 = vpop.f32.mrb[138].mxu1  ;;  %v10114_v31 = vadd.f32 %v5091_v62, %v1528_v23  ;;  %v5107_v62 = vld [vmem:[%s10420_s12 + $0x10] sm:$0xff]  ;;  %v5109_v63 = vld [vmem:[%s10420_s12 + $0x20] sm:$0xff] }
 0x4f0   : > { %v4974_v19 = vadd.f32 %v10039_v59, %v4918_v47  ;;  %v4903_v39 = vmax.f32 %v4887_v56, %v4209_v14  ;;  %v4888_v4 = vmax.f32 %v10002_v53, %v4211_v24  ;;  %v4213_v60 = vpop.f32.mrb[139].mxu1  ;;  %v10118_v35 = vadd.f32 %v5092_v52, %v1533_v25  ;;  %v5074_v21 = vpop.permute.xlu0 %5073  ;;  %v5110_v47 = vld [vmem:[%s10420_s12 + $0x28] sm:$0xff]  ;;  %v5111_v56 = vld [vmem:[%s10420_s12 + $0x30] sm:$0xff]  ;;  %v5112_v14 = vld [vmem:[%s10420_s12 + $0x38] sm:$0xff] }
 0x4f1   : > { %v5029_v0 = vmul.f32 %v10061_v11, %v4973_v18  ;;  %v7063_v11 = vld [vmem:[%s7288_s24 + $0x20] sm:$0xff]  ;;  %v5108_v18 = vld [vmem:[%s10420_s12 + $0x18] sm:$0xff]  ;;  %v5114_v52 = vld [vmem:[%s10420_s12 + $0x48] sm:$0xff] }
 0x4f2   : > { %v4911_v30 = vadd.f32 %v4903_v39, %v10051_v46  ;;  %v4904_v16 = vmax.f32 %v4888_v4, %v4213_v60  ;;  %v6669_v55 = vpack.c.bf16 %v10118_v35, %v10114_v31  ;;  %v5030_v5 = vmul.f32 %v10064_v45, %v4974_v19  ;;  %v5079_v54 = vpop.permute.xlu1 %5078  ;;  %v5113_v40 = vld [vmem:[%s10420_s12 + $0x40] sm:$0xff]  ;;  %v5116_v24 = vld [vmem:[%s10420_s12 + $0x58] sm:$0xff]  ;;  %v5118_v39 = vld [vmem:[%s10420_s12 + $0x68] sm:$0xff] }
 0x4f3   : > { %v5085_v59 = vadd.f32 %v5064_v37, %v5029_v0  ;;  %v7064_v37 = vld [vmem:[%s7288_s24 + $0x28] sm:$0xff]  ;;  %v5117_v19 = vld [vmem:[%s10420_s12 + $0x60] sm:$0xff]  ;;  %v5119_v4 = vld [vmem:[%s10420_s12 + $0x70] sm:$0xff] }
 0x4f4   : > { %v4919_v43 = vadd.f32 %v4911_v30, %v10809_v1  ;;  %v4912_v53 = vadd.f32 %v4904_v16, %v10056_v61  ;;  %6670 = vmatprep.subr.bf16.mxu1 %v6669_v55  ;;  %v5086_v34 = vadd.f32 %v5069_v13, %v5030_v5  ;;  %v5120_v60 = vld [vmem:[%s10420_s12 + $0x78] sm:$0xff] }
 0x4f5   : > { %6672 = vmatpush3.bf16.msra.mxu1 %v6669_v55  ;;  %v5093_v46 = vadd.f32 %v7063_v11, %v5085_v59 }
 0x4f6   : > { %v4975_v42 = vadd.f32 %v10067_v48, %v4919_v43  ;;  %v4920_v45 = vadd.f32 %v10812_v28, %v4912_v53  ;;  %v5094_v57 = vadd.f32 %v7064_v37, %v5086_v34  ;;  %v1420_v48 = vpop.permute.xlu0 %1419  ;;  %v1425_v3 = vpop.permute.xlu1 %1424 }
 0x4f7   : > { %v10133_v58 = vadd.f32 %v5093_v46, %v1538_v2  ;;  %v1548_v44 = vadd.f32 %v10813_v26, %v1420_v48  ;;  %v1553_v32 = vadd.f32 %v10814_v20, %v1425_v3 }
 0x4f8   : > { %v4976_v61 = vadd.f32 %v10072_v10, %v4920_v45  ;;  %v10136_v13 = vadd.f32 %v5094_v57, %v1543_v15  ;;  %v5031_v27 = vmul.f32 %v5018_v51, %v4975_v42  ;;  %v7066_v10 = vld [vmem:[%s7288_s24 + $0x38] sm:$0xff]  ;;  %v5115_v51 = vld [vmem:[%s10420_s12 + $0x50] sm:$0xff]  ;;  %s7071_s24 = sshll.u32 %s7133_s17, 4  ;;  %s7072_s24 = int_to_ptr.vmem [resolvable:$false] %s7071_s24 }
 0x4f9   : > { %s7073_s20 = scalar_lea.vmem %s7072_s24, 2048  ;;  %p7074_p0 = scmp.lt.s32.totalorder %s10362_s27, %s7072_s24 }
 0x4fa   : > { %v6673_v49 = vpack.c.bf16 %v10136_v13, %v10133_v58  ;;  %v5032_v41 = vmul.f32 %v5023_v17, %v4976_v61  ;;  %v5087_v7 = vadd.f32 %v5074_v21, %v5031_v27  ;;  %v5554_v17 = vld [vmem:[%s10422_s14] sm:$0xff]  ;;  %v5145_v0 = vpop.permute.xlu1 %5144  ;;  %v5140_v30 = vpop.permute.xlu0 %5139  ;;  %p7075_p1 = scmp.lt.s32.totalorder %s7073_s20, %s7067_s16 }
 0x4fb   : > { %6621 = vmatprep.mubr.f32.mxu0 %v5554_v17 }
 0x4fc   : > { %6674 = vmatprep.subr.bf16.mxu1 %v6673_v49  ;;  %v5088_v50 = vadd.f32 %v5079_v54, %v5032_v41  ;;  %v5095_v29 = vadd.f32 %v7065_v38, %v5087_v7  ;;  %p7076_p2 = por %p7075_p1, %p7074_p0 }
 0x4fd   : > { %6676 = vmatpush3.bf16.msra.mxu1 %v6673_v49 }
 0x4fe   : > { %v5096_v25 = vadd.f32 %v7066_v10, %v5088_v50  ;;  %v10144_v36 = vadd.f32 %v5095_v29, %v1548_v44  ;;  %v5155_v16 = vpop.permute.xlu1 %5154  ;;  %v5150_v55 = vpop.permute.xlu0 %5149  ;;  %p7077_p3 = pnand %p7076_p2, %p7070_p13 }
 0x500   : > { %v10146_v23 = vadd.f32 %v5096_v25, %v1553_v32 }
 0x502   : > { %v6677_v9 = vpack.c.bf16 %v10146_v23, %v10144_v36  ;;  %v5165_v5 = vpop.permute.xlu1 %5164  ;;  %v5160_v59 = vpop.permute.xlu0 %5159 }
 0x504   : > { %6678 = vmatprep.subr.bf16.mxu1 %v6677_v9 }
 0x505   : > { %6680 = vmatpush3.bf16.msra.mxu1 %v6677_v9 }
 0x506   : > { %v5175_v8 = vpop.permute.xlu1 %5174  ;;  %v5170_v46 = vpop.permute.xlu0 %5169 }
 0x508   : > { %6566 = vmatmul.mubr.msk.f32.vlgmr.msra.gmra.mrb[140].mxu1 %vm10815_vm13, %v5106_v33 }
 0x509   : > { %6568 = vmatprep.mubr.msk.f32.mxu1 %vm10816_vm14, %v5107_v62 }
 0x50a   : > { %v5185_v26 = vpop.permute.xlu1 %5184  ;;  %v5180_v29 = vpop.permute.xlu0 %5179 }
 0x50c   : > { %6569 = vmatmul.mubr.msk.f32.gmra.mrb[142].mxu1 %vm10817_vm15, %v5108_v18 }
 0x50d   : > { %6571 = vmatprep.mubr.msk.f32.mxu1 %vm10818_vm6, %v5109_v63 }
 0x50e   : > { %v5190_v17 = vpop.permute.xlu0 %5189 }
 0x510   : > { %6572 = vmatmul.mubr.msk.f32.gmra.mrb[144].mxu1 %vm10819_vm4, %v5110_v47 }
 0x511   : > { %6574 = vmatprep.mubr.msk.f32.mxu1 %vm10820_vm2, %v5111_v56 }
 0x514   : > { %6575 = vmatmul.mubr.msk.f32.gmra.mrb[146].mxu1 %vm10821_vm10, %v5112_v14 }
 0x515   : > { %6577 = vmatprep.mubr.msk.f32.mxu1 %vm10822_vm5, %v5113_v40 }
 0x518   : > { %6578 = vmatmul.mubr.msk.f32.gmra.mrb[148].mxu1 %vm10823_vm3, %v5114_v52 }
 0x519   : > { %6580 = vmatprep.mubr.msk.f32.mxu1 %vm10824_vm7, %v5115_v51 }
 0x51c   : > { %6581 = vmatmul.mubr.msk.f32.gmra.mrb[150].mxu1 %vm10825_vm11, %v5116_v24  ;;  %v5195_v24 = vpop.permute.xlu1 %5194 }
 0x51d   : > { %6583 = vmatprep.mubr.msk.f32.mxu1 %vm10826_vm1, %v5117_v19 }
 0x520   : > { %6584 = vmatmul.mubr.msk.f32.gmra.mrb[152].mxu1 %vm10827_vm12, %v5118_v39 }
 0x521   : > { %6586 = vmatprep.mubr.msk.f32.mxu1 %vm10828_vm8, %v5119_v4 }
 0x524   : > { %6587 = vmatmul.mubr.msk.f32.gmra.mrb[154].mxu1 %vm10829_vm9, %v5120_v60 }
 0x5db   : > { %v6567_v1 = vpop.f32.mrb[140].mxu1 }
 0x5dc   : > { %v10213_v43 = vadd.f32 %v6567_v1, %v5145_v0  ;;  %v5331_v53 = vpop.f32.mrb[141].mxu1 }
 0x5dd   : > { %v10215_v34 = vadd.f32 %v5331_v53, %v5140_v30 }
 0x5de   : > { %v5411_v21 = vmul.f32 %v10213_v43, %v10213_v43 }
 0x5df   : > { %v5410_v2 = vmul.f32 %v10215_v34, %v10215_v34  ;;  %v6570_v11 = vpop.f32.mrb[142].mxu1 }
 0x5e0   : > { %v5427_v6 = vmul.f32 %v5411_v21, %v10213_v43  ;;  %v10222_v15 = vadd.f32 %v6570_v11, %v5155_v16  ;;  %v5341_v42 = vpop.f32.mrb[143].mxu1 }
 0x5e1   : > { %v5426_v28 = vmul.f32 %v5410_v2, %v10215_v34  ;;  %v10225_v45 = vadd.f32 %v5341_v42, %v5150_v55 }
 0x5e2   : > { %v5443_v37 = vmul.f32 0.044715, %v5427_v6  ;;  %v5413_v57 = vmul.f32 %v10222_v15, %v10222_v15 }
 0x5e3   : > { %v5442_v54 = vmul.f32 0.044715, %v5426_v28  ;;  %v5412_v61 = vmul.f32 %v10225_v45, %v10225_v45  ;;  %v6573_v27 = vpop.f32.mrb[144].mxu1 }
 0x5e4   : > { %v5459_v49 = vadd.f32 %v5443_v37, %v10213_v43  ;;  %v5429_v41 = vmul.f32 %v5413_v57, %v10222_v15  ;;  %v10233_v7 = vadd.f32 %v6573_v27, %v5165_v5  ;;  %v5351_v48 = vpop.f32.mrb[145].mxu1 }
 0x5e5   : > { %v5458_v44 = vadd.f32 %v5442_v54, %v10215_v34  ;;  %v5428_v50 = vmul.f32 %v5412_v61, %v10225_v45  ;;  %v10237_v38 = vadd.f32 %v5351_v48, %v5160_v59  ;;  %v5205_v61 = vpop.permute.xlu1 %5204 }
 0x5e6   : > { %v5475_v3 = vmul.f32 0.7978846, %v5459_v49  ;;  %v5445_v20 = vmul.f32 0.044715, %v5429_v41  ;;  %v5415_v32 = vmul.f32 %v10233_v7, %v10233_v7 }
 0x5e7   : > { %v5474_v10 = vmul.f32 0.7978846, %v5458_v44  ;;  %v5444_v25 = vmul.f32 0.044715, %v5428_v50  ;;  %v5414_v9 = vmul.f32 %v10237_v38, %v10237_v38  ;;  %v6576_v33 = vpop.f32.mrb[146].mxu1 }
 0x5e8   : > { %7027 = vtanh.f32 %v5475_v3  ;;  %v5461_v62 = vadd.f32 %v5445_v20, %v10222_v15  ;;  %v5431_v18 = vmul.f32 %v5415_v32, %v10233_v7  ;;  %v10245_v63 = vadd.f32 %v6576_v33, %v5175_v8  ;;  %v5361_v47 = vpop.f32.mrb[147].mxu1 }
 0x5e9   : > { %7029 = vtanh.f32 %v5474_v10  ;;  %v5460_v56 = vadd.f32 %v5444_v25, %v10225_v45  ;;  %v5430_v14 = vmul.f32 %v5414_v9, %v10237_v38  ;;  %v10249_v40 = vadd.f32 %v5361_v47, %v5170_v46 }
 0x5ea   : > { %v5447_v52 = vmul.f32 0.044715, %v5431_v18  ;;  %v5417_v51 = vmul.f32 %v10245_v63, %v10245_v63  ;;  %v5477_v19 = vmul.f32 0.7978846, %v5461_v62 }
 0x5eb   : > { %v5446_v39 = vmul.f32 0.044715, %v5430_v14  ;;  %v5416_v4 = vmul.f32 %v10249_v40, %v10249_v40  ;;  %v6579_v60 = vpop.f32.mrb[148].mxu1  ;;  %v5476_v0 = vmul.f32 0.7978846, %v5460_v56 }
 0x5ec   : > { %v5463_v30 = vadd.f32 %v5447_v52, %v10233_v7  ;;  %v5433_v16 = vmul.f32 %v5417_v51, %v10245_v63  ;;  %v10257_v55 = vadd.f32 %v6579_v60, %v5185_v26  ;;  %v5371_v5 = vpop.f32.mrb[149].mxu1  ;;  %7031 = vtanh.f32 %v5477_v19  ;;  %v5200_v26 = vpop.permute.xlu0 %5199 }
 0x5ed   : > { %v5462_v59 = vadd.f32 %v5446_v39, %v10237_v38  ;;  %v5432_v1 = vmul.f32 %v5416_v4, %v10249_v40  ;;  %v10261_v53 = vadd.f32 %v5371_v5, %v5180_v29  ;;  %7033 = vtanh.f32 %v5476_v0  ;;  %v5215_v4 = vpop.permute.xlu1 %5214 }
 0x5ee   : > { %v5479_v21 = vmul.f32 0.7978846, %v5463_v30  ;;  %v5449_v8 = vmul.f32 0.044715, %v5433_v16  ;;  %v5419_v2 = vmul.f32 %v10257_v55, %v10257_v55 }
 0x5ef   : > { %v5478_v11 = vmul.f32 0.7978846, %v5462_v59  ;;  %v5448_v46 = vmul.f32 0.044715, %v5432_v1  ;;  %v5418_v6 = vmul.f32 %v10261_v53, %v10261_v53  ;;  %v6582_v42 = vpop.f32.mrb[150].mxu1 }
 0x5f0   : > { %v5465_v28 = vadd.f32 %v5449_v8, %v10245_v63  ;;  %v5435_v37 = vmul.f32 %v5419_v2, %v10257_v55  ;;  %v10269_v57 = vadd.f32 %v6582_v42, %v5195_v24  ;;  %v5381_v54 = vpop.f32.mrb[151].mxu1  ;;  %7035 = vtanh.f32 %v5479_v21  ;;  %v5210_v5 = vpop.permute.xlu0 %5209 }
 0x5f1   : > { %v5464_v27 = vadd.f32 %v5448_v46, %v10249_v40  ;;  %v5434_v49 = vmul.f32 %v5418_v6, %v10261_v53  ;;  %v10273_v41 = vadd.f32 %v5381_v54, %v5190_v17  ;;  %7037 = vtanh.f32 %v5478_v11 }
 0x5f2   : > { %v7028_v48 = vpop.eup %7027  ;;  %v5481_v44 = vmul.f32 0.7978846, %v5465_v28  ;;  %v5451_v50 = vmul.f32 0.044715, %v5435_v37  ;;  %v5421_v29 = vmul.f32 %v10269_v57, %v10269_v57 }
 0x5f3   : > { %v7030_v3 = vpop.eup %7029  ;;  %v5480_v20 = vmul.f32 0.7978846, %v5464_v27  ;;  %v5450_v32 = vmul.f32 0.044715, %v5434_v49  ;;  %v5420_v10 = vmul.f32 %v10273_v41, %v10273_v41  ;;  %v6585_v25 = vpop.f32.mrb[152].mxu1  ;;  %v5507_v9 = vadd.f32 1.0, %v7028_v48 }
 0x5f4   : > { %7039 = vtanh.f32 %v5481_v44  ;;  %v5467_v33 = vadd.f32 %v5451_v50, %v10257_v55  ;;  %v5437_v62 = vmul.f32 %v5421_v29, %v10269_v57  ;;  %v10281_v18 = vadd.f32 %v6585_v25, %v5205_v61  ;;  %v5391_v47 = vpop.f32.mrb[153].mxu1 }
 0x5f5   : > { %7041 = vtanh.f32 %v5480_v20  ;;  %v5466_v56 = vadd.f32 %v5450_v32, %v10261_v53  ;;  %v5436_v14 = vmul.f32 %v5420_v10, %v10273_v41  ;;  %v10285_v52 = vadd.f32 %v5391_v47, %v5200_v26 }
 0x5f6   : > { %v5483_v51 = vmul.f32 0.7978846, %v5467_v33  ;;  %v5453_v24 = vmul.f32 0.044715, %v5437_v62  ;;  %v5423_v19 = vmul.f32 %v10281_v18, %v10281_v18  ;;  %v5506_v39 = vadd.f32 1.0, %v7030_v3  ;;  %v7032_v2 = vpop.eup %7031 }
 0x5f7   : > { %v5482_v60 = vmul.f32 0.7978846, %v5466_v56  ;;  %v5452_v17 = vmul.f32 0.044715, %v5436_v14  ;;  %v5422_v0 = vmul.f32 %v10285_v52, %v10285_v52  ;;  %v6588_v30 = vpop.f32.mrb[154].mxu1  ;;  %v5523_v16 = vmul.f32 0.5, %v5507_v9  ;;  %v7034_v42 = vpop.eup %7033 }
 0x5f8   : > { %7043 = vtanh.f32 %v5483_v51  ;;  %v5469_v59 = vadd.f32 %v5453_v24, %v10269_v57  ;;  %v5439_v1 = vmul.f32 %v5423_v19, %v10281_v18  ;;  %v10293_v21 = vadd.f32 %v6588_v30, %v5215_v4  ;;  %v5401_v8 = vpop.f32.mrb[155].mxu1 }
 0x5f9   : > { %7045 = vtanh.f32 %v5482_v60  ;;  %v5468_v11 = vadd.f32 %v5452_v17, %v10273_v41  ;;  %v5438_v46 = vmul.f32 %v5422_v0, %v10285_v52  ;;  %v10297_v6 = vadd.f32 %v5401_v8, %v5210_v5 }
 0x5fa   : > { %v5485_v28 = vmul.f32 0.7978846, %v5469_v59  ;;  %v5455_v37 = vmul.f32 0.044715, %v5439_v1  ;;  %v5425_v54 = vmul.f32 %v10293_v21, %v10293_v21  ;;  %v5522_v61 = vmul.f32 0.5, %v5506_v39  ;;  %v7036_v27 = vpop.eup %7035 }
 0x5fb   : > { %v5484_v49 = vmul.f32 0.7978846, %v5468_v11  ;;  %v5454_v48 = vmul.f32 0.044715, %v5438_v46  ;;  %v5424_v26 = vmul.f32 %v10297_v6, %v10297_v6  ;;  %v5539_v44 = vmul.f32 %v5523_v16, %v10213_v43  ;;  %v7038_v50 = vpop.eup %7037 }
 0x5fc   : > { %7047 = vtanh.f32 %v5485_v28  ;;  %v5471_v29 = vadd.f32 %v5455_v37, %v10281_v18  ;;  %v5441_v3 = vmul.f32 %v5425_v54, %v10293_v21  ;;  %v5538_v20 = vmul.f32 %v5522_v61, %v10215_v34 }
 0x5fd   : > { %7049 = vtanh.f32 %v5484_v49  ;;  %v5470_v32 = vadd.f32 %v5454_v48, %v10285_v52  ;;  %v5440_v10 = vmul.f32 %v5424_v26, %v10297_v6  ;;  %v5508_v25 = vadd.f32 1.0, %v7034_v42 }
 0x5fe   : > { %v7040_v9 = vpop.eup %7039  ;;  %v5487_v33 = vmul.f32 0.7978846, %v5471_v29  ;;  %v5457_v62 = vmul.f32 0.044715, %v5441_v3  ;;  %v6681_v47 = vpack.c.bf16 %v5539_v44, %v5538_v20  ;;  %v5509_v56 = vadd.f32 1.0, %v7032_v2 }
 0x5ff   : > { %v7042_v43 = vpop.eup %7041  ;;  %v5486_v14 = vmul.f32 0.7978846, %v5470_v32  ;;  %v5456_v51 = vmul.f32 0.044715, %v5440_v10  ;;  %v5524_v24 = vmul.f32 0.5, %v5508_v25  ;;  %v5510_v19 = vadd.f32 1.0, %v7038_v50 }
 0x600   : > { %7051 = vtanh.f32 %v5487_v33  ;;  %v5473_v39 = vadd.f32 %v5457_v62, %v10293_v21  ;;  %6682 = vmatprep.subr.bf16.mxu0 %v6681_v47  ;;  %v5525_v34 = vmul.f32 0.5, %v5509_v56  ;;  %v5511_v4 = vadd.f32 1.0, %v7036_v27 }
 0x601   : > { %7053 = vtanh.f32 %v5486_v14  ;;  %v5472_v60 = vadd.f32 %v5456_v51, %v10297_v6  ;;  %6684 = vmatpush3.bf16.msra.mxu0 %v6681_v47  ;;  %v5540_v17 = vmul.f32 %v5524_v24, %v10225_v45  ;;  %v5526_v0 = vmul.f32 0.5, %v5510_v19 }
 0x602   : > { %v7044_v30 = vpop.eup %7043  ;;  %v5489_v16 = vmul.f32 0.7978846, %v5473_v39  ;;  %v5541_v5 = vmul.f32 %v5525_v34, %v10222_v15  ;;  %v5527_v59 = vmul.f32 0.5, %v5511_v4  ;;  %v5512_v1 = vadd.f32 1.0, %v7042_v43 }
 0x603   : > { %v7046_v8 = vpop.eup %7045  ;;  %v5488_v2 = vmul.f32 0.7978846, %v5472_v60  ;;  %v5542_v11 = vmul.f32 %v5526_v0, %v10237_v38  ;;  %v5513_v46 = vadd.f32 1.0, %v7040_v9  ;;  %v5515_v42 = vadd.f32 1.0, %v7044_v30  ;;  %v5559_v0 = vld [vmem:[%s10422_s14 + $0x28] sm:$0xff]  ;;  %v5560_v30 = vld [vmem:[%s10422_s14 + $0x30] sm:$0xff] }
 0x604   : > { %7055 = vtanh.f32 %v5489_v16  ;;  %v6685_v28 = vpack.c.bf16 %v5541_v5, %v5540_v17  ;;  %v5543_v37 = vmul.f32 %v5527_v59, %v10233_v7  ;;  %v5528_v54 = vmul.f32 0.5, %v5512_v1  ;;  %v5561_v16 = vld [vmem:[%s10422_s14 + $0x38] sm:$0xff] }
 0x605   : > { %7057 = vtanh.f32 %v5488_v2  ;;  %v5529_v45 = vmul.f32 0.5, %v5513_v46  ;;  %v5514_v61 = vadd.f32 1.0, %v7046_v8  ;;  %v5531_v27 = vmul.f32 0.5, %v5515_v42 }
 0x606   : > { %v7048_v49 = vpop.eup %7047  ;;  %6686 = vmatprep.subr.bf16.mxu0 %v6685_v28  ;;  %v6689_v15 = vpack.c.bf16 %v5543_v37, %v5542_v11  ;;  %v5544_v48 = vmul.f32 %v5528_v54, %v10249_v40 }
 0x607   : > { %v7050_v26 = vpop.eup %7049  ;;  %6688 = vmatpush3.bf16.msra.mxu0 %v6685_v28  ;;  %v5545_v38 = vmul.f32 %v5529_v45, %v10245_v63  ;;  %v5530_v44 = vmul.f32 0.5, %v5514_v61  ;;  %v5547_v50 = vmul.f32 %v5531_v27, %v10257_v55  ;;  %v5517_v29 = vadd.f32 1.0, %v7048_v49 }
 0x608   : > { %6690 = vmatprep.subr.bf16.mxu0 %v6689_v15  ;;  %v5516_v7 = vadd.f32 1.0, %v7050_v26 }
 0x609   : > { %v6693_v3 = vpack.c.bf16 %v5545_v38, %v5544_v48  ;;  %v5546_v20 = vmul.f32 %v5530_v44, %v10261_v53  ;;  %v5533_v32 = vmul.f32 0.5, %v5517_v29 }
 0x60a   : > { %v7052_v10 = vpop.eup %7051  ;;  %v5532_v25 = vmul.f32 0.5, %v5516_v7 }
 0x60b   : > { %v7054_v9 = vpop.eup %7053  ;;  %6692 = vmatpush3.bf16.msra.mxu0 %v6689_v15  ;;  %v6697_v33 = vpack.c.bf16 %v5547_v50, %v5546_v20  ;;  %v5549_v40 = vmul.f32 %v5533_v32, %v10269_v57  ;;  %v5519_v62 = vadd.f32 1.0, %v7052_v10 }
 0x60c   : > { %6694 = vmatprep.subr.bf16.mxu0 %v6693_v3  ;;  %v5548_v63 = vmul.f32 %v5532_v25, %v10273_v41  ;;  %v5518_v47 = vadd.f32 1.0, %v7054_v9 }
 0x60d   : > { %v5535_v55 = vmul.f32 0.5, %v5519_v62 }
 0x60e   : > { %v7056_v56 = vpop.eup %7055  ;;  %v6701_v43 = vpack.c.bf16 %v5549_v40, %v5548_v63  ;;  %v5534_v14 = vmul.f32 0.5, %v5518_v47 }
 0x60f   : > { %v7058_v51 = vpop.eup %7057  ;;  %6696 = vmatpush3.bf16.msra.mxu0 %v6693_v3  ;;  %v5551_v53 = vmul.f32 %v5535_v55, %v10281_v18  ;;  %v5521_v24 = vadd.f32 1.0, %v7056_v56  ;;  %v5555_v18 = vld [vmem:[%s10422_s14 + $0x8] sm:$0xff] }
 0x610   : > { %6698 = vmatprep.subr.bf16.mxu0 %v6697_v33  ;;  %v5550_v19 = vmul.f32 %v5534_v14, %v10285_v52  ;;  %v5520_v39 = vadd.f32 1.0, %v7058_v51  ;;  %v5556_v52 = vld [vmem:[%s10422_s14 + $0x10] sm:$0xff] }
 0x611   : > { %v5537_v34 = vmul.f32 0.5, %v5521_v24 }
 0x612   : > { %v6705_v57 = vpack.c.bf16 %v5551_v53, %v5550_v19  ;;  %v5536_v4 = vmul.f32 0.5, %v5520_v39 }
 0x613   : > { %6700 = vmatpush3.bf16.msra.mxu0 %v6697_v33  ;;  %v5553_v41 = vmul.f32 %v5537_v34, %v10293_v21  ;;  %v5557_v21 = vld [vmem:[%s10422_s14 + $0x18] sm:$0xff] }
 0x614   : > { %6702 = vmatprep.subr.bf16.mxu0 %v6701_v43  ;;  %v5552_v60 = vmul.f32 %v5536_v4, %v10297_v6  ;;  %v5558_v6 = vld [vmem:[%s10422_s14 + $0x20] sm:$0xff] }
 0x616   : > { %v6709_v17 = vpack.c.bf16 %v5553_v41, %v5552_v60 }
 0x617   : > { %6704 = vmatpush3.bf16.msra.mxu0 %v6701_v43 }
 0x618   : > { %6706 = vmatprep.subr.bf16.mxu0 %v6705_v57 }
 0x61b   : > { %6708 = vmatpush3.bf16.msra.mxu0 %v6705_v57 }
 0x61c   : > { %6710 = vmatprep.subr.bf16.mxu0 %v6709_v17 }
 0x61f   : > { %6712 = vmatpush3.bf16.msra.mxu0 %v6709_v17 }
 0x622   : > { %6622 = vmatmul.mubr.f32.vlgmr.msra.gmra.mrb[152].mxu0 %v5555_v18 }
 0x623   : > { %6624 = vmatprep.mubr.f32.mxu0 %v5556_v52 }
 0x626   : > { %6625 = vmatmul.mubr.f32.gmra.mrb[154].mxu0 %v5557_v21 }
 0x627   : > { %6627 = vmatprep.mubr.f32.mxu0 %v5558_v6 }
 0x62a   : > { %6628 = vmatmul.mubr.f32.gmra.mrb[156].mxu0 %v5559_v0 }
 0x62b   : > { %6630 = vmatprep.mubr.f32.mxu0 %v5560_v30 }
 0x62e   : > { %6631 = vmatmul.mubr.f32.gmra.mrb[158].mxu0 %v5561_v16 }
 0x6f5   : > { %v6623_v5 = vpop.f32.mrb[152].mxu0 }
 0x6f6   : > { %v5668_v59 = vadd.f32 %v6623_v5, %v10094_v12  ;;  %v5628_v1 = vpop.f32.mrb[153].mxu0 }
 0x6f7   : > { %v5667_v8 = vadd.f32 %v5628_v1, %v10090_v22 }
 0x6f8   : > { %5676 = vst [vmem:[%s515_s21 + $0x8] sm:$0xff] %v5668_v59 }
 0x6f9   : > { %5675 = vst [vmem:[%s515_s21] sm:$0xff] %v5667_v8  ;;  %v6626_v2 = vpop.f32.mrb[154].mxu0 }
 0x6fa   : > { %v5670_v11 = vadd.f32 %v6626_v2, %v10118_v35  ;;  %v5638_v46 = vpop.f32.mrb[155].mxu0 }
 0x6fb   : > { %v5669_v42 = vadd.f32 %v5638_v46, %v10114_v31 }
 0x6fc   : > { %5678 = vst [vmem:[%s515_s21 + $0x18] sm:$0xff] %v5670_v11 }
 0x6fd   : > { %5677 = vst [vmem:[%s515_s21 + $0x10] sm:$0xff] %v5669_v42  ;;  %v6629_v28 = vpop.f32.mrb[156].mxu0 }
 0x6fe   : > { %v5672_v37 = vadd.f32 %v6629_v28, %v10136_v13  ;;  %v5648_v12 = vpop.f32.mrb[157].mxu0 }
 0x6ff   : > { %v5671_v54 = vadd.f32 %v5648_v12, %v10133_v58 }
 0x700   : > { %5680 = vst [vmem:[%s515_s21 + $0x28] sm:$0xff] %v5672_v37 }
 0x701   : > { %5679 = vst [vmem:[%s515_s21 + $0x20] sm:$0xff] %v5671_v54  ;;  %v6632_v22 = vpop.f32.mrb[158].mxu0 }
 0x702   : > { %v5674_v35 = vadd.f32 %v6632_v22, %v10146_v23  ;;  %v5658_v45 = vpop.f32.mrb[159].mxu0 }
 0x703   : > { %v5673_v31 = vadd.f32 %v5658_v45, %v10144_v36 }
 0x704   : > { %5682 = vst [vmem:[%s515_s21 + $0x38] sm:$0xff] %v5674_v35 }
 0x705   : > { %5681 = vst [vmem:[%s515_s21 + $0x30] sm:$0xff] %v5673_v31 }
 0x706   : > { %7080 = shalt.err (!%p7077_p3)
}
 0x707   : > { %s7081_s23 = scalar_lea.hbm %s10360_s29, 1024  ;;  %s7085_s21 = scalar_lea.hbm %s10423_s15, 2048 }
 0x708   : > { %p7082_p4 = scmp.ne.s32.totalorder %s10360_s29, %s7081_s23  ;;  %p7086_p9 = scmp.lt.u32.totalorder %s10360_s29, %s10423_s15 }
 0x709   : > { %p7087_p10 = scmp.lt.u32.totalorder %s7085_s21, %s7081_s23  ;;  %p7089_p12 = scmp.lt.u32.totalorder %s7081_s23, %s10360_s29 }
 0x70a   : > { %p7083_p7 = pnand %p7082_p4, %p7254_p5 }
 0x70b   : > { %p7088_p11 = por %p7087_p10, %p7086_p9 }
 0x70c   : > { %p7084_p8 = pneg %p7083_p7 }
 0x70d   : > { %p7090_p13 = por %p7089_p12, %p7088_p11 }
 0x70f   : > { %p7091_p0 = pnand %p7090_p13, %p7084_p8 }
 0x711   : > { %7094 = shalt.err (!%p7091_p0)
}
 0x712   : > { %s7134_s0 = smov 128   ;;  %s7135_s16 = smov 8  }
 0x713   : > { %6970 = dma.vmem_to_hbm [thread:$0]  (%p7254_p5), %s10362_s27, 1024, %s10360_s29, %s10367_s22, %s7134_s0, %s7134_s0, %s7135_s16  }
 0x714 PF: > { %s10830_s17 = sld [smem:[#allocation7_spill]]  ;;  %s10831_s24 = sld [smem:[#allocation5_spill]] }
 0x71a   : > { %p6976_p1 = scmp.ge.s32.totalorder %s10830_s17, 2  ;;  %s5712_s18 = sand.u32 1, %s10831_s24  }
 0x71b   : > { %s5713_s23 = scalar_lea.sflag [#allocation3], %s5712_s18 }
 0x71c   : > { %p6973_p2 = pnand %p6976_p1, %p7258_p6 }
 0x71e   : > { %7112 = dma.done.wait (!%p6973_p2), %s5713_s23, 1024  }
 0x71f   : > { %7114 = vsyncadd (!%p6973_p2), %s5713_s23, 4294966272  ;;  %s10833_s21 = sld [smem:[#allocation8_spill]]  ;;  %s10834_s25 = sld [smem:[#allocation6_spill]] }
 0x720   : > { %s10835_s20 = sld [smem:[#allocation9_spill]]  ;;  %s10836_s18 = smov %s7121_s19 }
 0x725   : > { %p25_p3 = scmp.ge.s32.totalorder %s10833_s21, 4   ;;  %s10837_s19 = smov %s10834_s25 }
 0x727   :  { %27 = sbr.rel (!%p25_p3) target bundleno = 5 (0x5), region = 121 }
 0x72e   :  { %5718 = vsyncpa [#allocation3], 1 }
 0x72f   :  { %5720 = vsyncpa [#allocation3 + $0x1], 1 }

</bundles_post_ra>
